<compile_context>
chip_gen: v7x
topology: tpu7x:2x2x1
jax: 0.10.0
libtpu: 0.0.40
codegen_flags: <defaults>
</compile_context>

<pallas_src>
import functools
import math

import jax
import jax.numpy as jnp
from jax.experimental import pallas as pl
from jax.experimental.pallas import tpu as pltpu


def _tile_len(n, tile):
    # Block length along a row axis: full extent for small arrays (always a
    # legal block shape), otherwise the requested tile (multiple of 8) with
    # ragged trailing blocks handled by Pallas.
    return n if n <= tile else tile


def _vmem_limit_bytes():
    # Generation-aware VMEM budget (v5e/v6e: 128 MiB, v7x: 64 MiB per TC).
    try:
        cap = int(pltpu.get_tpu_info().vmem_capacity_bytes)
    except Exception:
        cap = 64 * 1024 * 1024
    return max(32 * 1024 * 1024, min(int(cap * 7 // 10), 112 * 1024 * 1024))


# ----------------------------------------------------------------------------
# Row-tiled linear layer (optionally with fused row-masking epilogue)
# ----------------------------------------------------------------------------
def _linear_kernel(x_ref, w_ref, b_ref, o_ref):
    o_ref[...] = (
        jnp.dot(x_ref[...], w_ref[...], preferred_element_type=jnp.float32)
        + b_ref[...]).astype(o_ref.dtype)


def _linear_mask_kernel(x_ref, w_ref, b_ref, keep_ref, o_ref):
    y = (jnp.dot(x_ref[...], w_ref[...], preferred_element_type=jnp.float32)
         + b_ref[...])
    o_ref[...] = (y * keep_ref[...]).astype(o_ref.dtype)


def pallas_linear(x, w, b, keep=None, *, tile_rows=512):
    """x: (N, d_in) @ w: (d_in, d_out) + b; rows with keep==0 are zeroed."""
    n, d_in = x.shape
    d_out = w.shape[1]
    tm = _tile_len(n, tile_rows)

    in_specs = [
        pl.BlockSpec((tm, d_in), lambda i: (i, 0)),
        pl.BlockSpec((d_in, d_out), lambda i: (0, 0)),
        pl.BlockSpec((1, d_out), lambda i: (0, 0)),
    ]
    args = [x, w, b.reshape(1, d_out)]
    kernel = _linear_kernel
    if keep is not None:
        in_specs.append(pl.BlockSpec((tm, 1), lambda i: (i, 0)))
        args.append(keep.reshape(n, 1).astype(x.dtype))
        kernel = _linear_mask_kernel

    return pl.pallas_call(
        kernel,
        out_shape=jax.ShapeDtypeStruct((n, d_out), x.dtype),
        grid=(pl.cdiv(n, tm),),
        in_specs=in_specs,
        out_specs=pl.BlockSpec((tm, d_out), lambda i: (i, 0)),
        compiler_params=pltpu.CompilerParams(
            dimension_semantics=("parallel",)),
    )(*args)


# ----------------------------------------------------------------------------
# Fused softmax + reference-point arithmetic + meta packing
# ----------------------------------------------------------------------------
def _meta_pack_kernel(raw_ref, ref_ref, sel_ref, invn_ref, meta_ref, *,
                      num_heads, num_levels, num_points):
    hlp = num_heads * num_levels * num_points
    lp = num_levels * num_points
    raw = raw_ref[0]                                    # (TQ, 3*HLP)
    tq = raw.shape[0]
    off_x = raw[:, 0 * hlp:1 * hlp]
    off_y = raw[:, 1 * hlp:2 * hlp]
    logits = raw[:, 2 * hlp:3 * hlp]

    refs = ref_ref[0]                                   # (TQ, 2*L)
    ref_x = refs[:, :num_levels]
    ref_y = refs[:, num_levels:]
    sel = sel_ref[...]                                  # (L, HLP) 0/1 selector
    invn = invn_ref[...]                                # (1, 2*HLP)
    inv_x = invn[:, :hlp]
    inv_y = invn[:, hlp:]

    # loc = reference_point(level of column) + offset / (W_l, H_l)
    loc_x = off_x * inv_x
    loc_y = off_y * inv_y
    for lvl in range(num_levels):
        loc_x = loc_x + ref_x[:, lvl:lvl + 1] * sel[lvl:lvl + 1, :]
        loc_y = loc_y + ref_y[:, lvl:lvl + 1] * sel[lvl:lvl + 1, :]

    # per-head softmax over the (levels * points) axis
    lg = logits.reshape(tq, num_heads, lp)
    lg = lg - jnp.max(lg, axis=-1, keepdims=True)
    e = jnp.exp(lg)
    attn = (e / jnp.sum(e, axis=-1, keepdims=True)).reshape(tq, hlp)

    meta_ref[0] = jnp.concatenate([loc_x, loc_y, attn],
                                  axis=-1).astype(meta_ref.dtype)


def meta_pack_pallas(raw, reference_points, spatial_shapes, *, num_heads,
                     num_points, q_tile=256):
    """raw: (B, Q, 3*H*L*P) [off_x | off_y | logits], ref: (B, Q, L, 2)
    -> meta (B, Q, 3*H*L*P) [loc_x | loc_y | attn]."""
    b, q, three_hlp = raw.shape
    num_levels = len(spatial_shapes)
    hlp = three_hlp // 3
    assert three_hlp == 3 * hlp and hlp == num_heads * num_levels * num_points

    # reference points laid out as [x per level | y per level]
    ref_flat = jnp.concatenate(
        [reference_points[..., 0], reference_points[..., 1]], axis=-1)

    # tiny per-column constants (level selector / inverse normalizers)
    cols = jnp.arange(hlp, dtype=jnp.int32)
    col_lvl = (cols // num_points) % num_levels
    sel = (col_lvl[None, :] == jnp.arange(num_levels, dtype=jnp.int32)[:, None]
           ).astype(jnp.float32)                                   # (L, HLP)
    inv_w = jnp.asarray([1.0 / float(w) for _, w in spatial_shapes],
                        jnp.float32)
    inv_h = jnp.asarray([1.0 / float(h) for h, _ in spatial_shapes],
                        jnp.float32)
    invn = jnp.concatenate([jnp.take(inv_w, col_lvl),
                            jnp.take(inv_h, col_lvl)])[None, :]    # (1, 2HLP)

    tq = _tile_len(q, q_tile)
    kernel = functools.partial(_meta_pack_kernel, num_heads=num_heads,
                               num_levels=num_levels, num_points=num_points)
    return pl.pallas_call(
        kernel,
        out_shape=jax.ShapeDtypeStruct((b, q, three_hlp), raw.dtype),
        grid=(b, pl.cdiv(q, tq)),
        in_specs=[
            pl.BlockSpec((1, tq, three_hlp), lambda bi, qi: (bi, qi, 0)),
            pl.BlockSpec((1, tq, 2 * num_levels), lambda bi, qi: (bi, qi, 0)),
            pl.BlockSpec((num_levels, hlp), lambda bi, qi: (0, 0)),
            pl.BlockSpec((1, 2 * hlp), lambda bi, qi: (0, 0)),
        ],
        out_specs=pl.BlockSpec((1, tq, three_hlp), lambda bi, qi: (bi, qi, 0)),
        compiler_params=pltpu.CompilerParams(
            dimension_semantics=("parallel", "parallel")),
    )(raw, ref_flat, sel, invn)


# ----------------------------------------------------------------------------
# Core multi-scale deformable attention kernel (separable bilinear hat)
# ----------------------------------------------------------------------------
def _msda_core_kernel(value_ref, meta_ref, out_ref, *, spatial_shapes,
                      num_heads, num_levels, num_points, head_dim, mxu_dtype):
    # value_ref : (1, S, d_model)     one batch element, all heads on lanes
    # meta_ref  : (1, TQ, 3*H*L*P)    packed [loc_x | loc_y | attn]
    # out_ref   : (1, TQ, d_model)
    meta = meta_ref[0]
    hlp = num_heads * num_levels * num_points
    loc_x = meta[:, 0 * hlp:1 * hlp]
    loc_y = meta[:, 1 * hlp:2 * hlp]
    attn = meta[:, 2 * hlp:3 * hlp]
    tq = meta.shape[0]

    accs = [jnp.zeros((tq, head_dim), jnp.float32) for _ in range(num_heads)]

    start = 0
    for lvl, (h_l, w_l) in enumerate(spatial_shapes):
        hw = h_l * w_l
        # Loop-invariant pixel-index vectors (integer iota, tiny shapes).
        col = jax.lax.broadcasted_iota(
            jnp.int32, (1, w_l), 1).astype(jnp.float32)          # (1, W)
        row = jax.lax.broadcasted_iota(
            jnp.int32, (1, h_l), 1).astype(jnp.float32)          # (1, H)

        # TODO(synk): for levels with large H*W (> ~2k) switch to a sparse
        # 4-corner gather of the value slab instead of this dense-hat matmul,
        # and accumulate `combined` in lane chunks to keep it vreg-resident.
        for h in range(num_heads):
            base = h * num_levels * num_points + lvl * num_points
            combined = jnp.zeros((tq, h_l, w_l), jnp.float32)
            for pt in range(num_points):
                c = base + pt
                lx = loc_x[:, c:c + 1] * float(w_l) - 0.5        # (TQ, 1)
                ly = loc_y[:, c:c + 1] * float(h_l) - 0.5        # (TQ, 1)
                aw = attn[:, c:c + 1]                            # (TQ, 1)
                # Separable bilinear hat: only (TQ, W) + (TQ, H) VPU work per
                # point; the full (TQ, H, W) plane sees one multiply-add.
                wx = jnp.maximum(0.0, 1.0 - jnp.abs(lx - col))        # (TQ,W)
                wy = jnp.maximum(0.0, 1.0 - jnp.abs(ly - row)) * aw   # (TQ,H)
                combined = combined + wy[:, :, None] * wx[:, None, :]

            v_h = value_ref[0, start:start + hw,
                            h * head_dim:(h + 1) * head_dim]     # (HW, D)
            flat = combined.reshape(tq, hw)
            if mxu_dtype is not None:
                flat = flat.astype(mxu_dtype)
                v_h = v_h.astype(mxu_dtype)
            accs[h] = accs[h] + jnp.dot(flat, v_h,
                                        preferred_element_type=jnp.float32)
        start += hw

    out_ref[0] = jnp.concatenate(accs, axis=-1).astype(out_ref.dtype)


def msda_core_from_meta(value2d, meta, spatial_shapes, *, num_heads,
                        num_points, head_dim, q_tile=256, use_bf16_mxu=False,
                        out_dtype=None):
    """value2d: (B, S, d_model) head-major channels-last; meta: (B, Q, 3HLP)."""
    b, s, d_model = value2d.shape
    _, q, three_hlp = meta.shape
    num_levels = len(spatial_shapes)
    hlp = num_heads * num_levels * num_points
    assert three_hlp == 3 * hlp
    assert sum(int(h) * int(w) for h, w in spatial_shapes) == s
    out_dtype = out_dtype if out_dtype is not None else value2d.dtype

    if use_bf16_mxu and value2d.dtype == jnp.float32:
        # bf16 value slab: halves the resident VMEM footprint (v7x) and feeds
        # the MXU at its native rate; accumulation stays f32.
        value2d = value2d.astype(jnp.bfloat16)

    tq = _tile_len(q, q_tile)
    kernel = functools.partial(
        _msda_core_kernel,
        spatial_shapes=tuple((int(hh), int(ww)) for hh, ww in spatial_shapes),
        num_heads=num_heads, num_levels=num_levels, num_points=num_points,
        head_dim=head_dim,
        mxu_dtype=jnp.bfloat16 if use_bf16_mxu else None)

    return pl.pallas_call(
        kernel,
        out_shape=jax.ShapeDtypeStruct((b, q, d_model), out_dtype),
        grid=(b, pl.cdiv(q, tq)),
        in_specs=[
            # value slab keyed only on batch -> stays resident across Q tiles
            pl.BlockSpec((1, s, d_model), lambda bi, qi: (bi, 0, 0)),
            pl.BlockSpec((1, tq, 3 * hlp), lambda bi, qi: (bi, qi, 0)),
        ],
        out_specs=pl.BlockSpec((1, tq, d_model), lambda bi, qi: (bi, qi, 0)),
        compiler_params=pltpu.CompilerParams(
            dimension_semantics=("parallel", "parallel"),
            vmem_limit_bytes=_vmem_limit_bytes()),
    )(value2d, meta)


def msda_core_pallas(value, spatial_shapes, sampling_locations,
                     attention_weights, *, q_tile=256, use_bf16_mxu=False):
    """value: (B,S,H,D), loc: (B,Q,H,L,P,2), attn: (B,Q,H,L,P) -> (B,Q,H*D)."""
    b, s, hn, d = value.shape
    _, q, _, l, p, _ = sampling_locations.shape
    hlp = hn * l * p
    v2d = value.reshape(b, s, hn * d)
    loc = sampling_locations.reshape(b, q, hlp, 2)
    meta = jnp.concatenate(
        [loc[..., 0], loc[..., 1], attention_weights.reshape(b, q, hlp)],
        axis=-1)
    return msda_core_from_meta(
        v2d, meta, spatial_shapes, num_heads=hn, num_points=p, head_dim=d,
        q_tile=q_tile, use_bf16_mxu=use_bf16_mxu, out_dtype=value.dtype)


# ----------------------------------------------------------------------------
# Pure-JAX references (for correctness checks)
# ----------------------------------------------------------------------------
def ref_core(value, spatial_shapes, sampling_locations, attention_weights):
    b, s, hn, d = value.shape
    _, q, _, l, p, _ = sampling_locations.shape
    out = jnp.zeros((b, q, hn, d), jnp.float32)
    b_idx = jnp.arange(b)[:, None, None, None]
    h_idx = jnp.arange(hn)[None, None, :, None]
    start = 0
    for lvl, (h_l, w_l) in enumerate(spatial_shapes):
        v = value[:, start:start + h_l * w_l].reshape(b, h_l, w_l, hn, d)
        loc = sampling_locations[:, :, :, lvl]                  # (B,Q,H,P,2)
        x = loc[..., 0] * w_l - 0.5
        y = loc[..., 1] * h_l - 0.5
        x0 = jnp.floor(x)
        y0 = jnp.floor(y)
        samp = jnp.zeros((b, q, hn, p, d), jnp.float32)
        for dy in (0.0, 1.0):
            for dx in (0.0, 1.0):
                xi = x0 + dx
                yi = y0 + dy
                wgt = (1.0 - jnp.abs(x - xi)) * (1.0 - jnp.abs(y - yi))
                valid = ((xi >= 0) & (xi < w_l) & (yi >= 0) & (yi < h_l)
                         ).astype(jnp.float32)
                xc = jnp.clip(xi, 0, w_l - 1).astype(jnp.int32)
                yc = jnp.clip(yi, 0, h_l - 1).astype(jnp.int32)
                g = v[b_idx, yc, xc, h_idx]                     # (B,Q,H,P,D)
                samp = samp + (wgt * valid)[..., None] * g
        out = out + jnp.sum(
            attention_weights[:, :, :, lvl][..., None] * samp, axis=3)
        start += h_l * w_l
    return out.reshape(b, q, hn * d)


def ref_module_forward(m, hidden, enc, reference_points, spatial_shapes,
                       attention_mask=None, position_embeddings=None):
    mm = functools.partial(jnp.matmul, precision=jax.lax.Precision.HIGHEST)
    if position_embeddings is not None:
        hidden = hidden + position_embeddings
    b, q, d = hidden.shape
    _, s, _ = enc.shape
    hn, nl, npnt = m.n_heads, m.n_levels, m.n_points
    hlp = hn * nl * npnt

    value = mm(enc, m.w_value) + m.b_value
    if attention_mask is not None:
        value = jnp.where(attention_mask[..., None], 0.0, value)
    value = value.reshape(b, s, hn, d // hn)

    raw = mm(hidden, m.w_meta) + m.b_meta
    off_x = raw[..., :hlp].reshape(b, q, hn, nl, npnt)
    off_y = raw[..., hlp:2 * hlp].reshape(b, q, hn, nl, npnt)
    offs = jnp.stack([off_x, off_y], axis=-1)
    attn = jax.nn.softmax(
        raw[..., 2 * hlp:].reshape(b, q, hn, nl * npnt), axis=-1)
    attn = attn.reshape(b, q, hn, nl, npnt)

    spatial = jnp.asarray(spatial_shapes, jnp.float32)
    normalizer = jnp.stack([spatial[:, 1], spatial[:, 0]], -1)
    loc = (reference_points[:, :, None, :, None, :]
           + offs / normalizer[None, None, None, :, None, :])

    core = ref_core(value, spatial_shapes, loc, attn)
    return mm(core, m.w_out) + m.b_out, attn


# ----------------------------------------------------------------------------
# MSDeformAttn module in JAX
# ----------------------------------------------------------------------------
class MSDeformAttnJAX:
    """The sampling_offsets / attention_weights projections are stored fused &
    column-permuted as one (d_model, 3*H*L*P) weight with layout
    [off_x(h,l,p) | off_y(h,l,p) | attn(h,l,p)] -- a pure re-parameterization
    of the reference module (weights follow the reference init)."""

    def __init__(self, d_model, n_levels, n_heads, n_points, key):
        assert d_model % n_heads == 0
        self.d_model = d_model
        self.n_levels = n_levels
        self.n_heads = n_heads
        self.n_points = n_points
        hlp = n_heads * n_levels * n_points

        k_v, k_o = jax.random.split(key, 2)

        # fused sampling_offsets + attention_weights projection (weights = 0,
        # offset bias = directional grid init, attn bias = 0)
        self.w_meta = jnp.zeros((d_model, 3 * hlp), jnp.float32)
        thetas = jnp.arange(n_heads, dtype=jnp.float32) * (
            2.0 * math.pi / n_heads)
        grid = jnp.stack([jnp.cos(thetas), jnp.sin(thetas)], -1)     # (H, 2)
        grid = grid / jnp.max(jnp.abs(grid), axis=-1, keepdims=True)
        grid = jnp.tile(grid[:, None, None, :], (1, n_levels, n_points, 1))
        scale = jnp.arange(1, n_points + 1, dtype=jnp.float32)[
            None, None, :, None]
        grid = grid * scale                                          # (H,L,P,2)
        self.b_meta = jnp.concatenate(
            [grid[..., 0].reshape(-1), grid[..., 1].reshape(-1),
             jnp.zeros((hlp,), jnp.float32)])

        # value_proj / output_proj: xavier_uniform, bias = 0
        bound = math.sqrt(6.0 / (d_model + d_model))
        self.w_value = jax.random.uniform(
            k_v, (d_model, d_model), jnp.float32, -bound, bound)
        self.b_value = jnp.zeros((d_model,), jnp.float32)
        self.w_out = jax.random.uniform(
            k_o, (d_model, d_model), jnp.float32, -bound, bound)
        self.b_out = jnp.zeros((d_model,), jnp.float32)

    def __call__(self, hidden_states, encoder_hidden_states, reference_points,
                 spatial_shapes, position_embeddings=None,
                 attention_mask=None, use_bf16_mxu=False):
        if position_embeddings is not None:
            hidden_states = hidden_states + position_embeddings

        b, q, _ = hidden_states.shape
        _, s, _ = encoder_hidden_states.shape
        assert sum(h * w for h, w in spatial_shapes) == s

        d = self.d_model
        hn, nl, npnt = self.n_heads, self.n_levels, self.n_points
        hlp = hn * nl * npnt

        # value projection with the attention-mask zeroing fused in
        keep = None
        if attention_mask is not None:
            keep = 1.0 - attention_mask.reshape(b * s).astype(jnp.float32)
        value = pallas_linear(encoder_hidden_states.reshape(b * s, d),
                              self.w_value, self.b_value,
                              keep=keep).reshape(b, s, d)

        # single fused projection for offsets + attention logits
        raw = pallas_linear(hidden_states.reshape(b * q, d),
                            self.w_meta, self.b_meta).reshape(b, q, 3 * hlp)

        if reference_points.shape[-1] == 2:
            meta = meta_pack_pallas(raw, reference_points, spatial_shapes,
                                    num_heads=hn, num_points=npnt)
        else:
            # TODO(synk): fold the 4-/6-dim reference-point variants into the
            # fused meta-packing kernel too; plain-JAX glue for now.
            meta = self._meta_pack_jax(raw, reference_points, spatial_shapes)

        attn = meta[..., 2 * hlp:].reshape(b, q, hn, nl, npnt)

        core = msda_core_from_meta(value, meta, spatial_shapes,
                                   num_heads=hn, num_points=npnt,
                                   head_dim=d // hn,
                                   use_bf16_mxu=use_bf16_mxu,
                                   out_dtype=hidden_states.dtype)

        output = pallas_linear(core.reshape(b * q, d), self.w_out,
                               self.b_out).reshape(b, q, d)
        return output, attn

    def _meta_pack_jax(self, raw, reference_points, spatial_shapes):
        b, q, _ = raw.shape
        hn, nl, npnt = self.n_heads, self.n_levels, self.n_points
        hlp = hn * nl * npnt
        off_x = raw[..., :hlp].reshape(b, q, hn, nl, npnt)
        off_y = raw[..., hlp:2 * hlp].reshape(b, q, hn, nl, npnt)
        offs = jnp.stack([off_x, off_y], axis=-1)
        attn = jax.nn.softmax(
            raw[..., 2 * hlp:].reshape(b, q, hn, nl * npnt), axis=-1)
        rp = reference_points
        if rp.shape[-1] == 4:
            loc = (rp[:, :, None, :, None, :2]
                   + offs / npnt * rp[:, :, None, :, None, 2:] * 0.5)
        elif rp.shape[-1] == 6:
            loc = (rp[:, :, None, :, None, :2]
                   + offs / npnt * (rp[:, :, None, :, None, 2::2]
                                    + rp[:, :, None, :, None, 3::2]) * 0.5)
        else:
            raise ValueError("reference_points last dim must be 2, 4 or 6")
        loc = loc.reshape(b, q, hlp, 2)
        return jnp.concatenate(
            [loc[..., 0], loc[..., 1], attn.reshape(b, q, hlp)], axis=-1)


# ----------------------------------------------------------------------------
if __name__ == "__main__":
    key = jax.random.PRNGKey(0)
    (k_params, k_hid, k_enc, k_ref, k_v, k_loc, k_aw,
     k_raw, k_mask) = jax.random.split(key, 9)

    d_model, n_heads, n_levels, n_points = 32, 4, 2, 2
    spatial_shapes = ((8, 12), (4, 6))       # non-square: catches x/y mixups
    seq = sum(h * w for h, w in spatial_shapes)        # 120
    batch, num_queries = 2, 8
    head_dim = d_model // n_heads
    hlp = n_heads * n_levels * n_points

    # --- 1. standalone check of the core Pallas kernel ----------------------
    v_t = jax.random.normal(k_v, (batch, seq, n_heads, head_dim), jnp.float32)
    loc_t = jax.random.uniform(
        k_loc, (batch, num_queries, n_heads, n_levels, n_points, 2),
        jnp.float32, minval=-0.1, maxval=1.1)          # includes out-of-bounds
    aw_t = jax.nn.softmax(
        jax.random.normal(
            k_aw, (batch, num_queries, n_heads, n_levels * n_points)),
        axis=-1).reshape(batch, num_queries, n_heads, n_levels, n_points)

    core_ref = ref_core(v_t, spatial_shapes, loc_t, aw_t)
    core_f32 = msda_core_pallas(v_t, spatial_shapes, loc_t, aw_t)
    jax.block_until_ready(core_f32)
    assert jnp.allclose(core_f32, core_ref, atol=1e-4, rtol=1e-4), (
        "core f32 mismatch: %e"
        % float(jnp.max(jnp.abs(core_f32 - core_ref))))

    core_bf16 = msda_core_pallas(v_t, spatial_shapes, loc_t, aw_t,
                                 use_bf16_mxu=True)
    jax.block_until_ready(core_bf16)
    assert jnp.allclose(core_bf16, core_ref, atol=5e-2, rtol=5e-2), (
        "core bf16 mismatch: %e"
        % float(jnp.max(jnp.abs(core_bf16 - core_ref))))

    # --- 2. fused meta-packing kernel check ----------------------------------
    reference_points = jax.random.uniform(
        k_ref, (batch, num_queries, n_levels, 2), jnp.float32)
    raw_t = jax.random.normal(
        k_raw, (batch, num_queries, 3 * hlp), jnp.float32)
    meta_pl = meta_pack_pallas(raw_t, reference_points, spatial_shapes,
                               num_heads=n_heads, num_points=n_points)
    offs_t = jnp.stack([raw_t[..., :hlp], raw_t[..., hlp:2 * hlp]],
                       axis=-1).reshape(batch, num_queries, n_heads,
                                        n_levels, n_points, 2)
    attn_t = jax.nn.softmax(
        raw_t[..., 2 * hlp:].reshape(batch, num_queries, n_heads,
                                     n_levels * n_points), axis=-1)
    spat = jnp.asarray(spatial_shapes, jnp.float32)
    norm = jnp.stack([spat[:, 1], spat[:, 0]], -1)
    loc_expected = (reference_points[:, :, None, :, None, :]
                    + offs_t / norm[None, None, None, :, None, :])
    meta_expected = jnp.concatenate(
        [loc_expected[..., 0].reshape(batch, num_queries, hlp),
         loc_expected[..., 1].reshape(batch, num_queries, hlp),
         attn_t.reshape(batch, num_queries, hlp)], axis=-1)
    jax.block_until_ready(meta_pl)
    assert jnp.allclose(meta_pl, meta_expected, atol=1e-4, rtol=1e-4), (
        "meta pack mismatch: %e"
        % float(jnp.max(jnp.abs(meta_pl - meta_expected))))

    # --- 3. full module forward vs. pure-JAX reference -----------------------
    module = MSDeformAttnJAX(d_model, n_levels, n_heads, n_points, k_params)
    hidden_states = jax.random.normal(
        k_hid, (batch, num_queries, d_model), jnp.float32)
    encoder_hidden_states = jax.random.normal(
        k_enc, (batch, seq, d_model), jnp.float32)
    attention_mask = jax.random.bernoulli(k_mask, 0.1, (batch, seq))

    output, attn_weights = module(hidden_states, encoder_hidden_states,
                                  reference_points, spatial_shapes,
                                  attention_mask=attention_mask)
    jax.block_until_ready(output)
    assert output.shape == (batch, num_queries, d_model)
    assert attn_weights.shape == (batch, num_queries, n_heads, n_levels,
                                  n_points)

    out_ref, attn_expected = ref_module_forward(
        module, hidden_states, encoder_hidden_states, reference_points,
        spatial_shapes, attention_mask=attention_mask)
    assert jnp.allclose(output, out_ref, atol=5e-2, rtol=5e-2), (
        "module mismatch: %e" % float(jnp.max(jnp.abs(output - out_ref))))
    assert jnp.allclose(attn_weights, attn_expected, atol=1e-5)

    # bf16-MXU production path (recommended for v6e / v7x): exercise + sanity.
    out_bf16, _ = module(hidden_states, encoder_hidden_states,
                         reference_points, spatial_shapes,
                         attention_mask=attention_mask, use_bf16_mxu=True)
    jax.block_until_ready(out_bf16)
    assert bool(jnp.all(jnp.isfinite(out_bf16)))

    print("KERNEL_OK")
</pallas_src>

<mosaic_0001>
module attributes {stable_mosaic.version = 11 : i64} {
  func.func @_msda_core_kernel(%arg0: i32, %arg1: i32, %arg2: memref<1x120x32xf32, #tpu.memory_space<vmem>>, %arg3: memref<1x8x48xf32, #tpu.memory_space<vmem>>, %arg4: memref<1x8x32xf32, #tpu.memory_space<vmem>>) attributes {dimension_semantics = [#tpu.dimension_semantics<parallel>, #tpu.dimension_semantics<parallel>], iteration_bounds = array<i64: 2, 1>, scalar_prefetch = 0 : i64, scratch_operands = 0 : i64, tpu.core_type = #tpu.core_type<tc>, window_params = [{transform_indices = @transform_0, window_bounds = array<i64: 1, 120, 32>}, {transform_indices = @transform_1, window_bounds = array<i64: 1, 8, 48>}, {transform_indices = @transform_2, window_bounds = array<i64: 1, 8, 32>}]} {
    %c0 = arith.constant 0 : index
    %c0_0 = arith.constant 0 : index
    %c0_1 = arith.constant 0 : index
    %0 = vector.load %arg3[%c0, %c0_0, %c0_1] : memref<1x8x48xf32, #tpu.memory_space<vmem>>, vector<1x8x48xf32>
    %1 = vector.shape_cast %0 : vector<1x8x48xf32> to vector<8x48xf32>
    %2 = vector.extract_strided_slice %1 {offsets = [0, 0], sizes = [8, 16], strides = [1, 1]} : vector<8x48xf32> to vector<8x16xf32>
    %3 = vector.extract_strided_slice %1 {offsets = [0, 16], sizes = [8, 16], strides = [1, 1]} : vector<8x48xf32> to vector<8x16xf32>
    %4 = vector.extract_strided_slice %1 {offsets = [0, 32], sizes = [8, 16], strides = [1, 1]} : vector<8x48xf32> to vector<8x16xf32>
    %cst = arith.constant 0.000000e+00 : f32
    %5 = vector.broadcast %cst : f32 to vector<8x8xf32>
    %cst_2 = arith.constant 0.000000e+00 : f32
    %6 = vector.broadcast %cst_2 : f32 to vector<8x8xf32>
    %cst_3 = arith.constant 0.000000e+00 : f32
    %7 = vector.broadcast %cst_3 : f32 to vector<8x8xf32>
    %cst_4 = arith.constant 0.000000e+00 : f32
    %8 = vector.broadcast %cst_4 : f32 to vector<8x8xf32>
    %9 = tpu.iota {dimensions = array<i32: 1>} : vector<1x12xi32>
    %10 = arith.sitofp %9 : vector<1x12xi32> to vector<1x12xf32>
    %11 = tpu.iota {dimensions = array<i32: 1>} : vector<1x8xi32>
    %12 = arith.sitofp %11 : vector<1x8xi32> to vector<1x8xf32>
    %cst_5 = arith.constant 0.000000e+00 : f32
    %13 = vector.broadcast %cst_5 : f32 to vector<8x8x12xf32>
    %14 = vector.extract_strided_slice %2 {offsets = [0, 0], sizes = [8, 1], strides = [1, 1]} : vector<8x16xf32> to vector<8x1xf32>
    %cst_6 = arith.constant 1.200000e+01 : f32
    %15 = vector.broadcast %cst_6 : f32 to vector<8x1xf32>
    %16 = arith.mulf %14, %15 : vector<8x1xf32>
    %cst_7 = arith.constant 5.000000e-01 : f32
    %17 = vector.broadcast %cst_7 : f32 to vector<8x1xf32>
    %18 = arith.subf %16, %17 : vector<8x1xf32>
    %19 = vector.extract_strided_slice %3 {offsets = [0, 0], sizes = [8, 1], strides = [1, 1]} : vector<8x16xf32> to vector<8x1xf32>
    %cst_8 = arith.constant 8.000000e+00 : f32
    %20 = vector.broadcast %cst_8 : f32 to vector<8x1xf32>
    %21 = arith.mulf %19, %20 : vector<8x1xf32>
    %cst_9 = arith.constant 5.000000e-01 : f32
    %22 = vector.broadcast %cst_9 : f32 to vector<8x1xf32>
    %23 = arith.subf %21, %22 : vector<8x1xf32>
    %24 = vector.extract_strided_slice %4 {offsets = [0, 0], sizes = [8, 1], strides = [1, 1]} : vector<8x16xf32> to vector<8x1xf32>
    %25 = vector.broadcast %18 : vector<8x1xf32> to vector<8x12xf32>
    %26 = vector.broadcast %10 : vector<1x12xf32> to vector<8x12xf32>
    %27 = arith.subf %25, %26 : vector<8x12xf32>
    %28 = math.absf %27 : vector<8x12xf32>
    %cst_10 = arith.constant 1.000000e+00 : f32
    %29 = vector.broadcast %cst_10 : f32 to vector<8x12xf32>
    %30 = arith.subf %29, %28 : vector<8x12xf32>
    %cst_11 = arith.constant 0.000000e+00 : f32
    %31 = vector.broadcast %cst_11 : f32 to vector<8x12xf32>
    %32 = arith.maximumf %31, %30 : vector<8x12xf32>
    %33 = vector.broadcast %23 : vector<8x1xf32> to vector<8x8xf32>
    %34 = vector.broadcast %12 : vector<1x8xf32> to vector<8x8xf32>
    %35 = arith.subf %33, %34 : vector<8x8xf32>
    %36 = math.absf %35 : vector<8x8xf32>
    %cst_12 = arith.constant 1.000000e+00 : f32
    %37 = vector.broadcast %cst_12 : f32 to vector<8x8xf32>
    %38 = arith.subf %37, %36 : vector<8x8xf32>
    %cst_13 = arith.constant 0.000000e+00 : f32
    %39 = vector.broadcast %cst_13 : f32 to vector<8x8xf32>
    %40 = arith.maximumf %39, %38 : vector<8x8xf32>
    %41 = vector.broadcast %24 : vector<8x1xf32> to vector<8x8xf32>
    %42 = arith.mulf %40, %41 : vector<8x8xf32>
    %43 = vector.shape_cast %42 : vector<8x8xf32> to vector<8x8x1xf32>
    %44 = vector.shape_cast %32 : vector<8x12xf32> to vector<8x1x12xf32>
    %45 = vector.broadcast %43 : vector<8x8x1xf32> to vector<8x8x12xf32>
    %46 = vector.broadcast %44 : vector<8x1x12xf32> to vector<8x8x12xf32>
    %47 = arith.mulf %45, %46 : vector<8x8x12xf32>
    %48 = arith.addf %13, %47 : vector<8x8x12xf32>
    %49 = vector.extract_strided_slice %2 {offsets = [0, 1], sizes = [8, 1], strides = [1, 1]} : vector<8x16xf32> to vector<8x1xf32>
    %cst_14 = arith.constant 1.200000e+01 : f32
    %50 = vector.broadcast %cst_14 : f32 to vector<8x1xf32>
    %51 = arith.mulf %49, %50 : vector<8x1xf32>
    %cst_15 = arith.constant 5.000000e-01 : f32
    %52 = vector.broadcast %cst_15 : f32 to vector<8x1xf32>
    %53 = arith.subf %51, %52 : vector<8x1xf32>
    %54 = vector.extract_strided_slice %3 {offsets = [0, 1], sizes = [8, 1], strides = [1, 1]} : vector<8x16xf32> to vector<8x1xf32>
    %cst_16 = arith.constant 8.000000e+00 : f32
    %55 = vector.broadcast %cst_16 : f32 to vector<8x1xf32>
    %56 = arith.mulf %54, %55 : vector<8x1xf32>
    %cst_17 = arith.constant 5.000000e-01 : f32
    %57 = vector.broadcast %cst_17 : f32 to vector<8x1xf32>
    %58 = arith.subf %56, %57 : vector<8x1xf32>
    %59 = vector.extract_strided_slice %4 {offsets = [0, 1], sizes = [8, 1], strides = [1, 1]} : vector<8x16xf32> to vector<8x1xf32>
    %60 = vector.broadcast %53 : vector<8x1xf32> to vector<8x12xf32>
    %61 = vector.broadcast %10 : vector<1x12xf32> to vector<8x12xf32>
    %62 = arith.subf %60, %61 : vector<8x12xf32>
    %63 = math.absf %62 : vector<8x12xf32>
    %cst_18 = arith.constant 1.000000e+00 : f32
    %64 = vector.broadcast %cst_18 : f32 to vector<8x12xf32>
    %65 = arith.subf %64, %63 : vector<8x12xf32>
    %cst_19 = arith.constant 0.000000e+00 : f32
    %66 = vector.broadcast %cst_19 : f32 to vector<8x12xf32>
    %67 = arith.maximumf %66, %65 : vector<8x12xf32>
    %68 = vector.broadcast %58 : vector<8x1xf32> to vector<8x8xf32>
    %69 = vector.broadcast %12 : vector<1x8xf32> to vector<8x8xf32>
    %70 = arith.subf %68, %69 : vector<8x8xf32>
    %71 = math.absf %70 : vector<8x8xf32>
    %cst_20 = arith.constant 1.000000e+00 : f32
    %72 = vector.broadcast %cst_20 : f32 to vector<8x8xf32>
    %73 = arith.subf %72, %71 : vector<8x8xf32>
    %cst_21 = arith.constant 0.000000e+00 : f32
    %74 = vector.broadcast %cst_21 : f32 to vector<8x8xf32>
    %75 = arith.maximumf %74, %73 : vector<8x8xf32>
    %76 = vector.broadcast %59 : vector<8x1xf32> to vector<8x8xf32>
    %77 = arith.mulf %75, %76 : vector<8x8xf32>
    %78 = vector.shape_cast %77 : vector<8x8xf32> to vector<8x8x1xf32>
    %79 = vector.shape_cast %67 : vector<8x12xf32> to vector<8x1x12xf32>
    %80 = vector.broadcast %78 : vector<8x8x1xf32> to vector<8x8x12xf32>
    %81 = vector.broadcast %79 : vector<8x1x12xf32> to vector<8x8x12xf32>
    %82 = arith.mulf %80, %81 : vector<8x8x12xf32>
    %83 = arith.addf %48, %82 : vector<8x8x12xf32>
    %c0_22 = arith.constant 0 : index
    %c0_23 = arith.constant 0 : index
    %c0_24 = arith.constant 0 : index
    %84 = vector.load %arg2[%c0_22, %c0_23, %c0_24] : memref<1x120x32xf32, #tpu.memory_space<vmem>>, vector<1x96x8xf32>
    %85 = vector.shape_cast %84 : vector<1x96x8xf32> to vector<96x8xf32>
    %86 = vector.shape_cast %83 : vector<8x8x12xf32> to vector<8x96xf32>
    %cst_25 = arith.constant dense<0.000000e+00> : vector<8x8xf32>
    %87 = tpu.matmul %86, %85, %cst_25 {dimension_numbers = #tpu.dot_dimension_numbers<[1], [0], [0], [1], [0, 0, 1, 1], [], []>} : vector<8x96xf32>, vector<96x8xf32>, vector<8x8xf32> -> vector<8x8xf32>
    %88 = arith.addf %5, %87 : vector<8x8xf32>
    %cst_26 = arith.constant 0.000000e+00 : f32
    %89 = vector.broadcast %cst_26 : f32 to vector<8x8x12xf32>
    %90 = vector.extract_strided_slice %2 {offsets = [0, 4], sizes = [8, 1], strides = [1, 1]} : vector<8x16xf32> to vector<8x1xf32>
    %cst_27 = arith.constant 1.200000e+01 : f32
    %91 = vector.broadcast %cst_27 : f32 to vector<8x1xf32>
    %92 = arith.mulf %90, %91 : vector<8x1xf32>
    %cst_28 = arith.constant 5.000000e-01 : f32
    %93 = vector.broadcast %cst_28 : f32 to vector<8x1xf32>
    %94 = arith.subf %92, %93 : vector<8x1xf32>
    %95 = vector.extract_strided_slice %3 {offsets = [0, 4], sizes = [8, 1], strides = [1, 1]} : vector<8x16xf32> to vector<8x1xf32>
    %cst_29 = arith.constant 8.000000e+00 : f32
    %96 = vector.broadcast %cst_29 : f32 to vector<8x1xf32>
    %97 = arith.mulf %95, %96 : vector<8x1xf32>
    %cst_30 = arith.constant 5.000000e-01 : f32
    %98 = vector.broadcast %cst_30 : f32 to vector<8x1xf32>
    %99 = arith.subf %97, %98 : vector<8x1xf32>
    %100 = vector.extract_strided_slice %4 {offsets = [0, 4], sizes = [8, 1], strides = [1, 1]} : vector<8x16xf32> to vector<8x1xf32>
    %101 = vector.broadcast %94 : vector<8x1xf32> to vector<8x12xf32>
    %102 = vector.broadcast %10 : vector<1x12xf32> to vector<8x12xf32>
    %103 = arith.subf %101, %102 : vector<8x12xf32>
    %104 = math.absf %103 : vector<8x12xf32>
    %cst_31 = arith.constant 1.000000e+00 : f32
    %105 = vector.broadcast %cst_31 : f32 to vector<8x12xf32>
    %106 = arith.subf %105, %104 : vector<8x12xf32>
    %cst_32 = arith.constant 0.000000e+00 : f32
    %107 = vector.broadcast %cst_32 : f32 to vector<8x12xf32>
    %108 = arith.maximumf %107, %106 : vector<8x12xf32>
    %109 = vector.broadcast %99 : vector<8x1xf32> to vector<8x8xf32>
    %110 = vector.broadcast %12 : vector<1x8xf32> to vector<8x8xf32>
    %111 = arith.subf %109, %110 : vector<8x8xf32>
    %112 = math.absf %111 : vector<8x8xf32>
    %cst_33 = arith.constant 1.000000e+00 : f32
    %113 = vector.broadcast %cst_33 : f32 to vector<8x8xf32>
    %114 = arith.subf %113, %112 : vector<8x8xf32>
    %cst_34 = arith.constant 0.000000e+00 : f32
    %115 = vector.broadcast %cst_34 : f32 to vector<8x8xf32>
    %116 = arith.maximumf %115, %114 : vector<8x8xf32>
    %117 = vector.broadcast %100 : vector<8x1xf32> to vector<8x8xf32>
    %118 = arith.mulf %116, %117 : vector<8x8xf32>
    %119 = vector.shape_cast %118 : vector<8x8xf32> to vector<8x8x1xf32>
    %120 = vector.shape_cast %108 : vector<8x12xf32> to vector<8x1x12xf32>
    %121 = vector.broadcast %119 : vector<8x8x1xf32> to vector<8x8x12xf32>
    %122 = vector.broadcast %120 : vector<8x1x12xf32> to vector<8x8x12xf32>
    %123 = arith.mulf %121, %122 : vector<8x8x12xf32>
    %124 = arith.addf %89, %123 : vector<8x8x12xf32>
    %125 = vector.extract_strided_slice %2 {offsets = [0, 5], sizes = [8, 1], strides = [1, 1]} : vector<8x16xf32> to vector<8x1xf32>
    %cst_35 = arith.constant 1.200000e+01 : f32
    %126 = vector.broadcast %cst_35 : f32 to vector<8x1xf32>
    %127 = arith.mulf %125, %126 : vector<8x1xf32>
    %cst_36 = arith.constant 5.000000e-01 : f32
    %128 = vector.broadcast %cst_36 : f32 to vector<8x1xf32>
    %129 = arith.subf %127, %128 : vector<8x1xf32>
    %130 = vector.extract_strided_slice %3 {offsets = [0, 5], sizes = [8, 1], strides = [1, 1]} : vector<8x16xf32> to vector<8x1xf32>
    %cst_37 = arith.constant 8.000000e+00 : f32
    %131 = vector.broadcast %cst_37 : f32 to vector<8x1xf32>
    %132 = arith.mulf %130, %131 : vector<8x1xf32>
    %cst_38 = arith.constant 5.000000e-01 : f32
    %133 = vector.broadcast %cst_38 : f32 to vector<8x1xf32>
    %134 = arith.subf %132, %133 : vector<8x1xf32>
    %135 = vector.extract_strided_slice %4 {offsets = [0, 5], sizes = [8, 1], strides = [1, 1]} : vector<8x16xf32> to vector<8x1xf32>
    %136 = vector.broadcast %129 : vector<8x1xf32> to vector<8x12xf32>
    %137 = vector.broadcast %10 : vector<1x12xf32> to vector<8x12xf32>
    %138 = arith.subf %136, %137 : vector<8x12xf32>
    %139 = math.absf %138 : vector<8x12xf32>
    %cst_39 = arith.constant 1.000000e+00 : f32
    %140 = vector.broadcast %cst_39 : f32 to vector<8x12xf32>
    %141 = arith.subf %140, %139 : vector<8x12xf32>
    %cst_40 = arith.constant 0.000000e+00 : f32
    %142 = vector.broadcast %cst_40 : f32 to vector<8x12xf32>
    %143 = arith.maximumf %142, %141 : vector<8x12xf32>
    %144 = vector.broadcast %134 : vector<8x1xf32> to vector<8x8xf32>
    %145 = vector.broadcast %12 : vector<1x8xf32> to vector<8x8xf32>
    %146 = arith.subf %144, %145 : vector<8x8xf32>
    %147 = math.absf %146 : vector<8x8xf32>
    %cst_41 = arith.constant 1.000000e+00 : f32
    %148 = vector.broadcast %cst_41 : f32 to vector<8x8xf32>
    %149 = arith.subf %148, %147 : vector<8x8xf32>
    %cst_42 = arith.constant 0.000000e+00 : f32
    %150 = vector.broadcast %cst_42 : f32 to vector<8x8xf32>
    %151 = arith.maximumf %150, %149 : vector<8x8xf32>
    %152 = vector.broadcast %135 : vector<8x1xf32> to vector<8x8xf32>
    %153 = arith.mulf %151, %152 : vector<8x8xf32>
    %154 = vector.shape_cast %153 : vector<8x8xf32> to vector<8x8x1xf32>
    %155 = vector.shape_cast %143 : vector<8x12xf32> to vector<8x1x12xf32>
    %156 = vector.broadcast %154 : vector<8x8x1xf32> to vector<8x8x12xf32>
    %157 = vector.broadcast %155 : vector<8x1x12xf32> to vector<8x8x12xf32>
    %158 = arith.mulf %156, %157 : vector<8x8x12xf32>
    %159 = arith.addf %124, %158 : vector<8x8x12xf32>
    %c0_43 = arith.constant 0 : index
    %c0_44 = arith.constant 0 : index
    %c8 = arith.constant 8 : index
    %160 = vector.load %arg2[%c0_43, %c0_44, %c8] : memref<1x120x32xf32, #tpu.memory_space<vmem>>, vector<1x96x8xf32>
    %161 = vector.shape_cast %160 : vector<1x96x8xf32> to vector<96x8xf32>
    %162 = vector.shape_cast %159 : vector<8x8x12xf32> to vector<8x96xf32>
    %cst_45 = arith.constant dense<0.000000e+00> : vector<8x8xf32>
    %163 = tpu.matmul %162, %161, %cst_45 {dimension_numbers = #tpu.dot_dimension_numbers<[1], [0], [0], [1], [0, 0, 1, 1], [], []>} : vector<8x96xf32>, vector<96x8xf32>, vector<8x8xf32> -> vector<8x8xf32>
    %164 = arith.addf %6, %163 : vector<8x8xf32>
    %cst_46 = arith.constant 0.000000e+00 : f32
    %165 = vector.broadcast %cst_46 : f32 to vector<8x8x12xf32>
    %166 = vector.extract_strided_slice %2 {offsets = [0, 8], sizes = [8, 1], strides = [1, 1]} : vector<8x16xf32> to vector<8x1xf32>
    %cst_47 = arith.constant 1.200000e+01 : f32
    %167 = vector.broadcast %cst_47 : f32 to vector<8x1xf32>
    %168 = arith.mulf %166, %167 : vector<8x1xf32>
    %cst_48 = arith.constant 5.000000e-01 : f32
    %169 = vector.broadcast %cst_48 : f32 to vector<8x1xf32>
    %170 = arith.subf %168, %169 : vector<8x1xf32>
    %171 = vector.extract_strided_slice %3 {offsets = [0, 8], sizes = [8, 1], strides = [1, 1]} : vector<8x16xf32> to vector<8x1xf32>
    %cst_49 = arith.constant 8.000000e+00 : f32
    %172 = vector.broadcast %cst_49 : f32 to vector<8x1xf32>
    %173 = arith.mulf %171, %172 : vector<8x1xf32>
    %cst_50 = arith.constant 5.000000e-01 : f32
    %174 = vector.broadcast %cst_50 : f32 to vector<8x1xf32>
    %175 = arith.subf %173, %174 : vector<8x1xf32>
    %176 = vector.extract_strided_slice %4 {offsets = [0, 8], sizes = [8, 1], strides = [1, 1]} : vector<8x16xf32> to vector<8x1xf32>
    %177 = vector.broadcast %170 : vector<8x1xf32> to vector<8x12xf32>
    %178 = vector.broadcast %10 : vector<1x12xf32> to vector<8x12xf32>
    %179 = arith.subf %177, %178 : vector<8x12xf32>
    %180 = math.absf %179 : vector<8x12xf32>
    %cst_51 = arith.constant 1.000000e+00 : f32
    %181 = vector.broadcast %cst_51 : f32 to vector<8x12xf32>
    %182 = arith.subf %181, %180 : vector<8x12xf32>
    %cst_52 = arith.constant 0.000000e+00 : f32
    %183 = vector.broadcast %cst_52 : f32 to vector<8x12xf32>
    %184 = arith.maximumf %183, %182 : vector<8x12xf32>
    %185 = vector.broadcast %175 : vector<8x1xf32> to vector<8x8xf32>
    %186 = vector.broadcast %12 : vector<1x8xf32> to vector<8x8xf32>
    %187 = arith.subf %185, %186 : vector<8x8xf32>
    %188 = math.absf %187 : vector<8x8xf32>
    %cst_53 = arith.constant 1.000000e+00 : f32
    %189 = vector.broadcast %cst_53 : f32 to vector<8x8xf32>
    %190 = arith.subf %189, %188 : vector<8x8xf32>
    %cst_54 = arith.constant 0.000000e+00 : f32
    %191 = vector.broadcast %cst_54 : f32 to vector<8x8xf32>
    %192 = arith.maximumf %191, %190 : vector<8x8xf32>
    %193 = vector.broadcast %176 : vector<8x1xf32> to vector<8x8xf32>
    %194 = arith.mulf %192, %193 : vector<8x8xf32>
    %195 = vector.shape_cast %194 : vector<8x8xf32> to vector<8x8x1xf32>
    %196 = vector.shape_cast %184 : vector<8x12xf32> to vector<8x1x12xf32>
    %197 = vector.broadcast %195 : vector<8x8x1xf32> to vector<8x8x12xf32>
    %198 = vector.broadcast %196 : vector<8x1x12xf32> to vector<8x8x12xf32>
    %199 = arith.mulf %197, %198 : vector<8x8x12xf32>
    %200 = arith.addf %165, %199 : vector<8x8x12xf32>
    %201 = vector.extract_strided_slice %2 {offsets = [0, 9], sizes = [8, 1], strides = [1, 1]} : vector<8x16xf32> to vector<8x1xf32>
    %cst_55 = arith.constant 1.200000e+01 : f32
    %202 = vector.broadcast %cst_55 : f32 to vector<8x1xf32>
    %203 = arith.mulf %201, %202 : vector<8x1xf32>
    %cst_56 = arith.constant 5.000000e-01 : f32
    %204 = vector.broadcast %cst_56 : f32 to vector<8x1xf32>
    %205 = arith.subf %203, %204 : vector<8x1xf32>
    %206 = vector.extract_strided_slice %3 {offsets = [0, 9], sizes = [8, 1], strides = [1, 1]} : vector<8x16xf32> to vector<8x1xf32>
    %cst_57 = arith.constant 8.000000e+00 : f32
    %207 = vector.broadcast %cst_57 : f32 to vector<8x1xf32>
    %208 = arith.mulf %206, %207 : vector<8x1xf32>
    %cst_58 = arith.constant 5.000000e-01 : f32
    %209 = vector.broadcast %cst_58 : f32 to vector<8x1xf32>
    %210 = arith.subf %208, %209 : vector<8x1xf32>
    %211 = vector.extract_strided_slice %4 {offsets = [0, 9], sizes = [8, 1], strides = [1, 1]} : vector<8x16xf32> to vector<8x1xf32>
    %212 = vector.broadcast %205 : vector<8x1xf32> to vector<8x12xf32>
    %213 = vector.broadcast %10 : vector<1x12xf32> to vector<8x12xf32>
    %214 = arith.subf %212, %213 : vector<8x12xf32>
    %215 = math.absf %214 : vector<8x12xf32>
    %cst_59 = arith.constant 1.000000e+00 : f32
    %216 = vector.broadcast %cst_59 : f32 to vector<8x12xf32>
    %217 = arith.subf %216, %215 : vector<8x12xf32>
    %cst_60 = arith.constant 0.000000e+00 : f32
    %218 = vector.broadcast %cst_60 : f32 to vector<8x12xf32>
    %219 = arith.maximumf %218, %217 : vector<8x12xf32>
    %220 = vector.broadcast %210 : vector<8x1xf32> to vector<8x8xf32>
    %221 = vector.broadcast %12 : vector<1x8xf32> to vector<8x8xf32>
    %222 = arith.subf %220, %221 : vector<8x8xf32>
    %223 = math.absf %222 : vector<8x8xf32>
    %cst_61 = arith.constant 1.000000e+00 : f32
    %224 = vector.broadcast %cst_61 : f32 to vector<8x8xf32>
    %225 = arith.subf %224, %223 : vector<8x8xf32>
    %cst_62 = arith.constant 0.000000e+00 : f32
    %226 = vector.broadcast %cst_62 : f32 to vector<8x8xf32>
    %227 = arith.maximumf %226, %225 : vector<8x8xf32>
    %228 = vector.broadcast %211 : vector<8x1xf32> to vector<8x8xf32>
    %229 = arith.mulf %227, %228 : vector<8x8xf32>
    %230 = vector.shape_cast %229 : vector<8x8xf32> to vector<8x8x1xf32>
    %231 = vector.shape_cast %219 : vector<8x12xf32> to vector<8x1x12xf32>
    %232 = vector.broadcast %230 : vector<8x8x1xf32> to vector<8x8x12xf32>
    %233 = vector.broadcast %231 : vector<8x1x12xf32> to vector<8x8x12xf32>
    %234 = arith.mulf %232, %233 : vector<8x8x12xf32>
    %235 = arith.addf %200, %234 : vector<8x8x12xf32>
    %c0_63 = arith.constant 0 : index
    %c0_64 = arith.constant 0 : index
    %c16 = arith.constant 16 : index
    %236 = vector.load %arg2[%c0_63, %c0_64, %c16] : memref<1x120x32xf32, #tpu.memory_space<vmem>>, vector<1x96x8xf32>
    %237 = vector.shape_cast %236 : vector<1x96x8xf32> to vector<96x8xf32>
    %238 = vector.shape_cast %235 : vector<8x8x12xf32> to vector<8x96xf32>
    %cst_65 = arith.constant dense<0.000000e+00> : vector<8x8xf32>
    %239 = tpu.matmul %238, %237, %cst_65 {dimension_numbers = #tpu.dot_dimension_numbers<[1], [0], [0], [1], [0, 0, 1, 1], [], []>} : vector<8x96xf32>, vector<96x8xf32>, vector<8x8xf32> -> vector<8x8xf32>
    %240 = arith.addf %7, %239 : vector<8x8xf32>
    %cst_66 = arith.constant 0.000000e+00 : f32
    %241 = vector.broadcast %cst_66 : f32 to vector<8x8x12xf32>
    %242 = vector.extract_strided_slice %2 {offsets = [0, 12], sizes = [8, 1], strides = [1, 1]} : vector<8x16xf32> to vector<8x1xf32>
    %cst_67 = arith.constant 1.200000e+01 : f32
    %243 = vector.broadcast %cst_67 : f32 to vector<8x1xf32>
    %244 = arith.mulf %242, %243 : vector<8x1xf32>
    %cst_68 = arith.constant 5.000000e-01 : f32
    %245 = vector.broadcast %cst_68 : f32 to vector<8x1xf32>
    %246 = arith.subf %244, %245 : vector<8x1xf32>
    %247 = vector.extract_strided_slice %3 {offsets = [0, 12], sizes = [8, 1], strides = [1, 1]} : vector<8x16xf32> to vector<8x1xf32>
    %cst_69 = arith.constant 8.000000e+00 : f32
    %248 = vector.broadcast %cst_69 : f32 to vector<8x1xf32>
    %249 = arith.mulf %247, %248 : vector<8x1xf32>
    %cst_70 = arith.constant 5.000000e-01 : f32
    %250 = vector.broadcast %cst_70 : f32 to vector<8x1xf32>
    %251 = arith.subf %249, %250 : vector<8x1xf32>
    %252 = vector.extract_strided_slice %4 {offsets = [0, 12], sizes = [8, 1], strides = [1, 1]} : vector<8x16xf32> to vector<8x1xf32>
    %253 = vector.broadcast %246 : vector<8x1xf32> to vector<8x12xf32>
    %254 = vector.broadcast %10 : vector<1x12xf32> to vector<8x12xf32>
    %255 = arith.subf %253, %254 : vector<8x12xf32>
    %256 = math.absf %255 : vector<8x12xf32>
    %cst_71 = arith.constant 1.000000e+00 : f32
    %257 = vector.broadcast %cst_71 : f32 to vector<8x12xf32>
    %258 = arith.subf %257, %256 : vector<8x12xf32>
    %cst_72 = arith.constant 0.000000e+00 : f32
    %259 = vector.broadcast %cst_72 : f32 to vector<8x12xf32>
    %260 = arith.maximumf %259, %258 : vector<8x12xf32>
    %261 = vector.broadcast %251 : vector<8x1xf32> to vector<8x8xf32>
    %262 = vector.broadcast %12 : vector<1x8xf32> to vector<8x8xf32>
    %263 = arith.subf %261, %262 : vector<8x8xf32>
    %264 = math.absf %263 : vector<8x8xf32>
    %cst_73 = arith.constant 1.000000e+00 : f32
    %265 = vector.broadcast %cst_73 : f32 to vector<8x8xf32>
    %266 = arith.subf %265, %264 : vector<8x8xf32>
    %cst_74 = arith.constant 0.000000e+00 : f32
    %267 = vector.broadcast %cst_74 : f32 to vector<8x8xf32>
    %268 = arith.maximumf %267, %266 : vector<8x8xf32>
    %269 = vector.broadcast %252 : vector<8x1xf32> to vector<8x8xf32>
    %270 = arith.mulf %268, %269 : vector<8x8xf32>
    %271 = vector.shape_cast %270 : vector<8x8xf32> to vector<8x8x1xf32>
    %272 = vector.shape_cast %260 : vector<8x12xf32> to vector<8x1x12xf32>
    %273 = vector.broadcast %271 : vector<8x8x1xf32> to vector<8x8x12xf32>
    %274 = vector.broadcast %272 : vector<8x1x12xf32> to vector<8x8x12xf32>
    %275 = arith.mulf %273, %274 : vector<8x8x12xf32>
    %276 = arith.addf %241, %275 : vector<8x8x12xf32>
    %277 = vector.extract_strided_slice %2 {offsets = [0, 13], sizes = [8, 1], strides = [1, 1]} : vector<8x16xf32> to vector<8x1xf32>
    %cst_75 = arith.constant 1.200000e+01 : f32
    %278 = vector.broadcast %cst_75 : f32 to vector<8x1xf32>
    %279 = arith.mulf %277, %278 : vector<8x1xf32>
    %cst_76 = arith.constant 5.000000e-01 : f32
    %280 = vector.broadcast %cst_76 : f32 to vector<8x1xf32>
    %281 = arith.subf %279, %280 : vector<8x1xf32>
    %282 = vector.extract_strided_slice %3 {offsets = [0, 13], sizes = [8, 1], strides = [1, 1]} : vector<8x16xf32> to vector<8x1xf32>
    %cst_77 = arith.constant 8.000000e+00 : f32
    %283 = vector.broadcast %cst_77 : f32 to vector<8x1xf32>
    %284 = arith.mulf %282, %283 : vector<8x1xf32>
    %cst_78 = arith.constant 5.000000e-01 : f32
    %285 = vector.broadcast %cst_78 : f32 to vector<8x1xf32>
    %286 = arith.subf %284, %285 : vector<8x1xf32>
    %287 = vector.extract_strided_slice %4 {offsets = [0, 13], sizes = [8, 1], strides = [1, 1]} : vector<8x16xf32> to vector<8x1xf32>
    %288 = vector.broadcast %281 : vector<8x1xf32> to vector<8x12xf32>
    %289 = vector.broadcast %10 : vector<1x12xf32> to vector<8x12xf32>
    %290 = arith.subf %288, %289 : vector<8x12xf32>
    %291 = math.absf %290 : vector<8x12xf32>
    %cst_79 = arith.constant 1.000000e+00 : f32
    %292 = vector.broadcast %cst_79 : f32 to vector<8x12xf32>
    %293 = arith.subf %292, %291 : vector<8x12xf32>
    %cst_80 = arith.constant 0.000000e+00 : f32
    %294 = vector.broadcast %cst_80 : f32 to vector<8x12xf32>
    %295 = arith.maximumf %294, %293 : vector<8x12xf32>
    %296 = vector.broadcast %286 : vector<8x1xf32> to vector<8x8xf32>
    %297 = vector.broadcast %12 : vector<1x8xf32> to vector<8x8xf32>
    %298 = arith.subf %296, %297 : vector<8x8xf32>
    %299 = math.absf %298 : vector<8x8xf32>
    %cst_81 = arith.constant 1.000000e+00 : f32
    %300 = vector.broadcast %cst_81 : f32 to vector<8x8xf32>
    %301 = arith.subf %300, %299 : vector<8x8xf32>
    %cst_82 = arith.constant 0.000000e+00 : f32
    %302 = vector.broadcast %cst_82 : f32 to vector<8x8xf32>
    %303 = arith.maximumf %302, %301 : vector<8x8xf32>
    %304 = vector.broadcast %287 : vector<8x1xf32> to vector<8x8xf32>
    %305 = arith.mulf %303, %304 : vector<8x8xf32>
    %306 = vector.shape_cast %305 : vector<8x8xf32> to vector<8x8x1xf32>
    %307 = vector.shape_cast %295 : vector<8x12xf32> to vector<8x1x12xf32>
    %308 = vector.broadcast %306 : vector<8x8x1xf32> to vector<8x8x12xf32>
    %309 = vector.broadcast %307 : vector<8x1x12xf32> to vector<8x8x12xf32>
    %310 = arith.mulf %308, %309 : vector<8x8x12xf32>
    %311 = arith.addf %276, %310 : vector<8x8x12xf32>
    %c0_83 = arith.constant 0 : index
    %c0_84 = arith.constant 0 : index
    %c24 = arith.constant 24 : index
    %312 = vector.load %arg2[%c0_83, %c0_84, %c24] : memref<1x120x32xf32, #tpu.memory_space<vmem>>, vector<1x96x8xf32>
    %313 = vector.shape_cast %312 : vector<1x96x8xf32> to vector<96x8xf32>
    %314 = vector.shape_cast %311 : vector<8x8x12xf32> to vector<8x96xf32>
    %cst_85 = arith.constant dense<0.000000e+00> : vector<8x8xf32>
    %315 = tpu.matmul %314, %313, %cst_85 {dimension_numbers = #tpu.dot_dimension_numbers<[1], [0], [0], [1], [0, 0, 1, 1], [], []>} : vector<8x96xf32>, vector<96x8xf32>, vector<8x8xf32> -> vector<8x8xf32>
    %316 = arith.addf %8, %315 : vector<8x8xf32>
    %317 = tpu.iota {dimensions = array<i32: 1>} : vector<1x6xi32>
    %318 = arith.sitofp %317 : vector<1x6xi32> to vector<1x6xf32>
    %319 = tpu.iota {dimensions = array<i32: 1>} : vector<1x4xi32>
    %320 = arith.sitofp %319 : vector<1x4xi32> to vector<1x4xf32>
    %cst_86 = arith.constant 0.000000e+00 : f32
    %321 = vector.broadcast %cst_86 : f32 to vector<8x4x6xf32>
    %322 = vector.extract_strided_slice %2 {offsets = [0, 2], sizes = [8, 1], strides = [1, 1]} : vector<8x16xf32> to vector<8x1xf32>
    %cst_87 = arith.constant 6.000000e+00 : f32
    %323 = vector.broadcast %cst_87 : f32 to vector<8x1xf32>
    %324 = arith.mulf %322, %323 : vector<8x1xf32>
    %cst_88 = arith.constant 5.000000e-01 : f32
    %325 = vector.broadcast %cst_88 : f32 to vector<8x1xf32>
    %326 = arith.subf %324, %325 : vector<8x1xf32>
    %327 = vector.extract_strided_slice %3 {offsets = [0, 2], sizes = [8, 1], strides = [1, 1]} : vector<8x16xf32> to vector<8x1xf32>
    %cst_89 = arith.constant 4.000000e+00 : f32
    %328 = vector.broadcast %cst_89 : f32 to vector<8x1xf32>
    %329 = arith.mulf %327, %328 : vector<8x1xf32>
    %cst_90 = arith.constant 5.000000e-01 : f32
    %330 = vector.broadcast %cst_90 : f32 to vector<8x1xf32>
    %331 = arith.subf %329, %330 : vector<8x1xf32>
    %332 = vector.extract_strided_slice %4 {offsets = [0, 2], sizes = [8, 1], strides = [1, 1]} : vector<8x16xf32> to vector<8x1xf32>
    %333 = vector.broadcast %326 : vector<8x1xf32> to vector<8x6xf32>
    %334 = vector.broadcast %318 : vector<1x6xf32> to vector<8x6xf32>
    %335 = arith.subf %333, %334 : vector<8x6xf32>
    %336 = math.absf %335 : vector<8x6xf32>
    %cst_91 = arith.constant 1.000000e+00 : f32
    %337 = vector.broadcast %cst_91 : f32 to vector<8x6xf32>
    %338 = arith.subf %337, %336 : vector<8x6xf32>
    %cst_92 = arith.constant 0.000000e+00 : f32
    %339 = vector.broadcast %cst_92 : f32 to vector<8x6xf32>
    %340 = arith.maximumf %339, %338 : vector<8x6xf32>
    %341 = vector.broadcast %331 : vector<8x1xf32> to vector<8x4xf32>
    %342 = vector.broadcast %320 : vector<1x4xf32> to vector<8x4xf32>
    %343 = arith.subf %341, %342 : vector<8x4xf32>
    %344 = math.absf %343 : vector<8x4xf32>
    %cst_93 = arith.constant 1.000000e+00 : f32
    %345 = vector.broadcast %cst_93 : f32 to vector<8x4xf32>
    %346 = arith.subf %345, %344 : vector<8x4xf32>
    %cst_94 = arith.constant 0.000000e+00 : f32
    %347 = vector.broadcast %cst_94 : f32 to vector<8x4xf32>
    %348 = arith.maximumf %347, %346 : vector<8x4xf32>
    %349 = vector.broadcast %332 : vector<8x1xf32> to vector<8x4xf32>
    %350 = arith.mulf %348, %349 : vector<8x4xf32>
    %351 = vector.shape_cast %350 : vector<8x4xf32> to vector<8x4x1xf32>
    %352 = vector.shape_cast %340 : vector<8x6xf32> to vector<8x1x6xf32>
    %353 = vector.broadcast %351 : vector<8x4x1xf32> to vector<8x4x6xf32>
    %354 = vector.broadcast %352 : vector<8x1x6xf32> to vector<8x4x6xf32>
    %355 = arith.mulf %353, %354 : vector<8x4x6xf32>
    %356 = arith.addf %321, %355 : vector<8x4x6xf32>
    %357 = vector.extract_strided_slice %2 {offsets = [0, 3], sizes = [8, 1], strides = [1, 1]} : vector<8x16xf32> to vector<8x1xf32>
    %cst_95 = arith.constant 6.000000e+00 : f32
    %358 = vector.broadcast %cst_95 : f32 to vector<8x1xf32>
    %359 = arith.mulf %357, %358 : vector<8x1xf32>
    %cst_96 = arith.constant 5.000000e-01 : f32
    %360 = vector.broadcast %cst_96 : f32 to vector<8x1xf32>
    %361 = arith.subf %359, %360 : vector<8x1xf32>
    %362 = vector.extract_strided_slice %3 {offsets = [0, 3], sizes = [8, 1], strides = [1, 1]} : vector<8x16xf32> to vector<8x1xf32>
    %cst_97 = arith.constant 4.000000e+00 : f32
    %363 = vector.broadcast %cst_97 : f32 to vector<8x1xf32>
    %364 = arith.mulf %362, %363 : vector<8x1xf32>
    %cst_98 = arith.constant 5.000000e-01 : f32
    %365 = vector.broadcast %cst_98 : f32 to vector<8x1xf32>
    %366 = arith.subf %364, %365 : vector<8x1xf32>
    %367 = vector.extract_strided_slice %4 {offsets = [0, 3], sizes = [8, 1], strides = [1, 1]} : vector<8x16xf32> to vector<8x1xf32>
    %368 = vector.broadcast %361 : vector<8x1xf32> to vector<8x6xf32>
    %369 = vector.broadcast %318 : vector<1x6xf32> to vector<8x6xf32>
    %370 = arith.subf %368, %369 : vector<8x6xf32>
    %371 = math.absf %370 : vector<8x6xf32>
    %cst_99 = arith.constant 1.000000e+00 : f32
    %372 = vector.broadcast %cst_99 : f32 to vector<8x6xf32>
    %373 = arith.subf %372, %371 : vector<8x6xf32>
    %cst_100 = arith.constant 0.000000e+00 : f32
    %374 = vector.broadcast %cst_100 : f32 to vector<8x6xf32>
    %375 = arith.maximumf %374, %373 : vector<8x6xf32>
    %376 = vector.broadcast %366 : vector<8x1xf32> to vector<8x4xf32>
    %377 = vector.broadcast %320 : vector<1x4xf32> to vector<8x4xf32>
    %378 = arith.subf %376, %377 : vector<8x4xf32>
    %379 = math.absf %378 : vector<8x4xf32>
    %cst_101 = arith.constant 1.000000e+00 : f32
    %380 = vector.broadcast %cst_101 : f32 to vector<8x4xf32>
    %381 = arith.subf %380, %379 : vector<8x4xf32>
    %cst_102 = arith.constant 0.000000e+00 : f32
    %382 = vector.broadcast %cst_102 : f32 to vector<8x4xf32>
    %383 = arith.maximumf %382, %381 : vector<8x4xf32>
    %384 = vector.broadcast %367 : vector<8x1xf32> to vector<8x4xf32>
    %385 = arith.mulf %383, %384 : vector<8x4xf32>
    %386 = vector.shape_cast %385 : vector<8x4xf32> to vector<8x4x1xf32>
    %387 = vector.shape_cast %375 : vector<8x6xf32> to vector<8x1x6xf32>
    %388 = vector.broadcast %386 : vector<8x4x1xf32> to vector<8x4x6xf32>
    %389 = vector.broadcast %387 : vector<8x1x6xf32> to vector<8x4x6xf32>
    %390 = arith.mulf %388, %389 : vector<8x4x6xf32>
    %391 = arith.addf %356, %390 : vector<8x4x6xf32>
    %c0_103 = arith.constant 0 : index
    %c96 = arith.constant 96 : index
    %c0_104 = arith.constant 0 : index
    %392 = vector.load %arg2[%c0_103, %c96, %c0_104] : memref<1x120x32xf32, #tpu.memory_space<vmem>>, vector<1x24x8xf32>
    %393 = vector.shape_cast %392 : vector<1x24x8xf32> to vector<24x8xf32>
    %394 = vector.shape_cast %391 : vector<8x4x6xf32> to vector<8x24xf32>
    %cst_105 = arith.constant dense<0.000000e+00> : vector<8x8xf32>
    %395 = tpu.matmul %394, %393, %cst_105 {dimension_numbers = #tpu.dot_dimension_numbers<[1], [0], [0], [1], [0, 0, 1, 1], [], []>} : vector<8x24xf32>, vector<24x8xf32>, vector<8x8xf32> -> vector<8x8xf32>
    %396 = arith.addf %88, %395 : vector<8x8xf32>
    %cst_106 = arith.constant 0.000000e+00 : f32
    %397 = vector.broadcast %cst_106 : f32 to vector<8x4x6xf32>
    %398 = vector.extract_strided_slice %2 {offsets = [0, 6], sizes = [8, 1], strides = [1, 1]} : vector<8x16xf32> to vector<8x1xf32>
    %cst_107 = arith.constant 6.000000e+00 : f32
    %399 = vector.broadcast %cst_107 : f32 to vector<8x1xf32>
    %400 = arith.mulf %398, %399 : vector<8x1xf32>
    %cst_108 = arith.constant 5.000000e-01 : f32
    %401 = vector.broadcast %cst_108 : f32 to vector<8x1xf32>
    %402 = arith.subf %400, %401 : vector<8x1xf32>
    %403 = vector.extract_strided_slice %3 {offsets = [0, 6], sizes = [8, 1], strides = [1, 1]} : vector<8x16xf32> to vector<8x1xf32>
    %cst_109 = arith.constant 4.000000e+00 : f32
    %404 = vector.broadcast %cst_109 : f32 to vector<8x1xf32>
    %405 = arith.mulf %403, %404 : vector<8x1xf32>
    %cst_110 = arith.constant 5.000000e-01 : f32
    %406 = vector.broadcast %cst_110 : f32 to vector<8x1xf32>
    %407 = arith.subf %405, %406 : vector<8x1xf32>
    %408 = vector.extract_strided_slice %4 {offsets = [0, 6], sizes = [8, 1], strides = [1, 1]} : vector<8x16xf32> to vector<8x1xf32>
    %409 = vector.broadcast %402 : vector<8x1xf32> to vector<8x6xf32>
    %410 = vector.broadcast %318 : vector<1x6xf32> to vector<8x6xf32>
    %411 = arith.subf %409, %410 : vector<8x6xf32>
    %412 = math.absf %411 : vector<8x6xf32>
    %cst_111 = arith.constant 1.000000e+00 : f32
    %413 = vector.broadcast %cst_111 : f32 to vector<8x6xf32>
    %414 = arith.subf %413, %412 : vector<8x6xf32>
    %cst_112 = arith.constant 0.000000e+00 : f32
    %415 = vector.broadcast %cst_112 : f32 to vector<8x6xf32>
    %416 = arith.maximumf %415, %414 : vector<8x6xf32>
    %417 = vector.broadcast %407 : vector<8x1xf32> to vector<8x4xf32>
    %418 = vector.broadcast %320 : vector<1x4xf32> to vector<8x4xf32>
    %419 = arith.subf %417, %418 : vector<8x4xf32>
    %420 = math.absf %419 : vector<8x4xf32>
    %cst_113 = arith.constant 1.000000e+00 : f32
    %421 = vector.broadcast %cst_113 : f32 to vector<8x4xf32>
    %422 = arith.subf %421, %420 : vector<8x4xf32>
    %cst_114 = arith.constant 0.000000e+00 : f32
    %423 = vector.broadcast %cst_114 : f32 to vector<8x4xf32>
    %424 = arith.maximumf %423, %422 : vector<8x4xf32>
    %425 = vector.broadcast %408 : vector<8x1xf32> to vector<8x4xf32>
    %426 = arith.mulf %424, %425 : vector<8x4xf32>
    %427 = vector.shape_cast %426 : vector<8x4xf32> to vector<8x4x1xf32>
    %428 = vector.shape_cast %416 : vector<8x6xf32> to vector<8x1x6xf32>
    %429 = vector.broadcast %427 : vector<8x4x1xf32> to vector<8x4x6xf32>
    %430 = vector.broadcast %428 : vector<8x1x6xf32> to vector<8x4x6xf32>
    %431 = arith.mulf %429, %430 : vector<8x4x6xf32>
    %432 = arith.addf %397, %431 : vector<8x4x6xf32>
    %433 = vector.extract_strided_slice %2 {offsets = [0, 7], sizes = [8, 1], strides = [1, 1]} : vector<8x16xf32> to vector<8x1xf32>
    %cst_115 = arith.constant 6.000000e+00 : f32
    %434 = vector.broadcast %cst_115 : f32 to vector<8x1xf32>
    %435 = arith.mulf %433, %434 : vector<8x1xf32>
    %cst_116 = arith.constant 5.000000e-01 : f32
    %436 = vector.broadcast %cst_116 : f32 to vector<8x1xf32>
    %437 = arith.subf %435, %436 : vector<8x1xf32>
    %438 = vector.extract_strided_slice %3 {offsets = [0, 7], sizes = [8, 1], strides = [1, 1]} : vector<8x16xf32> to vector<8x1xf32>
    %cst_117 = arith.constant 4.000000e+00 : f32
    %439 = vector.broadcast %cst_117 : f32 to vector<8x1xf32>
    %440 = arith.mulf %438, %439 : vector<8x1xf32>
    %cst_118 = arith.constant 5.000000e-01 : f32
    %441 = vector.broadcast %cst_118 : f32 to vector<8x1xf32>
    %442 = arith.subf %440, %441 : vector<8x1xf32>
    %443 = vector.extract_strided_slice %4 {offsets = [0, 7], sizes = [8, 1], strides = [1, 1]} : vector<8x16xf32> to vector<8x1xf32>
    %444 = vector.broadcast %437 : vector<8x1xf32> to vector<8x6xf32>
    %445 = vector.broadcast %318 : vector<1x6xf32> to vector<8x6xf32>
    %446 = arith.subf %444, %445 : vector<8x6xf32>
    %447 = math.absf %446 : vector<8x6xf32>
    %cst_119 = arith.constant 1.000000e+00 : f32
    %448 = vector.broadcast %cst_119 : f32 to vector<8x6xf32>
    %449 = arith.subf %448, %447 : vector<8x6xf32>
    %cst_120 = arith.constant 0.000000e+00 : f32
    %450 = vector.broadcast %cst_120 : f32 to vector<8x6xf32>
    %451 = arith.maximumf %450, %449 : vector<8x6xf32>
    %452 = vector.broadcast %442 : vector<8x1xf32> to vector<8x4xf32>
    %453 = vector.broadcast %320 : vector<1x4xf32> to vector<8x4xf32>
    %454 = arith.subf %452, %453 : vector<8x4xf32>
    %455 = math.absf %454 : vector<8x4xf32>
    %cst_121 = arith.constant 1.000000e+00 : f32
    %456 = vector.broadcast %cst_121 : f32 to vector<8x4xf32>
    %457 = arith.subf %456, %455 : vector<8x4xf32>
    %cst_122 = arith.constant 0.000000e+00 : f32
    %458 = vector.broadcast %cst_122 : f32 to vector<8x4xf32>
    %459 = arith.maximumf %458, %457 : vector<8x4xf32>
    %460 = vector.broadcast %443 : vector<8x1xf32> to vector<8x4xf32>
    %461 = arith.mulf %459, %460 : vector<8x4xf32>
    %462 = vector.shape_cast %461 : vector<8x4xf32> to vector<8x4x1xf32>
    %463 = vector.shape_cast %451 : vector<8x6xf32> to vector<8x1x6xf32>
    %464 = vector.broadcast %462 : vector<8x4x1xf32> to vector<8x4x6xf32>
    %465 = vector.broadcast %463 : vector<8x1x6xf32> to vector<8x4x6xf32>
    %466 = arith.mulf %464, %465 : vector<8x4x6xf32>
    %467 = arith.addf %432, %466 : vector<8x4x6xf32>
    %c0_123 = arith.constant 0 : index
    %c96_124 = arith.constant 96 : index
    %c8_125 = arith.constant 8 : index
    %468 = vector.load %arg2[%c0_123, %c96_124, %c8_125] : memref<1x120x32xf32, #tpu.memory_space<vmem>>, vector<1x24x8xf32>
    %469 = vector.shape_cast %468 : vector<1x24x8xf32> to vector<24x8xf32>
    %470 = vector.shape_cast %467 : vector<8x4x6xf32> to vector<8x24xf32>
    %cst_126 = arith.constant dense<0.000000e+00> : vector<8x8xf32>
    %471 = tpu.matmul %470, %469, %cst_126 {dimension_numbers = #tpu.dot_dimension_numbers<[1], [0], [0], [1], [0, 0, 1, 1], [], []>} : vector<8x24xf32>, vector<24x8xf32>, vector<8x8xf32> -> vector<8x8xf32>
    %472 = arith.addf %164, %471 : vector<8x8xf32>
    %cst_127 = arith.constant 0.000000e+00 : f32
    %473 = vector.broadcast %cst_127 : f32 to vector<8x4x6xf32>
    %474 = vector.extract_strided_slice %2 {offsets = [0, 10], sizes = [8, 1], strides = [1, 1]} : vector<8x16xf32> to vector<8x1xf32>
    %cst_128 = arith.constant 6.000000e+00 : f32
    %475 = vector.broadcast %cst_128 : f32 to vector<8x1xf32>
    %476 = arith.mulf %474, %475 : vector<8x1xf32>
    %cst_129 = arith.constant 5.000000e-01 : f32
    %477 = vector.broadcast %cst_129 : f32 to vector<8x1xf32>
    %478 = arith.subf %476, %477 : vector<8x1xf32>
    %479 = vector.extract_strided_slice %3 {offsets = [0, 10], sizes = [8, 1], strides = [1, 1]} : vector<8x16xf32> to vector<8x1xf32>
    %cst_130 = arith.constant 4.000000e+00 : f32
    %480 = vector.broadcast %cst_130 : f32 to vector<8x1xf32>
    %481 = arith.mulf %479, %480 : vector<8x1xf32>
    %cst_131 = arith.constant 5.000000e-01 : f32
    %482 = vector.broadcast %cst_131 : f32 to vector<8x1xf32>
    %483 = arith.subf %481, %482 : vector<8x1xf32>
    %484 = vector.extract_strided_slice %4 {offsets = [0, 10], sizes = [8, 1], strides = [1, 1]} : vector<8x16xf32> to vector<8x1xf32>
    %485 = vector.broadcast %478 : vector<8x1xf32> to vector<8x6xf32>
    %486 = vector.broadcast %318 : vector<1x6xf32> to vector<8x6xf32>
    %487 = arith.subf %485, %486 : vector<8x6xf32>
    %488 = math.absf %487 : vector<8x6xf32>
    %cst_132 = arith.constant 1.000000e+00 : f32
    %489 = vector.broadcast %cst_132 : f32 to vector<8x6xf32>
    %490 = arith.subf %489, %488 : vector<8x6xf32>
    %cst_133 = arith.constant 0.000000e+00 : f32
    %491 = vector.broadcast %cst_133 : f32 to vector<8x6xf32>
    %492 = arith.maximumf %491, %490 : vector<8x6xf32>
    %493 = vector.broadcast %483 : vector<8x1xf32> to vector<8x4xf32>
    %494 = vector.broadcast %320 : vector<1x4xf32> to vector<8x4xf32>
    %495 = arith.subf %493, %494 : vector<8x4xf32>
    %496 = math.absf %495 : vector<8x4xf32>
    %cst_134 = arith.constant 1.000000e+00 : f32
    %497 = vector.broadcast %cst_134 : f32 to vector<8x4xf32>
    %498 = arith.subf %497, %496 : vector<8x4xf32>
    %cst_135 = arith.constant 0.000000e+00 : f32
    %499 = vector.broadcast %cst_135 : f32 to vector<8x4xf32>
    %500 = arith.maximumf %499, %498 : vector<8x4xf32>
    %501 = vector.broadcast %484 : vector<8x1xf32> to vector<8x4xf32>
    %502 = arith.mulf %500, %501 : vector<8x4xf32>
    %503 = vector.shape_cast %502 : vector<8x4xf32> to vector<8x4x1xf32>
    %504 = vector.shape_cast %492 : vector<8x6xf32> to vector<8x1x6xf32>
    %505 = vector.broadcast %503 : vector<8x4x1xf32> to vector<8x4x6xf32>
    %506 = vector.broadcast %504 : vector<8x1x6xf32> to vector<8x4x6xf32>
    %507 = arith.mulf %505, %506 : vector<8x4x6xf32>
    %508 = arith.addf %473, %507 : vector<8x4x6xf32>
    %509 = vector.extract_strided_slice %2 {offsets = [0, 11], sizes = [8, 1], strides = [1, 1]} : vector<8x16xf32> to vector<8x1xf32>
    %cst_136 = arith.constant 6.000000e+00 : f32
    %510 = vector.broadcast %cst_136 : f32 to vector<8x1xf32>
    %511 = arith.mulf %509, %510 : vector<8x1xf32>
    %cst_137 = arith.constant 5.000000e-01 : f32
    %512 = vector.broadcast %cst_137 : f32 to vector<8x1xf32>
    %513 = arith.subf %511, %512 : vector<8x1xf32>
    %514 = vector.extract_strided_slice %3 {offsets = [0, 11], sizes = [8, 1], strides = [1, 1]} : vector<8x16xf32> to vector<8x1xf32>
    %cst_138 = arith.constant 4.000000e+00 : f32
    %515 = vector.broadcast %cst_138 : f32 to vector<8x1xf32>
    %516 = arith.mulf %514, %515 : vector<8x1xf32>
    %cst_139 = arith.constant 5.000000e-01 : f32
    %517 = vector.broadcast %cst_139 : f32 to vector<8x1xf32>
    %518 = arith.subf %516, %517 : vector<8x1xf32>
    %519 = vector.extract_strided_slice %4 {offsets = [0, 11], sizes = [8, 1], strides = [1, 1]} : vector<8x16xf32> to vector<8x1xf32>
    %520 = vector.broadcast %513 : vector<8x1xf32> to vector<8x6xf32>
    %521 = vector.broadcast %318 : vector<1x6xf32> to vector<8x6xf32>
    %522 = arith.subf %520, %521 : vector<8x6xf32>
    %523 = math.absf %522 : vector<8x6xf32>
    %cst_140 = arith.constant 1.000000e+00 : f32
    %524 = vector.broadcast %cst_140 : f32 to vector<8x6xf32>
    %525 = arith.subf %524, %523 : vector<8x6xf32>
    %cst_141 = arith.constant 0.000000e+00 : f32
    %526 = vector.broadcast %cst_141 : f32 to vector<8x6xf32>
    %527 = arith.maximumf %526, %525 : vector<8x6xf32>
    %528 = vector.broadcast %518 : vector<8x1xf32> to vector<8x4xf32>
    %529 = vector.broadcast %320 : vector<1x4xf32> to vector<8x4xf32>
    %530 = arith.subf %528, %529 : vector<8x4xf32>
    %531 = math.absf %530 : vector<8x4xf32>
    %cst_142 = arith.constant 1.000000e+00 : f32
    %532 = vector.broadcast %cst_142 : f32 to vector<8x4xf32>
    %533 = arith.subf %532, %531 : vector<8x4xf32>
    %cst_143 = arith.constant 0.000000e+00 : f32
    %534 = vector.broadcast %cst_143 : f32 to vector<8x4xf32>
    %535 = arith.maximumf %534, %533 : vector<8x4xf32>
    %536 = vector.broadcast %519 : vector<8x1xf32> to vector<8x4xf32>
    %537 = arith.mulf %535, %536 : vector<8x4xf32>
    %538 = vector.shape_cast %537 : vector<8x4xf32> to vector<8x4x1xf32>
    %539 = vector.shape_cast %527 : vector<8x6xf32> to vector<8x1x6xf32>
    %540 = vector.broadcast %538 : vector<8x4x1xf32> to vector<8x4x6xf32>
    %541 = vector.broadcast %539 : vector<8x1x6xf32> to vector<8x4x6xf32>
    %542 = arith.mulf %540, %541 : vector<8x4x6xf32>
    %543 = arith.addf %508, %542 : vector<8x4x6xf32>
    %c0_144 = arith.constant 0 : index
    %c96_145 = arith.constant 96 : index
    %c16_146 = arith.constant 16 : index
    %544 = vector.load %arg2[%c0_144, %c96_145, %c16_146] : memref<1x120x32xf32, #tpu.memory_space<vmem>>, vector<1x24x8xf32>
    %545 = vector.shape_cast %544 : vector<1x24x8xf32> to vector<24x8xf32>
    %546 = vector.shape_cast %543 : vector<8x4x6xf32> to vector<8x24xf32>
    %cst_147 = arith.constant dense<0.000000e+00> : vector<8x8xf32>
    %547 = tpu.matmul %546, %545, %cst_147 {dimension_numbers = #tpu.dot_dimension_numbers<[1], [0], [0], [1], [0, 0, 1, 1], [], []>} : vector<8x24xf32>, vector<24x8xf32>, vector<8x8xf32> -> vector<8x8xf32>
    %548 = arith.addf %240, %547 : vector<8x8xf32>
    %cst_148 = arith.constant 0.000000e+00 : f32
    %549 = vector.broadcast %cst_148 : f32 to vector<8x4x6xf32>
    %550 = vector.extract_strided_slice %2 {offsets = [0, 14], sizes = [8, 1], strides = [1, 1]} : vector<8x16xf32> to vector<8x1xf32>
    %cst_149 = arith.constant 6.000000e+00 : f32
    %551 = vector.broadcast %cst_149 : f32 to vector<8x1xf32>
    %552 = arith.mulf %550, %551 : vector<8x1xf32>
    %cst_150 = arith.constant 5.000000e-01 : f32
    %553 = vector.broadcast %cst_150 : f32 to vector<8x1xf32>
    %554 = arith.subf %552, %553 : vector<8x1xf32>
    %555 = vector.extract_strided_slice %3 {offsets = [0, 14], sizes = [8, 1], strides = [1, 1]} : vector<8x16xf32> to vector<8x1xf32>
    %cst_151 = arith.constant 4.000000e+00 : f32
    %556 = vector.broadcast %cst_151 : f32 to vector<8x1xf32>
    %557 = arith.mulf %555, %556 : vector<8x1xf32>
    %cst_152 = arith.constant 5.000000e-01 : f32
    %558 = vector.broadcast %cst_152 : f32 to vector<8x1xf32>
    %559 = arith.subf %557, %558 : vector<8x1xf32>
    %560 = vector.extract_strided_slice %4 {offsets = [0, 14], sizes = [8, 1], strides = [1, 1]} : vector<8x16xf32> to vector<8x1xf32>
    %561 = vector.broadcast %554 : vector<8x1xf32> to vector<8x6xf32>
    %562 = vector.broadcast %318 : vector<1x6xf32> to vector<8x6xf32>
    %563 = arith.subf %561, %562 : vector<8x6xf32>
    %564 = math.absf %563 : vector<8x6xf32>
    %cst_153 = arith.constant 1.000000e+00 : f32
    %565 = vector.broadcast %cst_153 : f32 to vector<8x6xf32>
    %566 = arith.subf %565, %564 : vector<8x6xf32>
    %cst_154 = arith.constant 0.000000e+00 : f32
    %567 = vector.broadcast %cst_154 : f32 to vector<8x6xf32>
    %568 = arith.maximumf %567, %566 : vector<8x6xf32>
    %569 = vector.broadcast %559 : vector<8x1xf32> to vector<8x4xf32>
    %570 = vector.broadcast %320 : vector<1x4xf32> to vector<8x4xf32>
    %571 = arith.subf %569, %570 : vector<8x4xf32>
    %572 = math.absf %571 : vector<8x4xf32>
    %cst_155 = arith.constant 1.000000e+00 : f32
    %573 = vector.broadcast %cst_155 : f32 to vector<8x4xf32>
    %574 = arith.subf %573, %572 : vector<8x4xf32>
    %cst_156 = arith.constant 0.000000e+00 : f32
    %575 = vector.broadcast %cst_156 : f32 to vector<8x4xf32>
    %576 = arith.maximumf %575, %574 : vector<8x4xf32>
    %577 = vector.broadcast %560 : vector<8x1xf32> to vector<8x4xf32>
    %578 = arith.mulf %576, %577 : vector<8x4xf32>
    %579 = vector.shape_cast %578 : vector<8x4xf32> to vector<8x4x1xf32>
    %580 = vector.shape_cast %568 : vector<8x6xf32> to vector<8x1x6xf32>
    %581 = vector.broadcast %579 : vector<8x4x1xf32> to vector<8x4x6xf32>
    %582 = vector.broadcast %580 : vector<8x1x6xf32> to vector<8x4x6xf32>
    %583 = arith.mulf %581, %582 : vector<8x4x6xf32>
    %584 = arith.addf %549, %583 : vector<8x4x6xf32>
    %585 = vector.extract_strided_slice %2 {offsets = [0, 15], sizes = [8, 1], strides = [1, 1]} : vector<8x16xf32> to vector<8x1xf32>
    %cst_157 = arith.constant 6.000000e+00 : f32
    %586 = vector.broadcast %cst_157 : f32 to vector<8x1xf32>
    %587 = arith.mulf %585, %586 : vector<8x1xf32>
    %cst_158 = arith.constant 5.000000e-01 : f32
    %588 = vector.broadcast %cst_158 : f32 to vector<8x1xf32>
    %589 = arith.subf %587, %588 : vector<8x1xf32>
    %590 = vector.extract_strided_slice %3 {offsets = [0, 15], sizes = [8, 1], strides = [1, 1]} : vector<8x16xf32> to vector<8x1xf32>
    %cst_159 = arith.constant 4.000000e+00 : f32
    %591 = vector.broadcast %cst_159 : f32 to vector<8x1xf32>
    %592 = arith.mulf %590, %591 : vector<8x1xf32>
    %cst_160 = arith.constant 5.000000e-01 : f32
    %593 = vector.broadcast %cst_160 : f32 to vector<8x1xf32>
    %594 = arith.subf %592, %593 : vector<8x1xf32>
    %595 = vector.extract_strided_slice %4 {offsets = [0, 15], sizes = [8, 1], strides = [1, 1]} : vector<8x16xf32> to vector<8x1xf32>
    %596 = vector.broadcast %589 : vector<8x1xf32> to vector<8x6xf32>
    %597 = vector.broadcast %318 : vector<1x6xf32> to vector<8x6xf32>
    %598 = arith.subf %596, %597 : vector<8x6xf32>
    %599 = math.absf %598 : vector<8x6xf32>
    %cst_161 = arith.constant 1.000000e+00 : f32
    %600 = vector.broadcast %cst_161 : f32 to vector<8x6xf32>
    %601 = arith.subf %600, %599 : vector<8x6xf32>
    %cst_162 = arith.constant 0.000000e+00 : f32
    %602 = vector.broadcast %cst_162 : f32 to vector<8x6xf32>
    %603 = arith.maximumf %602, %601 : vector<8x6xf32>
    %604 = vector.broadcast %594 : vector<8x1xf32> to vector<8x4xf32>
    %605 = vector.broadcast %320 : vector<1x4xf32> to vector<8x4xf32>
    %606 = arith.subf %604, %605 : vector<8x4xf32>
    %607 = math.absf %606 : vector<8x4xf32>
    %cst_163 = arith.constant 1.000000e+00 : f32
    %608 = vector.broadcast %cst_163 : f32 to vector<8x4xf32>
    %609 = arith.subf %608, %607 : vector<8x4xf32>
    %cst_164 = arith.constant 0.000000e+00 : f32
    %610 = vector.broadcast %cst_164 : f32 to vector<8x4xf32>
    %611 = arith.maximumf %610, %609 : vector<8x4xf32>
    %612 = vector.broadcast %595 : vector<8x1xf32> to vector<8x4xf32>
    %613 = arith.mulf %611, %612 : vector<8x4xf32>
    %614 = vector.shape_cast %613 : vector<8x4xf32> to vector<8x4x1xf32>
    %615 = vector.shape_cast %603 : vector<8x6xf32> to vector<8x1x6xf32>
    %616 = vector.broadcast %614 : vector<8x4x1xf32> to vector<8x4x6xf32>
    %617 = vector.broadcast %615 : vector<8x1x6xf32> to vector<8x4x6xf32>
    %618 = arith.mulf %616, %617 : vector<8x4x6xf32>
    %619 = arith.addf %584, %618 : vector<8x4x6xf32>
    %c0_165 = arith.constant 0 : index
    %c96_166 = arith.constant 96 : index
    %c24_167 = arith.constant 24 : index
    %620 = vector.load %arg2[%c0_165, %c96_166, %c24_167] : memref<1x120x32xf32, #tpu.memory_space<vmem>>, vector<1x24x8xf32>
    %621 = vector.shape_cast %620 : vector<1x24x8xf32> to vector<24x8xf32>
    %622 = vector.shape_cast %619 : vector<8x4x6xf32> to vector<8x24xf32>
    %cst_168 = arith.constant dense<0.000000e+00> : vector<8x8xf32>
    %623 = tpu.matmul %622, %621, %cst_168 {dimension_numbers = #tpu.dot_dimension_numbers<[1], [0], [0], [1], [0, 0, 1, 1], [], []>} : vector<8x24xf32>, vector<24x8xf32>, vector<8x8xf32> -> vector<8x8xf32>
    %624 = arith.addf %316, %623 : vector<8x8xf32>
    %625 = tpu.concatenate %396, %472, %548, %624 in 1 : vector<8x8xf32>, vector<8x8xf32>, vector<8x8xf32>, vector<8x8xf32> -> vector<8x32xf32>
    %c0_169 = arith.constant 0 : index
    %c0_170 = arith.constant 0 : index
    %c0_171 = arith.constant 0 : index
    %626 = vector.load %arg4[%c0_169, %c0_170, %c0_171] : memref<1x8x32xf32, #tpu.memory_space<vmem>>, vector<1x8x32xf32>
    %627 = vector.shape_cast %626 : vector<1x8x32xf32> to vector<8x32xf32>
    %628 = vector.shape_cast %625 : vector<8x32xf32> to vector<1x8x32xf32>
    tpu.vector_store %arg4[%c0_169, %c0_170, %c0_171], %628 {strides = array<i32>} : memref<1x8x32xf32, #tpu.memory_space<vmem>>, vector<1x8x32xf32>,
    return
  }
  func.func @transform_0(%arg0: i32, %arg1: i32) -> (i32, i32, i32) {
    %c0_i32 = arith.constant 0 : i32
    %c0_i32_0 = arith.constant 0 : i32
    %c0_i32_1 = arith.constant 0 : i32
    return %arg0, %c0_i32, %c0_i32_0 : i32, i32, i32
  }
  func.func @transform_1(%arg0: i32, %arg1: i32) -> (i32, i32, i32) {
    %c0_i32 = arith.constant 0 : i32
    %c0_i32_0 = arith.constant 0 : i32
    return %arg0, %arg1, %c0_i32 : i32, i32, i32
  }
  func.func @transform_2(%arg0: i32, %arg1: i32) -> (i32, i32, i32) {
    %c0_i32 = arith.constant 0 : i32
    %c0_i32_0 = arith.constant 0 : i32
    return %arg0, %arg1, %c0_i32 : i32, i32, i32
  }
}

</mosaic_0001>

<bundles_post_ra>
// kernel: tpu_custom_call.1
= control target key start
LH: loop header
LB: loop body
LE: loop exit
PB: predicated region body
PF: predicated region fallthrough
CT: control target
= control target key end

     0   :  { %7 = vsyncpa [#allocation3], 0  ;;  %s7740_s0 = inlined_call_operand.vmem [shape: f32[2,120,32], index: 0, kind: input, shape index: {}]   ;;  %s7741_s1 = inlined_call_operand.vmem [shape: f32[2,8,48], index: 1, kind: input, shape index: {}]   ;;  %s7742_s2 = inlined_call_operand.hbm [shape: f32[2,8,32], index: 2, kind: output, shape index: {}]  }
   0x1   :  { %9 = vsyncpa [#allocation3 + $0x1], 0  ;;  %s5874_s9 = smov 0   ;;  %s5876_s10 = smov 0  }
   0x2   :  { %s5878_s11 = smov 0   ;;  %s5880_s12 = smov 0  }
   0x3   :  { %s5882_s13 = smov 0   ;;  %s5884_s14 = smov 0  }
   0x4 LB: > { %s5096_s15 = sadd.s32 4294967295, %s5788_s14   ;;  %s5097_s16 = sadd.s32 4294967294, %s5788_s14   ;;  %s5788_s14 = sphi %s5884_s14, %s15_s14   ;;  %s5784_s13 = sphi %s5882_s13, %s7863_s13   ;;  %s5780_s12 = sphi %s5880_s12, %s7862_s12   ;;  %s5776_s11 = sphi %s5878_s11, %s7861_s11   ;;  %s5772_s10 = sphi %s5876_s10, %s7860_s10   ;;  %s5768_s9 = sphi %s5874_s9, %s7859_s9  }
   0x5   : > { %s27_s17 = sadd.s32 1, %s5784_s13  ;;  %s90_s18 = sadd.s32 1, %s5776_s11 }
   0x6   : > { %p29_p0 = scmp.ge.s32.totalorder %s27_s17, 2  ;;  %p100_p1 = scmp.ne.s32.totalorder %s5776_s11, %s5772_s10 }
   0x7   : > { %p101_p2 = scmp.eq.s32.totalorder %s5096_s15, 1  ;;  %p106_p3 = scmp.ne.s32.totalorder %s5772_s10, %s5768_s9 }
   0x8   : > { %s7865_s17 = smov (%p29_p0, %s27_s17), 0  ;;  %p107_p5 = scmp.eq.s32.totalorder %s5097_s16, 1 }
   0x9   : > { %p5914_p4 = por %p101_p2, %p100_p1  ;;  %s85_s20 = ssub.s32 %s5784_s13, %s7865_s17 }
   0xa   : > { %p5100_p6 = scmp.ge.s32.totalorder %s5788_s14, 1  ;;  %p88_p7 = scmp.eq.s32.totalorder %s85_s20, 0 }
   0xb   : > { %p5921_p8 = por %p107_p5, %p106_p3  ;;  %p143_p9 = scmp.lt.s32.totalorder %s5788_s14, 3 }
   0xc   : > { %s5927_s22 = scalar_select %p88_p7, %s5776_s11, %s90_s18  }
   0xd   : > { %p144_p10 = pnand %p5100_p6, %p143_p9 }
   0xf   : > { %147 = sbr.rel (%p144_p10) target bundleno = 1103 (0x44f), region = 28 }
  0x16   : > { %p172_p11 = scmp.lt.s32.totalorder %s5780_s12, 1  ;;  %v5790_v0 = vmov 0   ;;  %v5791_v1 = vmov 32   ;;  %v5792_v6 = vmov 33   ;;  %v5793_v8 = vmov 16   ;;  %s5841_s28 = smov 12  }
  0x17   : > { %5549 = vset.pattern.permute.xlu0 %v5790_v0  ;;  %5548 = vset.pattern.permute.xlu1 %v5791_v1  ;;  %v5794_v9 = vmov 17   ;;  %v5795_v10 = vmov 1   ;;  %v5796_v11 = vmov 4   ;;  %v5797_v13 = vmov 20   ;;  %s5842_s29 = smov 36   ;;  %s5843_s30 = smov 60  }
  0x18   : > { %s5931_s23 = scalar_select %p172_p11, %s5780_s12, 1  ;;  %v5798_v14 = vmov 36   ;;  %v5799_v16 = vmov 18   ;;  %v5800_v17 = vmov 19   ;;  %v5801_v18 = vmov 23  }
  0x19   : > { %v5802_v19 = vmov 22   ;;  %v5803_v20 = vmov 38   ;;  %v5804_v21 = vmov 34   ;;  %v5805_v22 = vmov 37   ;;  %s5844_s3 = smov 84   ;;  %s5845_s4 = smov 24  }
  0x1a   : > { %s5103_s24 = sshll.u32 %s5931_s23, 3  ;;  %v5806_v23 = vmov 35   ;;  %v5807_v24 = vmov 30   ;;  %v5808_v25 = vmov 39   ;;  %v5809_v26 = vmov 43   ;;  %s5846_s5 = smov 48  }
  0x1b   : > { %s183_s27 = scalar_lea.vmem %s7741_s1, %s5103_s24  ;;  %v5810_v27 = vmov 21   ;;  %v5811_v28 = vmov 24   ;;  %v5812_v29 = vmov 26   ;;  %v5813_v31 = vmov 29   ;;  %s5847_s6 = smov 72  }
  0x1c   : > { %v5937_v2 = vld [vmem:[%s183_s27] sm:$0xff]  ;;  %v5814_v32 = vmov 27   ;;  %v5815_v34 = vmov 6   ;;  %v5816_v35 = vmov 31   ;;  %v5817_v36 = vmov 41   ;;  %s5424_s7 = smul.u32 120, %s5931_s23 }
  0x1d   : > { %v188_v3 = vmul.f32 12.0, %v5937_v2  ;;  %212 = vperm.xlu1 %5548, %v5937_v2   ;;  %v190_v4 = vmul.f32 8.0, %v5937_v2  ;;  %v2400_v12 = vmul.f32 4.0, %v5937_v2  ;;  %v2398_v30 = vmul.f32 6.0, %v5937_v2  ;;  %s5848_s18 = smov 120   ;;  %s5849_s20 = smov 18  }
  0x1e   : > { %v5818_v37 = vmov 42   ;;  %v5819_v38 = vmov 5   ;;  %v5820_v39 = vmov 46   ;;  %v5821_v40 = vmov 47   ;;  %s6841_s16 = scalar_lea.vmem %s7740_s0, %s5424_s7  ;;  %s5850_s23 = smov 6  }
  0x1f   : > { %v5942_v5 = vadd.f32 -0.5, %v188_v3  ;;  %v5945_v7 = vadd.f32 -0.5, %v190_v4  ;;  %v5107_v15 = vadd.f32 -0.5, %v2400_v12  ;;  %v5965_v33 = vadd.f32 -0.5, %v2398_v30  ;;  %s5854_s24 = smov 112   ;;  %s5855_s25 = smov 104  }
  0x20   : > { %v5822_v41 = vmov 25   ;;  %v5823_v42 = vmov 28   ;;  %v5824_v43 = vmov 2   ;;  %v5825_v44 = vmov 3   ;;  %s5856_s26 = smov 8   ;;  %s5857_s27 = smov 16  }
  0x21   : > { %194 = vperm.xlu0 %5549, %v5942_v5   ;;  %5552 = vset.pattern.permute.xlu1 %v5792_v6  ;;  %v5826_v45 = vmov 7   ;;  %v5827_v46 = vmov 40   ;;  %v5828_v47 = vmov 10   ;;  %v5829_v48 = vmov 44   ;;  %s5858_s15 = smov [#allocation2]  }
  0x22   : > { %395 = vperm.xlu1 %5552, %v5937_v2   ;;  %v5830_v49 = vmov 45   ;;  %v185_v50 = vlaneseq  ;;  %v5831_v54 = vmov 11   ;;  %vm5853_vm0 = vmmov 0  }
  0x23   : > { %vm737_vm1 = vcmask 97280   ;;  %vm2853_vm2 = vcmask 48128   ;;  %vm2856_vm3 = vcmask 146432   ;;  %vm739_vm4 = vcmask 195584  }
  0x24   : > { %v186_v52 = vand.u32 127, %v185_v50  ;;  %v5988_v62 = vshrl.u32 %v185_v50, 7  ;;  %vm741_vm5 = vcmask 293888   ;;  %vm743_vm6 = vcmask 392192  }
  0x25   : > { %5550 = vset.pattern.permute.xlu0 %v5793_v8  ;;  %vm745_vm7 = vcmask 490496   ;;  %vm747_vm8 = vcmask 588800   ;;  %vm749_vm9 = vcmask 687104   ;;  %vm2931_vm10 = vcmask 785408  }
  0x26   : > { %203 = vperm.xlu0 %5550, %v5945_v7   ;;  %5553 = vset.pattern.permute.xlu1 %v5794_v9  ;;  %v5984_v56 = vcvt.s32.f32 %v186_v52  ;;  %v5995_v4 = vsub.s32 2, %v5988_v62  ;;  %v6001_v8 = vsub.s32 4, %v5988_v62  ;;  %v6006_v12 = vsub.s32 1, %v5988_v62 }
  0x27   : > { %387 = vperm.xlu1 %5553, %v5945_v7   ;;  %vm4991_vm11 = vcmask 64512   ;;  %vm4993_vm12 = vcmask 130048   ;;  %vm4996_vm13 = vcmask 261120  }
  0x2a   : > { %5551 = vset.pattern.permute.xlu0 %v5795_v10 }
  0x2b   : > { %5554 = vset.pattern.permute.xlu1 %v5796_v11  ;;  %379 = vperm.xlu0 %5551, %v5942_v5  }
  0x2c   : > { %752 = vperm.xlu1 %5554, %v5942_v5  }
  0x2f   : > { %5555 = vset.pattern.permute.xlu0 %v5797_v13 }
  0x30   : > { %5556 = vset.pattern.permute.xlu1 %v5798_v14  ;;  %760 = vperm.xlu0 %5555, %v5945_v7  }
  0x31   : > { %768 = vperm.xlu1 %5556, %v5937_v2  }
  0x34   : > { %5557 = vset.pattern.permute.xlu0 %v5799_v16 }
  0x35   : > { %5558 = vset.pattern.permute.xlu1 %v5800_v17  ;;  %2413 = vperm.xlu0 %5557, %v5107_v15  }
  0x36   : > { %2596 = vperm.xlu1 %5558, %v5107_v15  }
  0x39   : > { %5560 = vset.pattern.permute.xlu0 %v5801_v18 }
  0x3a   : > { %5559 = vset.pattern.permute.xlu1 %v5802_v19  ;;  %3197 = vperm.xlu0 %5560, %v5107_v15   ;;  %v6014_v19 = vsub.s32 3, %v5988_v62 }
  0x3b   : > { %3014 = vperm.xlu1 %5559, %v5107_v15  }
  0x3e   : > { %5563 = vset.pattern.permute.xlu0 %v5803_v20 }
  0x3f   : > { %5561 = vset.pattern.permute.xlu1 %v5804_v21  ;;  %3022 = vperm.xlu0 %5563, %v5937_v2  }
  0x40   : > { %2421 = vperm.xlu1 %5561, %v5937_v2  }
  0x43   : > { %5566 = vset.pattern.permute.xlu0 %v5805_v22 }
  0x44   : > { %5562 = vset.pattern.permute.xlu1 %v5806_v23  ;;  %951 = vperm.xlu0 %5566, %v5937_v2  }
  0x45   : > { %2604 = vperm.xlu1 %5562, %v5937_v2  }
  0x48   : > { %5569 = vset.pattern.permute.xlu0 %v5807_v24 }
  0x49   : > { %5564 = vset.pattern.permute.xlu1 %v5808_v25  ;;  %4330 = vperm.xlu0 %5569, %v5107_v15  }
  0x4a   : > { %3205 = vperm.xlu1 %5564, %v5937_v2  }
  0x4d   : > { %5572 = vset.pattern.permute.xlu0 %v5809_v26  ;;  %v6020_v26 = vsub.s32 5, %v5988_v62 }
  0x4e   : > { %5565 = vset.pattern.permute.xlu1 %v5810_v27  ;;  %3863 = vperm.xlu0 %5572, %v5937_v2  }
  0x4f   : > { %943 = vperm.xlu1 %5565, %v5945_v7  }
  0x52   : > { %5575 = vset.pattern.permute.xlu0 %v5811_v28 }
  0x53   : > { %5567 = vset.pattern.permute.xlu1 %v5812_v29  ;;  %1309 = vperm.xlu0 %5575, %v5945_v7  }
  0x54   : > { %3672 = vperm.xlu1 %5567, %v5107_v15  }
  0x57   : > { %5578 = vset.pattern.permute.xlu0 %v5813_v31 }
  0x58   : > { %5568 = vset.pattern.permute.xlu1 %v5814_v32  ;;  %2041 = vperm.xlu0 %5578, %v5945_v7   ;;  %v6026_v32 = vsub.s32 7, %v5988_v62 }
  0x59   : > { %3855 = vperm.xlu1 %5568, %v5107_v15  }
  0x5c   : > { %5581 = vset.pattern.permute.xlu0 %v5815_v34 }
  0x5d   : > { %5570 = vset.pattern.permute.xlu1 %v5816_v35  ;;  %3006 = vperm.xlu0 %5581, %v5965_v33  }
  0x5e   : > { %4513 = vperm.xlu1 %5570, %v5107_v15   ;;  %v6009_v15 = vsub.s32 6, %v5988_v62 }
  0x61   : > { %5584 = vset.pattern.permute.xlu0 %v5817_v36 }
  0x62   : > { %5571 = vset.pattern.permute.xlu1 %v5818_v37  ;;  %1500 = vperm.xlu0 %5584, %v5937_v2  }
  0x63   : > { %3680 = vperm.xlu1 %5571, %v5937_v2  }
  0x66   : > { %5587 = vset.pattern.permute.xlu0 %v5819_v38 }
  0x67   : > { %5573 = vset.pattern.permute.xlu1 %v5820_v39  ;;  %935 = vperm.xlu0 %5587, %v5942_v5  }
  0x68   : > { %4338 = vperm.xlu1 %5573, %v5937_v2  }
  0x6b   : > { %5588 = vset.pattern.permute.xlu0 %v5828_v47 }
  0x6c   : > { %5574 = vset.pattern.permute.xlu1 %v5821_v40 }
  0x6d   : > { %4521 = vperm.xlu1 %5574, %v5937_v2  }
  0x71   : > { %5576 = vset.pattern.permute.xlu1 %v5822_v41 }
  0x72   : > { %1492 = vperm.xlu1 %5576, %v5945_v7  }
  0x76   : > { %5577 = vset.pattern.permute.xlu1 %v5823_v42 }
  0x77   : > { %1858 = vperm.xlu1 %5577, %v5945_v7   ;;  %v5998_v7 = vsub.s32 0, %v5988_v62 }
  0x7b   : > { %5579 = vset.pattern.permute.xlu1 %v5824_v43 }
  0x7c   : > { %2404 = vperm.xlu1 %5579, %v5965_v33  }
  0x80   : > { %5580 = vset.pattern.permute.xlu1 %v5825_v44 }
  0x81   : > { %2588 = vperm.xlu1 %5580, %v5965_v33  }
  0x85   : > { %5582 = vset.pattern.permute.xlu1 %v5826_v45 }
  0x86   : > { %3189 = vperm.xlu1 %5582, %v5965_v33  }
  0x8a   : > { %5583 = vset.pattern.permute.xlu1 %v5827_v46 }
  0x8b   : > { %1317 = vperm.xlu1 %5583, %v5937_v2  }
  0x8f   : > { %5585 = vset.pattern.permute.xlu1 %v5829_v48 }
  0x90   : > { %1866 = vperm.xlu1 %5585, %v5937_v2  }
  0x94   : > { %5586 = vset.pattern.permute.xlu1 %v5830_v49 }
  0x95   : > { %2049 = vperm.xlu1 %5586, %v5937_v2  }
  0x99   : > { %5589 = vset.pattern.permute.xlu1 %v5831_v54 }
  0x9c   : > { %v213_v51 = vpop.permute.xlu1 %212 }
  0xa0   : > { %v5982_v53 = vpop.permute.xlu0 %194 }
  0xa1   : > { %v396_v55 = vpop.permute.xlu1 %395 }
  0xa5   : > { %v204_v57 = vpop.permute.xlu0 %203 }
  0xa6   : > { %v206_v58 = vsub.f32 %v204_v57, %v5984_v56  ;;  %v388_v59 = vpop.permute.xlu1 %387 }
  0xa7   : > { %v390_v61 = vsub.f32 %v388_v59, %v5984_v56 }
  0xa8   : > { %v207_v60 = vand.u32 2147483647, %v206_v58 }
  0xa9   : > { %v391_v3 = vand.u32 2147483647, %v390_v61 }
  0xaa   : > { %v208_v63 = vsub.f32 1.0, %v207_v60  ;;  %v5992_v1 = vpop.permute.xlu0 %379 }
  0xab   : > { %v5990_v0 = vpop.permute.xlu1 %752  ;;  %v392_v9 = vsub.f32 1.0, %v391_v3 }
  0xac   : > { %7765 = vst [vmem:[#allocation5_spill] sm:$0xff] %v5990_v0  ;;  %v209_v2 = vmax.f32 %v208_v63, 0.0 }
  0xad   : > { %v393_v16 = vmax.f32 %v392_v9, 0.0 }
  0xae   : > { %v215_v6 = vmul.f32 %v213_v51, %v209_v2 }
  0xaf   : > { %v761_v14 = vpop.permute.xlu0 %760  ;;  %v398_v23 = vmul.f32 %v396_v55, %v393_v16 }
  0xb0   : > { %v233_v10 = vrot.slane %v215_v6, %v5995_v4  ;;  %v219_v11 = vrot.slane %v215_v6, %v5998_v7  ;;  %v769_v13 = vpop.permute.xlu1 %768  ;;  %v247_v17 = vrot.slane %v215_v6, %v6001_v8  ;;  %v226_v18 = vrot.slane %v215_v6, %v6006_v12 }
  0xb1   : > { %v763_v21 = vsub.f32 %v761_v14, %v5984_v56  ;;  %v261_v24 = vrot.slane %v215_v6, %v6009_v15  ;;  %v240_v25 = vrot.slane %v215_v6, %v6014_v19  ;;  %v402_v30 = vrot.slane %v398_v23, %v5998_v7 }
  0xb2   : > { %235 = vbcast.lane.b32.xlu0 %v233_v10, 256  ;;  %221 = vbcast.lane.b32.xlu1 %v219_v11, 256  ;;  %v254_v31 = vrot.slane %v215_v6, %v6020_v26  ;;  %v416_v36 = vrot.slane %v398_v23, %v5995_v4  ;;  %v268_v37 = vrot.slane %v215_v6, %v6026_v32 }
  0xb3   : > { %v764_v27 = vand.u32 2147483647, %v763_v21  ;;  %v430_v42 = vrot.slane %v398_v23, %v6001_v8  ;;  %v409_v43 = vrot.slane %v398_v23, %v6006_v12  ;;  %v444_v48 = vrot.slane %v398_v23, %v6009_v15 }
  0xb4   : > { %v2414_v22 = vpop.permute.xlu0 %2413  ;;  %v423_v49 = vrot.slane %v398_v23, %v6014_v19  ;;  %v437_v55 = vrot.slane %v398_v23, %v6020_v26  ;;  %v451_v60 = vrot.slane %v398_v23, %v6026_v32 }
  0xb5   : > { %v2597_v20 = vpop.permute.xlu1 %2596  ;;  %v2416_v28 = vsub.f32 %v2414_v22, %v5984_v56  ;;  %v765_v34 = vsub.f32 1.0, %v764_v27 }
  0xb6   : > { %249 = vbcast.lane.b32.xlu0 %v247_v17, 256  ;;  %228 = vbcast.lane.b32.xlu1 %v226_v18, 256  ;;  %v2599_v47 = vsub.f32 %v2597_v20, %v5984_v56 }
  0xb7   : > { %v2417_v35 = vand.u32 2147483647, %v2416_v28  ;;  %v766_v39 = vmax.f32 %v765_v34, 0.0 }
  0xb8   : > { %v2600_v54 = vand.u32 2147483647, %v2599_v47 }
  0xb9   : > { %v2418_v41 = vsub.f32 1.0, %v2417_v35  ;;  %v6032_v45 = vmul.f32 %v769_v13, %v766_v39  ;;  %v3198_v20 = vpop.permute.xlu0 %3197 }
  0xba   : > { %263 = vbcast.lane.b32.xlu0 %v261_v24, 256  ;;  %242 = vbcast.lane.b32.xlu1 %v240_v25, 256  ;;  %v3015_v29 = vpop.permute.xlu1 %3014  ;;  %v2601_v59 = vsub.f32 1.0, %v2600_v54 }
  0xbb   : > { %v2419_v46 = vmax.f32 %v2418_v41, 0.0  ;;  %v782_v52 = vrot.slane %v6032_v45, %v6006_v12  ;;  %v775_v3 = vrot.slane %v6032_v45, %v5998_v7  ;;  %v3017_v9 = vsub.f32 %v3015_v29, %v5984_v56 }
  0xbc   : > { %v2602_v2 = vmax.f32 %v2601_v59, 0.0  ;;  %v789_v11 = vrot.slane %v6032_v45, %v5995_v4 }
  0xbd   : > { %v3018_v16 = vand.u32 2147483647, %v3017_v9 }
  0xbe   : > { %404 = vbcast.lane.b32.xlu0 %v402_v30, 256  ;;  %256 = vbcast.lane.b32.xlu1 %v254_v31, 256  ;;  %v3023_v29 = vpop.permute.xlu0 %3022  ;;  %v3200_v30 = vsub.f32 %v3198_v20, %v5984_v56 }
  0xbf   : > { %v2422_v38 = vpop.permute.xlu1 %2421  ;;  %v3019_v21 = vsub.f32 1.0, %v3018_v16 }
  0xc0   : > { %v2424_v51 = vmul.f32 %v2422_v38, %v2419_v46 }
  0xc1   : > { %v3020_v24 = vmax.f32 %v3019_v21, 0.0 }
  0xc2   : > { %418 = vbcast.lane.b32.xlu0 %v416_v36, 256  ;;  %270 = vbcast.lane.b32.xlu1 %v268_v37, 256  ;;  %v2442_v57 = vrot.slane %v2424_v51, %v5995_v4  ;;  %v2456_v61 = vrot.slane %v2424_v51, %v6001_v8  ;;  %v2470_v6 = vrot.slane %v2424_v51, %v6009_v15  ;;  %v3201_v37 = vand.u32 2147483647, %v3200_v30 }
  0xc3   : > { %v2428_v14 = vrot.slane %v2424_v51, %v5998_v7  ;;  %v2435_v23 = vrot.slane %v2424_v51, %v6006_v12  ;;  %v2449_v27 = vrot.slane %v2424_v51, %v6014_v19  ;;  %v3025_v31 = vmul.f32 %v3023_v29, %v3020_v24 }
  0xc4   : > { %v2605_v44 = vpop.permute.xlu1 %2604  ;;  %v2463_v35 = vrot.slane %v2424_v51, %v6020_v26  ;;  %v2477_v38 = vrot.slane %v2424_v51, %v6026_v32  ;;  %v3202_v41 = vsub.f32 1.0, %v3201_v37  ;;  %v5832_v29 = vmov 15  }
  0xc5   : > { %v2607_v10 = vmul.f32 %v2605_v44, %v2602_v2  ;;  %v3029_v39 = vrot.slane %v3025_v31, %v5998_v7  ;;  %v3071_v54 = vrot.slane %v3025_v31, %v6009_v15  ;;  %v3036_v2 = vrot.slane %v3025_v31, %v6006_v12 }
  0xc6   : > { %432 = vbcast.lane.b32.xlu0 %v430_v42, 256  ;;  %411 = vbcast.lane.b32.xlu1 %v409_v43, 256  ;;  %v3043_v43 = vrot.slane %v3025_v31, %v5995_v4  ;;  %v3203_v46 = vmax.f32 %v3202_v41, 0.0  ;;  %v3050_v9 = vrot.slane %v3025_v31, %v6014_v19  ;;  %v3078_v21 = vrot.slane %v3025_v31, %v6026_v32 }
  0xc7   : > { %v2611_v17 = vrot.slane %v2607_v10, %v5998_v7  ;;  %v2625_v22 = vrot.slane %v2607_v10, %v5995_v4  ;;  %v2639_v25 = vrot.slane %v2607_v10, %v6001_v8  ;;  %v2653_v34 = vrot.slane %v2607_v10, %v6009_v15 }
  0xc8   : > { %v2618_v42 = vrot.slane %v2607_v10, %v6006_v12  ;;  %v2632_v47 = vrot.slane %v2607_v10, %v6014_v19  ;;  %v824_v41 = vrot.slane %v6032_v45, %v6026_v32 }
  0xc9   : > { %v6037_v50 = vpop.permute.xlu1 %3205 }
  0xca   : > { %446 = vbcast.lane.b32.xlu0 %v444_v48, 256  ;;  %425 = vbcast.lane.b32.xlu1 %v423_v49, 256  ;;  %v3057_v48 = vrot.slane %v3025_v31, %v6001_v8  ;;  %v3208_v51 = vmul.f32 %v6037_v50, %v3203_v46  ;;  %v382_v46 = vsub.f32 %v5992_v1, %v5984_v56  ;;  %v5834_v1 = vmov 1966171168  }
  0xcc   : > { %v3212_v59 = vrot.slane %v3208_v51, %v5998_v7  ;;  %v3226_v50 = vrot.slane %v3208_v51, %v5995_v4  ;;  %v3254_v16 = vrot.slane %v3208_v51, %v6009_v15  ;;  %v3247_v37 = vrot.slane %v3208_v51, %v6020_v26 }
  0xce   : > { %439 = vbcast.lane.b32.xlu1 %v437_v55, 256  ;;  %784 = vbcast.lane.b32.xlu0 %v782_v52, 256  ;;  %v6043_v58 = vpop.permute.xlu1 %943  ;;  %v2646_v52 = vrot.slane %v2607_v10, %v6020_v26  ;;  %v952_v55 = vpop.permute.xlu0 %951 }
  0xcf   : > { %v946_v20 = vsub.f32 %v6043_v58, %v5984_v56 }
  0xd2   : > { %453 = vbcast.lane.b32.xlu1 %v451_v60, 256  ;;  %2444 = vbcast.lane.b32.xlu0 %v2442_v57, 256  ;;  %v2660_v57 = vrot.slane %v2607_v10, %v6026_v32  ;;  %v3240_v10 = vrot.slane %v3208_v51, %v6001_v8 }
  0xd3   : > { %v6047_v63 = vpop.permute.xlu1 %3672 }
  0xd6   : > { %777 = vbcast.lane.b32.xlu1 %v775_v3, 256  ;;  %2458 = vbcast.lane.b32.xlu0 %v2456_v61, 256  ;;  %v6089_v61 = vpop.permute.xlu0 %4330 }
  0xd8   : > { %v6055_v13 = vpop.permute.xlu1 %3855 }
  0xda   : > { %791 = vbcast.lane.b32.xlu1 %v789_v11, 256  ;;  %2472 = vbcast.lane.b32.xlu0 %v2470_v6, 256  ;;  %v6095_v6 = vpop.permute.xlu0 %3863 }
  0xdd   : > { %v6059_v18 = vpop.permute.xlu1 %4513 }
  0xde   : > { %2613 = vbcast.lane.b32.xlu0 %v2611_v17, 256  ;;  %2430 = vbcast.lane.b32.xlu1 %v2428_v14, 256  ;;  %v6099_v11 = vpop.permute.xlu0 %1309  ;;  %v3064_v14 = vrot.slane %v3025_v31, %v6020_v26  ;;  %v3233_v31 = vrot.slane %v3208_v51, %v6014_v19 }
  0xdf   : > { %7770 = vst [vmem:[#allocation10_spill] sm:$0xff] %v6099_v11 }
  0xe2   : > { %2627 = vbcast.lane.b32.xlu0 %v2625_v22, 256  ;;  %2437 = vbcast.lane.b32.xlu1 %v2435_v23, 256  ;;  %v6065_v28 = vpop.permute.xlu1 %3680  ;;  %v947_v22 = vand.u32 2147483647, %v946_v20  ;;  %v6108_v23 = vpop.permute.xlu0 %2041 }
  0xe3   : > { %7771 = vst [vmem:[#allocation11_spill] sm:$0xff] %v6108_v23 }
  0xe6   : > { %2641 = vbcast.lane.b32.xlu0 %v2639_v25, 256  ;;  %2451 = vbcast.lane.b32.xlu1 %v2449_v27, 256  ;;  %v3219_v25 = vrot.slane %v3208_v51, %v6006_v12  ;;  %v948_v27 = vsub.f32 1.0, %v947_v22  ;;  %v6115_v58 = vpop.permute.xlu0 %3006  ;;  %v5835_v22 = vmov 14  }
  0xe7   : > { %v6070_v36 = vpop.permute.xlu1 %4338 }
  0xe8   : > { %7766 = vst [vmem:[#allocation6_spill] sm:$0xff] %v6070_v36 }
  0xea   : > { %2655 = vbcast.lane.b32.xlu0 %v2653_v34, 256  ;;  %2465 = vbcast.lane.b32.xlu1 %v2463_v35, 256  ;;  %v949_v34 = vmax.f32 %v948_v27, 0.0  ;;  %v810_v35 = vrot.slane %v6032_v45, %v6020_v26 }
  0xec   : > { %v6076_v44 = vpop.permute.xlu1 %4521 }
  0xed   : > { %7767 = vst [vmem:[#allocation7_spill] sm:$0xff] %v6076_v44 }
  0xee   : > { %2479 = vbcast.lane.b32.xlu1 %v2477_v38, 256  ;;  %3031 = vbcast.lane.b32.xlu0 %v3029_v39, 256  ;;  %v5833_v38 = vmov 9   ;;  %v6123_v39 = vmul.f32 %v952_v55, %v949_v34 }
  0xf1   : > { %v6080_v49 = vpop.permute.xlu1 %1492 }
  0xf2   : > { %2620 = vbcast.lane.b32.xlu1 %v2618_v42, 256  ;;  %3045 = vbcast.lane.b32.xlu0 %v3043_v43, 256  ;;  %7768 = vst [vmem:[#allocation8_spill] sm:$0xff] %v6080_v49  ;;  %v6127_v42 = vpop.permute.xlu0 %1500 }
  0xf3   : > { %7773 = vst [vmem:[#allocation13_spill] sm:$0xff] %v6127_v42  ;;  %v5838_v42 = vmov 1934713408  }
  0xf6   : > { %2634 = vbcast.lane.b32.xlu1 %v2632_v47, 256  ;;  %3059 = vbcast.lane.b32.xlu0 %v3057_v48, 256  ;;  %v6087_v60 = vpop.permute.xlu1 %1858  ;;  %v197_v47 = vsub.f32 %v5982_v53, %v5984_v56  ;;  %v3261_v48 = vrot.slane %v3208_v51, %v6026_v32  ;;  %v979_v53 = vrot.slane %v6123_v39, %v6014_v19 }
  0xf7   : > { %7769 = vst [vmem:[#allocation9_spill] sm:$0xff] %v6087_v60 }
  0xfa   : > { %2648 = vbcast.lane.b32.xlu1 %v2646_v52, 256  ;;  %3073 = vbcast.lane.b32.xlu0 %v3071_v54, 256  ;;  %v3675_v52 = vsub.f32 %v6047_v63, %v5984_v56  ;;  %v965_v54 = vrot.slane %v6123_v39, %v6006_v12 }
  0xfb   : > { %v6093_v3 = vpop.permute.xlu1 %2404 }
  0xfe   : > { %2662 = vbcast.lane.b32.xlu1 %v2660_v57, 256  ;;  %3214 = vbcast.lane.b32.xlu0 %v3212_v59, 256  ;;  %v6142_v57 = vpop.permute.xlu0 %935  ;;  %v383_v59 = vand.u32 2147483647, %v382_v46 }
  0xff   : > { %7776 = vst [vmem:[#allocation16_spill] sm:$0xff] %v6142_v57 }
 0x100   : > { %v6103_v17 = vpop.permute.xlu1 %2588  ;;  %v384_v63 = vsub.f32 1.0, %v383_v59 }
 0x102   : > { %3038 = vbcast.lane.b32.xlu1 %v3036_v2, 256  ;;  %3228 = vbcast.lane.b32.xlu0 %v3226_v50, 256  ;;  %v275_v2 = vunpack.c.l.s4 %v5834_v1  ;;  %v198_v50 = vand.u32 2147483647, %v197_v47  ;;  %v803_v1 = vrot.slane %v6032_v45, %v6001_v8 }
 0x104   : > { %v276_v51 = vunpack.c.0.s8 %v275_v2 }
 0x105   : > { %v6111_v24 = vpop.permute.xlu1 %3189 }
 0x106   : > { %3052 = vbcast.lane.b32.xlu1 %v3050_v9, 256  ;;  %3242 = vbcast.lane.b32.xlu0 %v3240_v10, 256  ;;  %v3676_v9 = vand.u32 2147483647, %v3675_v52  ;;  %v199_v10 = vsub.f32 1.0, %v198_v50  ;;  %v6155_v27 = vsub.s32 %v276_v51, %v5988_v62 }
 0x108   : > { %v3677_v20 = vsub.f32 1.0, %v3676_v9 }
 0x10a   : > { %3066 = vbcast.lane.b32.xlu1 %v3064_v14, 256  ;;  %3256 = vbcast.lane.b32.xlu0 %v3254_v16, 256  ;;  %v6117_v30 = vpop.permute.xlu1 %1317 }
 0x10b   : > { %7772 = vst [vmem:[#allocation12_spill] sm:$0xff] %v6117_v30 }
 0x10e   : > { %3080 = vbcast.lane.b32.xlu1 %v3078_v21, 256  ;;  %3664 = vperm.xlu0 %5588, %v5965_v33   ;;  %v993_v21 = vrot.slane %v6123_v39, %v6020_v26 }
 0x10f   : > { %v6129_v43 = vpop.permute.xlu1 %1866 }
 0x110   : > { %7774 = vst [vmem:[#allocation14_spill] sm:$0xff] %v6129_v43 }
 0x112   : > { %3221 = vbcast.lane.b32.xlu1 %v3219_v25, 256  ;;  %5591 = vset.pattern.permute.xlu0 %v5832_v29  ;;  %v385_v25 = vmax.f32 %v384_v63, 0.0  ;;  %v200_v29 = vmax.f32 %v199_v10, 0.0 }
 0x113   : > { %4505 = vperm.xlu0 %5591, %v5965_v33  }
 0x114   : > { %v6140_v55 = vpop.permute.xlu1 %2049  ;;  %v273_v52 = vcombine.high %v200_v29, %v200_v29 }
 0x115   : > { %7775 = vst [vmem:[#allocation15_spill] sm:$0xff] %v6140_v55 }
 0x116   : > { %3235 = vbcast.lane.b32.xlu1 %v3233_v31, 256  ;;  %v287_v63 = vrot.slane %v273_v52, %v6155_v27 }
 0x117   : > { %812 = vbcast.lane.b32.xlu0 %v810_v35, 256  ;;  %v3678_v35 = vmax.f32 %v3677_v20, 0.0 }
 0x118   : > { %5593 = vset.pattern.permute.xlu0 %v5833_v38  ;;  %v1007_v38 = vrot.slane %v6123_v39, %v6026_v32 }
 0x119   : > { %v6172_v59 = vmul.f32 %v6065_v28, %v3678_v35  ;;  %v817_v28 = vrot.slane %v6032_v45, %v6009_v15 }
 0x11a   : > { %3249 = vbcast.lane.b32.xlu1 %v3247_v37, 256  ;;  %v796_v37 = vrot.slane %v6032_v45, %v6014_v19  ;;  %v6195_v45 = vrot.slane %v287_v63, %v6155_v27 }
 0x11b   : > { %826 = vbcast.lane.b32.xlu0 %v824_v41, 256  ;;  %v463_v41 = vrot.slane %v385_v25, %v6155_v27  ;;  %v3687_v10 = vrot.slane %v6172_v59, %v5998_v7  ;;  %v3715_v43 = vrot.slane %v6172_v59, %v6001_v8 }
 0x11c   : > { %v319_v55 = vcombine.high %v6195_v45, %v6195_v45 }
 0x11d   : > { %v471_v2 = vcombine.high %v463_v41, %v463_v41 }
 0x11e   : > { %3263 = vbcast.lane.b32.xlu1 %v3261_v48, 256  ;;  %v5836_v48 = vmov 8  }
 0x11f   : > { %967 = vbcast.lane.b32.xlu0 %v965_v54, 256  ;;  %v456_v54 = vcombine.high %v385_v25, %v385_v25  ;;  %v493_v20 = vrot.slane %v471_v2, %v6155_v27  ;;  %v479_v25 = vrot.slane %v463_v41, %v6155_v27  ;;  %v289_v41 = vcombine.high %v287_v63, %v287_v63 }
 0x120   : > { %v6209_v63 = vunpack.c.l.s4 %v5838_v42 }
 0x121   : > { %v470_v51 = vrot.slane %v456_v54, %v6155_v27  ;;  %v503_v54 = vcombine.high %v493_v20, %v493_v20  ;;  %v317_v60 = vrot.slane %v289_v41, %v6155_v27  ;;  %v508_v41 = vrot.slane %v479_v25, %v5998_v7 }
 0x122   : > { %3847 = vperm.xlu1 %5589, %v5965_v33  }
 0x123   : > { %981 = vbcast.lane.b32.xlu0 %v979_v53, 256  ;;  %v520_v57 = vrot.slane %v503_v54, %v5998_v7 }
 0x124   : > { %v6147_v14 = vpop.permute.xlu1 %221  ;;  %v6149_v16 = vpop.permute.xlu0 %235 }
 0x126   : > { %5590 = vset.pattern.permute.xlu1 %v5835_v22 }
 0x127   : > { %4322 = vperm.xlu1 %5590, %v5965_v33   ;;  %995 = vbcast.lane.b32.xlu0 %v993_v21, 256  ;;  %v280_v33 = vrot.slane %v200_v29, %v6155_v27 }
 0x128   : > { %v6157_v31 = vpop.permute.xlu1 %228  ;;  %v6159_v34 = vpop.permute.xlu0 %249 }
 0x129   : > { %v288_v50 = vcombine.high %v280_v33, %v280_v33  ;;  %v296_v21 = vrot.slane %v280_v33, %v6155_v27  ;;  %v486_v33 = vrot.slane %v470_v51, %v6155_v27 }
 0x12b   : > { %798 = vbcast.lane.b32.xlu1 %v796_v37, 256  ;;  %1009 = vbcast.lane.b32.xlu0 %v1007_v38, 256  ;;  %v310_v22 = vrot.slane %v288_v50, %v6155_v27  ;;  %v3701_v37 = vrot.slane %v6172_v59, %v5995_v4  ;;  %v958_v38 = vrot.slane %v6123_v39, %v5998_v7 }
 0x12c   : > { %v6167_v46 = vpop.permute.xlu1 %242  ;;  %v6169_v47 = vpop.permute.xlu0 %263  ;;  %5592 = vset.pattern.permute.xlu1 %v5836_v48  ;;  %v5837_v48 = vmov 1983009808   ;;  %v501_v50 = vcombine.high %v479_v25, %v479_v25  ;;  %v502_v23 = vcombine.high %v486_v33, %v486_v33 }
 0x12d   : > { %v6202_v52 = vunpack.c.l.s4 %v5837_v48  ;;  %v320_v2 = vcombine.high %v310_v22, %v310_v22 }
 0x12e   : > { %v516_v42 = vrot.slane %v501_v50, %v5998_v7  ;;  %v532_v54 = vrot.slane %v502_v23, %v5998_v7 }
 0x12f   : > { %805 = vbcast.lane.b32.xlu1 %v803_v1, 256  ;;  %1484 = vperm.xlu0 %5593, %v5942_v5   ;;  %v472_v1 = vcombine.high %v470_v51, %v470_v51  ;;  %v577_v48 = vunpack.c.0.s8 %v6202_v52  ;;  %v972_v51 = vrot.slane %v6123_v39, %v5995_v4  ;;  %v337_v52 = vrot.slane %v320_v2, %v5998_v7 }
 0x130   : > { %v6177_v9 = vpop.permute.xlu1 %256  ;;  %v6179_v53 = vpop.permute.xlu0 %404  ;;  %v986_v2 = vrot.slane %v6123_v39, %v6001_v8 }
 0x131   : > { %v500_v0 = vrot.slane %v472_v1, %v6155_v27  ;;  %v365_v1 = vmul.f32 %v337_v52, %v6167_v46  ;;  %v545_v25 = vmul.f32 %v508_v41, %v6179_v53  ;;  %v345_v52 = vrot.slane %v317_v60, %v5998_v7 }
 0x132   : > { %v641_v41 = vunpack.c.0.s8 %v6209_v63 }
 0x133   : > { %819 = vbcast.lane.b32.xlu1 %v817_v28, 256  ;;  %3689 = vbcast.lane.b32.xlu0 %v3687_v10, 256  ;;  %v504_v36 = vcombine.high %v500_v0, %v500_v0 }
 0x134   : > { %v6191_v29 = vpop.permute.xlu1 %270  ;;  %v419_v35 = vpop.permute.xlu0 %418  ;;  %5701 = vset.pattern.permute.xlu0 %v5821_v40  ;;  %v318_v40 = vcombine.high %v296_v21, %v296_v21 }
 0x135   : > { %v547_v11 = vmul.f32 %v516_v42, %v419_v35 }
 0x136   : > { %v333_v30 = vrot.slane %v318_v40, %v5998_v7 }
 0x137   : > { %3703 = vbcast.lane.b32.xlu0 %v3701_v37, 256  ;;  %960 = vbcast.lane.b32.xlu1 %v958_v38, 256  ;;  %v325_v37 = vrot.slane %v296_v21, %v5998_v7  ;;  %v329_v38 = vrot.slane %v310_v22, %v5998_v7  ;;  %v512_v21 = vrot.slane %v493_v20, %v5998_v7 }
 0x138   : > { %v412_v28 = vpop.permute.xlu1 %411  ;;  %v433_v10 = vpop.permute.xlu0 %432  ;;  %v349_v22 = vrot.slane %v319_v55, %v5998_v7  ;;  %v364_v50 = vmul.f32 %v333_v30, %v6149_v16  ;;  %v321_v20 = vcombine.high %v317_v60, %v317_v60  ;;  %v341_v30 = vrot.slane %v6195_v45, %v5998_v7 }
 0x139   : > { %v546_v40 = vmul.f32 %v512_v21, %v412_v28  ;;  %v363_v55 = vmul.f32 %v329_v38, %v6157_v31  ;;  %v362_v35 = vmul.f32 %v325_v37, %v6147_v14  ;;  %v528_v16 = vrot.slane %v500_v0, %v5998_v7 }
 0x13a   : > { %v368_v31 = vmul.f32 %v349_v22, %v6169_v47  ;;  %v6243_v53 = vadd.f32 %v547_v11, %v364_v50  ;;  %v366_v38 = vmul.f32 %v341_v30, %v6159_v34  ;;  %v353_v14 = vrot.slane %v321_v20, %v5998_v7 }
 0x13b   : > { %3717 = vbcast.lane.b32.xlu0 %v3715_v43, 256  ;;  %974 = vbcast.lane.b32.xlu1 %v972_v51, 256  ;;  %v524_v51 = vrot.slane %v486_v33, %v5998_v7  ;;  %v1000_v33 = vrot.slane %v6123_v39, %v6009_v15  ;;  %v554_v28 = vadd.f32 %v546_v40, %v363_v55  ;;  %v5839_v30 = vmov 12  }
 0x13c   : > { %v426_v49 = vpop.permute.xlu1 %425  ;;  %v447_v44 = vpop.permute.xlu0 %446  ;;  %v536_v37 = vrot.slane %v504_v36, %v5998_v7  ;;  %v553_v45 = vadd.f32 %v545_v25, %v362_v35  ;;  %v6253_v11 = vsub.s32 %v577_v48, %v5988_v62  ;;  %v367_v34 = vmul.f32 %v345_v52, %v6177_v9 }
 0x13d   : > { %v548_v43 = vmul.f32 %v520_v57, %v426_v49  ;;  %v551_v23 = vmul.f32 %v532_v54, %v447_v44  ;;  %v549_v44 = vmul.f32 %v524_v51, %v433_v10  ;;  %v369_v60 = vmul.f32 %v353_v14, %v6191_v29 }
 0x13e   : > { %v573_v10 = vcombine.low %v553_v45, %v6243_v53  ;;  %v2591_v54 = vsub.f32 %v6103_v17, %v5984_v56 }
 0x13f   : > { %v6232_v49 = vadd.f32 %v548_v43, %v365_v1  ;;  %988 = vbcast.lane.b32.xlu1 %v986_v2, 256  ;;  %v559_v42 = vadd.f32 %v551_v23, %v368_v31  ;;  %v557_v22 = vadd.f32 %v549_v44, %v366_v38  ;;  %v2407_v43 = vsub.f32 %v6093_v3, %v5984_v56 }
 0x140   : > { %v440_v57 = vpop.permute.xlu1 %439  ;;  %v6234_v46 = vpop.permute.xlu0 %784  ;;  %v581_v50 = vrot.slane %v573_v10, %v6253_v11  ;;  %v6271_v3 = vsub.s32 %v641_v41, %v5988_v62  ;;  %v2592_v17 = vand.u32 2147483647, %v2591_v54  ;;  %v574_v62 = vcombine.high %v553_v45, %v6243_v53 }
 0x141   : > { %7777 = vst [vmem:[#allocation17_spill] sm:$0xff] %v6234_v46  ;;  %v589_v0 = vcombine.low %v554_v28, %v6232_v49  ;;  %v550_v21 = vmul.f32 %v528_v16, %v440_v57  ;;  %v605_v48 = vcombine.low %v557_v22, %v559_v42  ;;  %v2408_v51 = vand.u32 2147483647, %v2407_v43 }
 0x142   : > { %v590_v55 = vcombine.high %v554_v28, %v6232_v49  ;;  %v606_v23 = vcombine.high %v557_v22, %v559_v42  ;;  %v2593_v38 = vsub.f32 1.0, %v2592_v17  ;;  %v3858_v45 = vsub.f32 %v6055_v13, %v5984_v56 }
 0x143   : > { %1002 = vbcast.lane.b32.xlu1 %v1000_v33, 256  ;;  %v597_v1 = vrot.slane %v589_v0, %v6253_v11  ;;  %v558_v40 = vadd.f32 %v550_v21, %v367_v34  ;;  %v613_v57 = vrot.slane %v605_v48, %v6253_v11  ;;  %v2409_v28 = vsub.f32 1.0, %v2408_v51 }
 0x144   : > { %v454_v39 = vpop.permute.xlu1 %453  ;;  %v6250_v47 = vpop.permute.xlu0 %2444  ;;  %v604_v52 = vrot.slane %v590_v55, %v6253_v11  ;;  %v588_v34 = vrot.slane %v574_v62, %v6253_v11  ;;  %v2594_v41 = vmax.f32 %v2593_v38, 0.0 }
 0x145   : > { %v552_v36 = vmul.f32 %v536_v37, %v454_v39  ;;  %v637_v25 = vcombine.low %v581_v50, %v597_v1  ;;  %v638_v14 = vcombine.high %v581_v50, %v597_v1  ;;  %v620_v37 = vrot.slane %v606_v23, %v6253_v11 }
 0x146   : > { %v5840_v39 = vmov 13   ;;  %v653_v43 = vcombine.low %v588_v34, %v604_v52  ;;  %v3694_v1 = vrot.slane %v6172_v59, %v6006_v12  ;;  %v2672_v17 = vrot.slane %v2594_v41, %v6155_v27 }
 0x147   : > { %v560_v2 = vadd.f32 %v552_v36, %v369_v60  ;;  %1301 = vperm.xlu1 %5592, %v5942_v5   ;;  %v6290_v21 = vrot.slane %v637_v25, %v6271_v3  ;;  %v2410_v36 = vmax.f32 %v2409_v28, 0.0  ;;  %v654_v25 = vcombine.high %v588_v34, %v604_v52 }
 0x148   : > { %v6265_v9 = vpop.permute.xlu1 %777  ;;  %v6267_v29 = vpop.permute.xlu0 %2458  ;;  %v2680_v38 = vcombine.high %v2672_v17, %v2672_v17 }
 0x149   : > { %v621_v63 = vcombine.low %v558_v40, %v560_v2  ;;  %v622_v20 = vcombine.high %v558_v40, %v560_v2  ;;  %7778 = vst [vmem:[#allocation18_spill] sm:$0xff] %v6290_v21  ;;  %v3859_v40 = vand.u32 2147483647, %v3858_v45  ;;  %v4333_v2 = vsub.f32 %v6089_v61, %v5984_v56 }
 0x14a   : > { %v2482_v51 = vcombine.high %v2410_v36, %v2410_v36  ;;  %v2489_v55 = vrot.slane %v2410_v36, %v6155_v27  ;;  %v3708_v61 = vrot.slane %v6172_v59, %v6014_v19  ;;  %v6345_v34 = vrot.slane %v654_v25, %v6271_v3 }
 0x14b   : > { %v629_v35 = vrot.slane %v621_v63, %v6253_v11  ;;  %5594 = vset.pattern.permute.xlu1 %v5839_v30  ;;  %v636_v31 = vrot.slane %v622_v20, %v6253_v11  ;;  %v3860_v30 = vsub.f32 1.0, %v3859_v40  ;;  %v4334_v62 = vand.u32 2147483647, %v4333_v2 }
 0x14c   : > { %v6276_v16 = vpop.permute.xlu1 %791  ;;  %v6278_v33 = vpop.permute.xlu0 %2472  ;;  %1850 = vperm.xlu1 %5594, %v5942_v5   ;;  %v2496_v28 = vrot.slane %v2482_v51, %v6155_v27  ;;  %v2497_v52 = vcombine.high %v2489_v55, %v2489_v55  ;;  %v6360_v2 = vrot.slane %v2672_v17, %v6155_v27 }
 0x14d   : > { %v669_v44 = vcombine.low %v613_v57, %v629_v35  ;;  %v670_v49 = vcombine.high %v613_v57, %v629_v35  ;;  %v685_v60 = vcombine.low %v620_v37, %v636_v31  ;;  %v686_v50 = vcombine.high %v620_v37, %v636_v31 }
 0x14e   : > { %v661_v35 = vrot.slane %v653_v43, %v6271_v3  ;;  %v2665_v31 = vcombine.high %v2594_v41, %v2594_v41  ;;  %v6351_v41 = vrot.slane %v2489_v55, %v6155_v27  ;;  %v6354_v43 = vrot.slane %v2496_v28, %v6155_v27 }
 0x14f   : > { %v6293_v53 = vrot.slane %v669_v44, %v6271_v3  ;;  %v6302_v22 = vrot.slane %v670_v49, %v6271_v3  ;;  %v6318_v20 = vrot.slane %v685_v60, %v6271_v3  ;;  %v6332_v49 = vrot.slane %v686_v50, %v6271_v3 }
 0x150   : > { %v6285_v0 = vpop.permute.xlu1 %2430  ;;  %v6287_v42 = vpop.permute.xlu0 %2613  ;;  %5595 = vset.pattern.permute.xlu1 %v5840_v39  ;;  %v3722_v39 = vrot.slane %v6172_v59, %v6020_v26  ;;  %v3861_v60 = vmax.f32 %v3860_v30, 0.0  ;;  %v2679_v36 = vrot.slane %v2665_v31, %v6155_v27  ;;  %v6363_v50 = vrot.slane %v2497_v52, %v6155_v27 }
 0x151   : > { %7779 = vst [vmem:[#allocation19_spill] sm:$0xff] %v6293_v53  ;;  %2033 = vperm.xlu1 %5595, %v5942_v5   ;;  %v702_v10 = vcombine.high %v6290_v21, %v6293_v53  ;;  %v652_v5 = vrot.slane %v638_v14, %v6271_v3  ;;  %v706_v44 = vcombine.high %v661_v35, %v6318_v20 }
 0x152   : > { %v3009_v14 = vsub.f32 %v6115_v58, %v5984_v56  ;;  %v708_v58 = vcombine.high %v6345_v34, %v6332_v49  ;;  %v2695_v17 = vrot.slane %v2679_v36, %v6155_v27  ;;  %v2498_v31 = vcombine.high %v2496_v28, %v2496_v28 }
 0x153   : > { %710 = vrot.lane.b32.xlu0 %v702_v10, %s5841_s28  ;;  %v704_v63 = vcombine.high %v652_v5, %v6302_v22  ;;  %v4335_v10 = vsub.f32 1.0, %v4334_v62  ;;  %v703_v55 = vcombine.low %v652_v5, %v6302_v22  ;;  %v3192_v62 = vsub.f32 %v6111_v24, %v5984_v56 }
 0x154   : > { %v6305_v13 = vpop.permute.xlu1 %2437  ;;  %v6307_v54 = vpop.permute.xlu0 %2627  ;;  %v6357_v40 = vand.u32 2147483647, %v3009_v14  ;;  %v3729_v22 = vrot.slane %v6172_v59, %v6009_v15  ;;  %v2527_v5 = vcombine.high %v6351_v41, %v6351_v41  ;;  %v2710_v24 = vcombine.high %v6360_v2, %v6360_v2 }
 0x155   : > { %3696 = vbcast.lane.b32.xlu1 %v3694_v1, 256  ;;  %v2702_v1 = vrot.slane %v2680_v38, %v6155_v27  ;;  %v6371_v25 = vmax.f32 %v4335_v10, 0.0  ;;  %v2681_v38 = vcombine.high %v2679_v36, %v2679_v36  ;;  %v2529_v28 = vcombine.high %v6363_v50, %v6363_v50 }
 0x156   : > { %v3011_v52 = vsub.f32 1.0, %v6357_v40  ;;  %v2526_v48 = vrot.slane %v2498_v31, %v6155_v27  ;;  %v2725_v21 = vrot.slane %v2710_v24, %v5998_v7 }
 0x157   : > { %718 = vrot.lane.b32.xlu0 %v704_v63, %s5842_s29  ;;  %v2721_v31 = vrot.slane %v2702_v1, %v5998_v7 }
 0x158   : > { %v6323_v23 = vpop.permute.xlu1 %2451  ;;  %v6325_v57 = vpop.permute.xlu0 %2641 }
 0x159   : > { %3710 = vbcast.lane.b32.xlu1 %v3708_v61, 256  ;;  %v6374_v61 = vmul.f32 %v6095_v6, %v3861_v60  ;;  %v2528_v6 = vcombine.high %v6354_v43, %v6354_v43  ;;  %v2711_v60 = vcombine.high %v2695_v17, %v2695_v17 }
 0x15b   : > { %726 = vrot.lane.b32.xlu0 %v706_v44, %s5843_s30  ;;  %v2712_v44 = vcombine.high %v2702_v1, %v2702_v1  ;;  %v3884_v36 = vrot.slane %v6374_v61, %v5995_v4  ;;  %v3898_v40 = vrot.slane %v6374_v61, %v6001_v8  ;;  %v2558_v30 = vrot.slane %v2528_v6, %v5998_v7 }
 0x15c   : > { %v6338_v37 = vpop.permute.xlu1 %2465  ;;  %v6340_v45 = vpop.permute.xlu0 %2655  ;;  %v2741_v6 = vrot.slane %v2711_v60, %v5998_v7 }
 0x15d   : > { %3724 = vbcast.lane.b32.xlu1 %v3722_v39, 256  ;;  %v705_v39 = vcombine.low %v661_v35, %v6318_v20  ;;  %v3736_v20 = vrot.slane %v6172_v59, %v6026_v32  ;;  %v2542_v35 = vrot.slane %v2527_v5, %v5998_v7  ;;  %v2729_v53 = vrot.slane %v2712_v44, %v5998_v7 }
 0x15e   : > { %v2717_v59 = vrot.slane %v6360_v2, %v5998_v7  ;;  %v2538_v5 = vrot.slane %v6363_v50, %v5998_v7  ;;  %v2760_v2 = vmul.f32 %v2741_v6, %v6340_v45 }
 0x15f   : > { %734 = vrot.lane.b32.xlu0 %v708_v58, %s5844_s3  ;;  %v3870_v58 = vrot.slane %v6374_v61, %v5998_v7 }
 0x160   : > { %v6366_v63 = vpop.permute.xlu1 %2479  ;;  %v6368_v51 = vpop.permute.xlu0 %3031 }
 0x161   : > { %714 = vrot.lane.b32.xlu1 %v703_v55, %s5845_s4  ;;  %v6402_v55 = vand.u32 2147483647, %v3192_v62  ;;  %v2709_v62 = vrot.slane %v2681_v38, %v6155_v27  ;;  %v2756_v38 = vmul.f32 %v2725_v21, %v6307_v54  ;;  %v2754_v21 = vmul.f32 %v2717_v59, %v6287_v42  ;;  %v7780_v59 = vld [vmem:[#allocation6_spill] sm:$0xff] }
 0x163   : > { %3731 = vbcast.lane.b32.xlu0 %v3729_v22, 256  ;;  %v2534_v22 = vrot.slane %v6351_v41, %v5998_v7  ;;  %v2546_v41 = vrot.slane %v2529_v28, %v5998_v7  ;;  %v2530_v28 = vcombine.high %v2526_v48, %v2526_v48  ;;  %v2713_v50 = vcombine.high %v2709_v62, %v2709_v62 }
 0x164   : > { %v2621_v14 = vpop.permute.xlu1 %2620  ;;  %v6394_v10 = vpop.permute.xlu0 %3045  ;;  %v2737_v45 = vrot.slane %v2709_v62, %v5998_v7 }
 0x165   : > { %722 = vrot.lane.b32.xlu1 %v705_v39, %s5846_s5  ;;  %v707_v39 = vcombine.low %v6345_v34, %v6332_v49  ;;  %v2574_v24 = vmul.f32 %v2546_v41, %v6323_v23  ;;  %v2755_v1 = vmul.f32 %v2721_v31, %v2621_v14  ;;  %v2573_v49 = vmul.f32 %v2542_v35, %v6250_v47 }
 0x166   : > { %v2733_v34 = vrot.slane %v2695_v17, %v5998_v7  ;;  %v2550_v14 = vrot.slane %v6354_v43, %v5998_v7  ;;  %v2577_v47 = vmul.f32 %v2558_v30, %v6278_v33  ;;  %v2554_v35 = vrot.slane %v2526_v48, %v5998_v7 }
 0x167   : > { %3872 = vbcast.lane.b32.xlu0 %v3870_v58, 256  ;;  %v2764_v60 = vadd.f32 %v2756_v38, %v2573_v49  ;;  %v2745_v41 = vrot.slane %v2713_v50, %v5998_v7  ;;  %v3012_v43 = vmax.f32 %v3011_v52, 0.0  ;;  %v3877_v30 = vrot.slane %v6374_v61, %v6006_v12 }
 0x168   : > { %v2635_v46 = vpop.permute.xlu1 %2634  ;;  %v6430_v58 = vpop.permute.xlu0 %3059  ;;  %v2758_v17 = vmul.f32 %v2733_v34, %v6325_v57  ;;  %v2576_v48 = vmul.f32 %v2554_v35, %v6338_v37  ;;  %v3194_v52 = vsub.f32 1.0, %v6402_v55  ;;  %v7782_v55 = vsub.f32 %v6059_v18, %v5984_v56  ;;  %v7784_v18 = vld [vmem:[#allocation10_spill] sm:$0xff] }
 0x169   : > { %v2757_v44 = vmul.f32 %v2729_v53, %v2635_v46  ;;  %730 = vrot.lane.b32.xlu1 %v707_v39, %s5847_s6  ;;  %v2571_v46 = vmul.f32 %v2534_v22, %v6285_v0  ;;  %v2572_v53 = vmul.f32 %v2538_v5, %v6305_v13  ;;  %v2562_v0 = vrot.slane %v2530_v28, %v5998_v7 }
 0x16a   : > { %v2575_v13 = vmul.f32 %v2550_v14, %v6267_v29  ;;  %v6452_v5 = vmul.f32 %v7780_v59, %v6371_v25  ;;  %v3891_v25 = vrot.slane %v6374_v61, %v6014_v19  ;;  %v4517_v28 = vand.u32 2147483647, %v7782_v55 }
 0x16b   : > { %v2765_v54 = vadd.f32 %v2757_v44, %v2574_v24  ;;  %3886 = vbcast.lane.b32.xlu0 %v3884_v36, 256  ;;  %v2763_v42 = vadd.f32 %v2755_v1, %v2572_v53  ;;  %v2768_v36 = vadd.f32 %v2760_v2, %v2577_v47  ;;  %v2762_v31 = vadd.f32 %v2754_v21, %v2571_v46 }
 0x16c   : > { %v2649_v23 = vpop.permute.xlu1 %2648  ;;  %v2766_v62 = vadd.f32 %v2758_v17, %v2575_v13  ;;  %v2578_v39 = vmul.f32 %v2562_v0, %v6366_v63  ;;  %v3083_v1 = vcombine.high %v3012_v43, %v3012_v43  ;;  %v3195_v34 = vmax.f32 %v3194_v52, 0.0 }
 0x16d   : > { %3738 = vbcast.lane.b32.xlu1 %v3736_v20, 256  ;;  %v2759_v22 = vmul.f32 %v2737_v45, %v2649_v23  ;;  %v2781_v33 = vcombine.low %v2763_v42, %v2765_v54  ;;  %v6448_v20 = vpop.permute.xlu0 %3073  ;;  %v2773_v6 = vcombine.low %v2762_v31, %v2764_v60  ;;  %v4345_v50 = vrot.slane %v6452_v5, %v5998_v7 }
 0x16e   : > { %v2789_v44 = vcombine.low %v2766_v62, %v2768_v36  ;;  %v1312_v54 = vsub.f32 %v7784_v18, %v5984_v56  ;;  %v3905_v47 = vrot.slane %v6374_v61, %v6020_v26  ;;  %v4518_v17 = vsub.f32 1.0, %v4517_v28 }
 0x16f   : > { %3900 = vbcast.lane.b32.xlu0 %v3898_v40, 256  ;;  %v3912_v40 = vrot.slane %v6374_v61, %v6009_v15  ;;  %v2767_v38 = vadd.f32 %v2759_v22, %v2576_v48  ;;  %v6458_v37 = vrot.slane %v2781_v33, %v6253_v11  ;;  %v6468_v2 = vrot.slane %v2773_v6, %v6253_v11 }
 0x170   : > { %v2663_v57 = vpop.permute.xlu1 %2662  ;;  %v6473_v46 = vrot.slane %v2789_v44, %v6253_v11  ;;  %v3090_v45 = vrot.slane %v3012_v43, %v6155_v27  ;;  %v3097_v60 = vrot.slane %v3083_v1, %v6155_v27  ;;  %v3266_v0 = vcombine.high %v3195_v34, %v3195_v34  ;;  %v7787_v44 = vld [vmem:[#allocation7_spill] sm:$0xff] }
 0x171   : > { %v2761_v29 = vmul.f32 %v2745_v41, %v2663_v57  ;;  %3879 = vbcast.lane.b32.xlu1 %v3877_v30, 256  ;;  %7781 = vst [vmem:[#allocation6_spill] sm:$0xff] %v6458_v37  ;;  %7783 = vst [vmem:[#allocation20_spill] sm:$0xff] %v6468_v2  ;;  %v6478_v53 = vpop.permute.xlu0 %3214  ;;  %v2805_v23 = vcombine.low %v6468_v2, %v6458_v37  ;;  %v3273_v42 = vrot.slane %v3195_v34, %v6155_v27 }
 0x172   : > { %v4359_v13 = vrot.slane %v6452_v5, %v5995_v4  ;;  %v3919_v41 = vrot.slane %v6374_v61, %v6026_v32  ;;  %v4519_v31 = vmax.f32 %v4518_v17, 0.0  ;;  %v1313_v33 = vand.u32 2147483647, %v1312_v54 }
 0x173   : > { %v2769_v24 = vadd.f32 %v2761_v29, %v2578_v39  ;;  %3914 = vbcast.lane.b32.xlu0 %v3912_v40, 256  ;;  %v6503_v43 = vrot.slane %v2805_v23, %v6271_v3  ;;  %v3098_v57 = vcombine.high %v3090_v45, %v3090_v45  ;;  %v3099_v62 = vcombine.high %v3097_v60, %v3097_v60 }
 0x174   : > { %v6460_v63 = vpop.permute.xlu1 %3038  ;;  %v3280_v48 = vrot.slane %v3266_v0, %v6155_v27  ;;  %v3281_v39 = vcombine.high %v3273_v42, %v3273_v42  ;;  %v4373_v29 = vrot.slane %v6452_v5, %v6001_v8  ;;  %v6513_v61 = vrot.slane %v3090_v45, %v6155_v27 }
 0x175   : > { %v2797_v49 = vcombine.low %v2767_v38, %v2769_v24  ;;  %3893 = vbcast.lane.b32.xlu1 %v3891_v25, 256  ;;  %7786 = vst [vmem:[#allocation21_spill] sm:$0xff] %v6503_v43  ;;  %v6505_v30 = vpop.permute.xlu0 %3228  ;;  %v6516_v52 = vrot.slane %v3097_v60, %v6155_v27  ;;  %v4352_v40 = vrot.slane %v6452_v5, %v6006_v12  ;;  %v1314_v24 = vsub.f32 1.0, %v1313_v33 }
 0x176   : > { %v6523_v38 = vmul.f32 %v7787_v44, %v4519_v31  ;;  %v6526_v25 = vrot.slane %v3098_v57, %v6155_v27  ;;  %v3296_v55 = vrot.slane %v3280_v48, %v6155_v27  ;;  %v6530_v28 = vrot.slane %v3099_v62, %v6155_v27 }
 0x177   : > { %v6476_v21 = vrot.slane %v2797_v49, %v6253_v11  ;;  %4347 = vbcast.lane.b32.xlu0 %v4345_v50, 256  ;;  %v4387_v1 = vrot.slane %v6452_v5, %v6009_v15  ;;  %v3303_v49 = vrot.slane %v3281_v39, %v6155_v27  ;;  %v3282_v50 = vcombine.high %v3280_v48, %v3280_v48 }
 0x178   : > { %v6484_v14 = vpop.permute.xlu1 %3052  ;;  %v3128_v18 = vcombine.high %v6513_v61, %v6513_v61  ;;  %v3129_v54 = vcombine.high %v6516_v52, %v6516_v52  ;;  %v3289_v23 = vrot.slane %v3273_v42, %v6155_v27  ;;  %v4366_v17 = vrot.slane %v6452_v5, %v6014_v19 }
 0x179   : > { %v2821_v35 = vcombine.low %v6473_v46, %v6476_v21  ;;  %3907 = vbcast.lane.b32.xlu1 %v3905_v47, 256  ;;  %v3243_v34 = vpop.permute.xlu0 %3242  ;;  %v1315_v45 = vmax.f32 %v1314_v24, 0.0  ;;  %v3130_v60 = vcombine.high %v6526_v25, %v6526_v25  ;;  %v3131_v0 = vcombine.high %v6530_v28, %v6530_v28 }
 0x17a   : > { %v3135_v42 = vrot.slane %v6513_v61, %v5998_v7  ;;  %v3151_v31 = vrot.slane %v6516_v52, %v5998_v7  ;;  %v3139_v33 = vrot.slane %v6526_v25, %v5998_v7  ;;  %v3310_v57 = vrot.slane %v3282_v50, %v6155_v27  ;;  %v7788_v61 = vld [vmem:[#allocation8_spill] sm:$0xff] }
 0x17b   : > { %v6496_v36 = vrot.slane %v2821_v35, %v6271_v3  ;;  %4361 = vbcast.lane.b32.xlu0 %v4359_v13, 256  ;;  %v3312_v35 = vcombine.high %v3296_v55, %v3296_v55  ;;  %v4528_v13 = vrot.slane %v6523_v38, %v5998_v7  ;;  %v3143_v62 = vrot.slane %v3128_v18, %v5998_v7 }
 0x17c   : > { %v6498_v22 = vpop.permute.xlu1 %3066  ;;  %v3159_v48 = vrot.slane %v3129_v54, %v5998_v7  ;;  %v3311_v39 = vcombine.high %v3289_v23, %v3289_v23  ;;  %v1495_v44 = vsub.f32 %v7788_v61, %v5984_v56  ;;  %v3147_v52 = vrot.slane %v3130_v60, %v5998_v7 }
 0x17d   : > { %7785 = vst [vmem:[#allocation10_spill] sm:$0xff] %v6496_v36  ;;  %3921 = vbcast.lane.b32.xlu1 %v3919_v41, 256  ;;  %v3313_v41 = vcombine.high %v3303_v49, %v3303_v49  ;;  %v3155_v24 = vrot.slane %v6530_v28, %v5998_v7  ;;  %v3257_v25 = vpop.permute.xlu0 %3256  ;;  %v3342_v50 = vrot.slane %v3312_v35, %v5998_v7 }
 0x17e   : > { %v3163_v18 = vrot.slane %v3131_v0, %v5998_v7  ;;  %v4556_v60 = vrot.slane %v6523_v38, %v6001_v8  ;;  %v3314_v28 = vcombine.high %v3310_v57, %v3310_v57  ;;  %v4535_v61 = vrot.slane %v6523_v38, %v6006_v12 }
 0x17f   : > { %4375 = vbcast.lane.b32.xlu0 %v4373_v29, 256  ;;  %v3330_v54 = vrot.slane %v3313_v41, %v5998_v7  ;;  %v3326_v59 = vrot.slane %v3311_v39, %v5998_v7  ;;  %v3361_v35 = vmul.f32 %v3342_v50, %v3257_v25  ;;  %v3322_v0 = vrot.slane %v3303_v49, %v5998_v7 }
 0x180   : > { %v6518_v6 = vpop.permute.xlu1 %3080  ;;  %v4570_v2 = vrot.slane %v6523_v38, %v6009_v15  ;;  %v3175_v39 = vmul.f32 %v3147_v52, %v6484_v14 }
 0x181   : > { %4354 = vbcast.lane.b32.xlu1 %v4352_v40, 256  ;;  %v4380_v40 = vrot.slane %v6452_v5, %v6020_v26  ;;  %v3357_v37 = vmul.f32 %v3326_v59, %v6505_v30  ;;  %v7789_v59 = vld [vmem:[#allocation12_spill] sm:$0xff] }
 0x182   : > { %v6593_v14 = vmul.f32 %v7789_v59, %v1315_v45  ;;  %v7795_v59 = vld [vmem:[#allocation9_spill] sm:$0xff] }
 0x183   : > { %4389 = vbcast.lane.b32.xlu0 %v4387_v1, 256  ;;  %v4542_v1 = vrot.slane %v6523_v38, %v5995_v4 }
 0x184   : > { %v3222_v47 = vpop.permute.xlu1 %3221 }
 0x185   : > { %4368 = vbcast.lane.b32.xlu1 %v4366_v17, 256  ;;  %v4394_v17 = vrot.slane %v6452_v5, %v6026_v32  ;;  %v3318_v5 = vrot.slane %v3289_v23, %v5998_v7  ;;  %v3356_v49 = vmul.f32 %v3322_v0, %v3222_v47  ;;  %v3346_v23 = vrot.slane %v3314_v28, %v5998_v7 }
 0x187   : > { %4530 = vbcast.lane.b32.xlu0 %v4528_v13, 256  ;;  %v3334_v13 = vrot.slane %v3296_v55, %v5998_v7  ;;  %v3338_v55 = vrot.slane %v3310_v57, %v5998_v7  ;;  %v3355_v57 = vmul.f32 %v3318_v5, %v6478_v53 }
 0x188   : > { %v3236_v29 = vpop.permute.xlu1 %3235 }
 0x189   : > { %4382 = vbcast.lane.b32.xlu1 %v4380_v40, 256  ;;  %v3358_v43 = vmul.f32 %v3330_v54, %v3236_v29  ;;  %v3178_v40 = vmul.f32 %v3159_v48, %v6448_v20  ;;  %v3359_v25 = vmul.f32 %v3334_v13, %v3243_v34  ;;  %v3174_v29 = vmul.f32 %v3143_v62, %v6394_v10 }
 0x18a   : > { %v3176_v20 = vmul.f32 %v3151_v31, %v6430_v58  ;;  %v3177_v34 = vmul.f32 %v3155_v24, %v6498_v22  ;;  %v3179_v10 = vmul.f32 %v3163_v18, %v6518_v6  ;;  %v3172_v58 = vmul.f32 %v3135_v42, %v6368_v51  ;;  %v7791_v42 = vld [vmem:[#allocation5_spill] sm:$0xff] }
 0x18b   : > { %4544 = vbcast.lane.b32.xlu0 %v4542_v1, 256  ;;  %v3173_v1 = vmul.f32 %v3139_v33, %v6460_v63  ;;  %v3369_v50 = vadd.f32 %v3361_v35, %v3178_v40  ;;  %v3366_v54 = vadd.f32 %v3358_v43, %v3175_v39  ;;  %v3365_v31 = vadd.f32 %v3357_v37, %v3174_v29 }
 0x18c   : > { %v3250_v41 = vpop.permute.xlu1 %3249  ;;  %v3367_v62 = vadd.f32 %v3359_v25, %v3176_v20  ;;  %v3363_v33 = vadd.f32 %v3355_v57, %v3172_v58  ;;  %v4549_v22 = vrot.slane %v6523_v38, %v6014_v19  ;;  %v1496_v6 = vand.u32 2147483647, %v1495_v44 }
 0x18d   : > { %v6581_v36 = vpop.permute.xlu0 %3664  ;;  %4396 = vbcast.lane.b32.xlu1 %v4394_v17, 256  ;;  %v3360_v48 = vmul.f32 %v3338_v55, %v3250_v41  ;;  %v3364_v52 = vadd.f32 %v3356_v49, %v3173_v1  ;;  %v1324_v37 = vrot.slane %v6593_v14, %v5998_v7  ;;  %v755_v18 = vsub.f32 %v7791_v42, %v5984_v56 }
 0x18e   : > { %v3390_v17 = vcombine.low %v3367_v62, %v3369_v50  ;;  %v3374_v24 = vcombine.low %v3363_v33, %v3365_v31  ;;  %v4563_v35 = vrot.slane %v6523_v38, %v6020_v26  ;;  %v1497_v0 = vsub.f32 1.0, %v1496_v6 }
 0x18f   : > { %4558 = vbcast.lane.b32.xlu0 %v4556_v60, 256  ;;  %v3368_v63 = vadd.f32 %v3360_v48, %v3177_v34  ;;  %v3382_v13 = vcombine.low %v3364_v52, %v3366_v54  ;;  %v1338_v55 = vrot.slane %v6593_v14, %v5995_v4  ;;  %v756_v39 = vand.u32 2147483647, %v755_v18 }
 0x190   : > { %v3264_v30 = vpop.permute.xlu1 %3263  ;;  %v6622_v41 = vrot.slane %v3374_v24, %v6253_v11  ;;  %v4577_v29 = vrot.slane %v6523_v38, %v6026_v32  ;;  %v1498_v20 = vmax.f32 %v1497_v0, 0.0  ;;  %v1331_v54 = vrot.slane %v6593_v14, %v6006_v12 }
 0x191   : > { %v3362_v47 = vmul.f32 %v3346_v23, %v3264_v30  ;;  %4537 = vbcast.lane.b32.xlu1 %v4535_v61, 256  ;;  %v6614_v61 = vrot.slane %v3390_v17, %v6253_v11  ;;  %v6617_v44 = vrot.slane %v3382_v13, %v6253_v11  ;;  %v1352_v23 = vrot.slane %v6593_v14, %v6001_v8 }
 0x192   : > { %v6598_v53 = vpop.permute.xlu0 %4505  ;;  %v757_v1 = vsub.f32 1.0, %v756_v39  ;;  %v1861_v34 = vsub.f32 %v7795_v59, %v5984_v56  ;;  %v1366_v31 = vrot.slane %v6593_v14, %v6009_v15  ;;  %v1359_v24 = vrot.slane %v6593_v14, %v6020_v26 }
 0x193   : > { %7790 = vst [vmem:[#allocation7_spill] sm:$0xff] %v6598_v53  ;;  %v3370_v43 = vadd.f32 %v3362_v47, %v3179_v10  ;;  %4572 = vbcast.lane.b32.xlu0 %v4570_v2, 256  ;;  %v7792_v2 = vld [vmem:[#allocation16_spill] sm:$0xff]  ;;  %v3406_v49 = vcombine.low %v6622_v41, %v6617_v44  ;;  %v7796_v10 = vld [vmem:[#allocation13_spill] sm:$0xff] }
 0x194   : > { %v938_v28 = vsub.f32 %v7792_v2, %v5984_v56  ;;  %v6651_v47 = vmul.f32 %v7796_v10, %v1498_v20  ;;  %v758_v52 = vmax.f32 %v757_v1, 0.0  ;;  %v1862_v33 = vand.u32 2147483647, %v1861_v34  ;;  %v7798_v20 = vld [vmem:[#allocation11_spill] sm:$0xff] }
 0x195   : > { %v3398_v45 = vcombine.low %v3368_v63, %v3370_v43  ;;  %4551 = vbcast.lane.b32.xlu1 %v4549_v22, 256  ;;  %v6644_v30 = vrot.slane %v3406_v49, %v6271_v3  ;;  %v1345_v43 = vrot.slane %v6593_v14, %v6014_v19 }
 0x196   : > { %v6602_v51 = vpop.permute.xlu0 %812  ;;  %v939_v25 = vand.u32 2147483647, %v938_v28  ;;  %v1507_v22 = vrot.slane %v6651_v47, %v5998_v7  ;;  %v1863_v42 = vsub.f32 1.0, %v1862_v33  ;;  %v1521_v28 = vrot.slane %v6651_v47, %v5995_v4 }
 0x197   : > { %v6609_v60 = vrot.slane %v3398_v45, %v6253_v11  ;;  %1326 = vbcast.lane.b32.xlu0 %v1324_v37, 256  ;;  %7794 = vst [vmem:[#allocation12_spill] sm:$0xff] %v6644_v30  ;;  %v829_v45 = vcombine.high %v758_v52, %v758_v52  ;;  %v836_v37 = vrot.slane %v758_v52, %v6155_v27 }
 0x198   : > { %v940_v50 = vsub.f32 1.0, %v939_v25  ;;  %v1864_v25 = vmax.f32 %v1863_v42, 0.0  ;;  %v1549_v33 = vrot.slane %v6651_v47, %v6009_v15 }
 0x199   : > { %v3422_v40 = vcombine.low %v6614_v61, %v6609_v60  ;;  %4565 = vbcast.lane.b32.xlu1 %v4563_v35, 256  ;;  %v843_v35 = vrot.slane %v829_v45, %v6155_v27  ;;  %v6695_v10 = vrot.slane %v836_v37, %v6155_v27 }
 0x19a   : > { %v6626_v5 = vpop.permute.xlu0 %826  ;;  %v941_v63 = vmax.f32 %v940_v50, 0.0 }
 0x19b   : > { %1340 = vbcast.lane.b32.xlu0 %v1338_v55, 256  ;;  %v6639_v57 = vrot.slane %v3422_v40, %v6271_v3  ;;  %v1373_v40 = vrot.slane %v6593_v14, %v6026_v32  ;;  %v844_v55 = vcombine.high %v836_v37, %v836_v37  ;;  %v845_v1 = vcombine.high %v843_v35, %v843_v35 }
 0x19c   : > { %v1012_v6 = vcombine.high %v941_v63, %v941_v63  ;;  %v1019_v39 = vrot.slane %v941_v63, %v6155_v27  ;;  %v1514_v14 = vrot.slane %v6651_v47, %v6006_v12  ;;  %v6701_v63 = vrot.slane %v843_v35, %v6155_v27 }
 0x19d   : > { %4579 = vbcast.lane.b32.xlu1 %v4577_v29, 256  ;;  %7793 = vst [vmem:[#allocation8_spill] sm:$0xff] %v6639_v57  ;;  %v1535_v29 = vrot.slane %v6651_v47, %v6001_v8  ;;  %v6692_v34 = vrot.slane %v844_v55, %v6155_v27  ;;  %v1528_v37 = vrot.slane %v6651_v47, %v6014_v19 }
 0x19e   : > { %v6634_v48 = vpop.permute.xlu0 %967  ;;  %v1026_v0 = vrot.slane %v1012_v6, %v6155_v27  ;;  %v1027_v59 = vcombine.high %v1019_v39, %v1019_v39  ;;  %v6709_v6 = vrot.slane %v845_v1, %v6155_v27  ;;  %v874_v42 = vcombine.high %v6695_v10, %v6695_v10 }
 0x19f   : > { %1354 = vbcast.lane.b32.xlu0 %v1352_v23, 256  ;;  %v2044_v23 = vsub.f32 %v7798_v20, %v5984_v56  ;;  %v876_v35 = vcombine.high %v6692_v34, %v6692_v34  ;;  %v897_v62 = vrot.slane %v6701_v63, %v5998_v7 }
 0x1a0   : > { %v1028_v50 = vcombine.high %v1026_v0, %v1026_v0  ;;  %v1042_v1 = vrot.slane %v1026_v0, %v6155_v27  ;;  %v901_v0 = vrot.slane %v6709_v6, %v5998_v7 }
 0x1a1   : > { %v6646_v38 = vpop.permute.xlu1 %3847  ;;  %1333 = vbcast.lane.b32.xlu1 %v1331_v54, 256  ;;  %v2045_v45 = vand.u32 2147483647, %v2044_v23  ;;  %v877_v23 = vcombine.high %v6709_v6, %v6709_v6 }
 0x1a2   : > { %v6653_v58 = vpop.permute.xlu0 %981 }
 0x1a3   : > { %1368 = vbcast.lane.b32.xlu0 %v1366_v31, 256  ;;  %v7800_v31 = vld [vmem:[#allocation14_spill] sm:$0xff]  ;;  %v2046_v20 = vsub.f32 1.0, %v2045_v45  ;;  %v893_v45 = vrot.slane %v876_v35, %v5998_v7 }
 0x1a4   : > { %v6698_v52 = vmul.f32 %v7800_v31, %v1864_v25  ;;  %v1542_v31 = vrot.slane %v6651_v47, %v6020_v26 }
 0x1a5   : > { %1347 = vbcast.lane.b32.xlu1 %v1345_v43, 256 }
 0x1a6   : > { %v6661_v17 = vpop.permute.xlu1 %4322  ;;  %v6663_v13 = vpop.permute.xlu0 %995  ;;  %v1873_v25 = vrot.slane %v6698_v52, %v5998_v7 }
 0x1a7   : > { %7797 = vst [vmem:[#allocation5_spill] sm:$0xff] %v6661_v17  ;;  %1509 = vbcast.lane.b32.xlu0 %v1507_v22, 256  ;;  %v1035_v22 = vrot.slane %v1019_v39, %v6155_v27  ;;  %v1058_v17 = vcombine.high %v1042_v1, %v1042_v1 }
 0x1a9   : > { %1361 = vbcast.lane.b32.xlu1 %v1359_v24, 256  ;;  %v1056_v24 = vrot.slane %v1028_v50, %v6155_v27  ;;  %v885_v50 = vrot.slane %v6692_v34, %v5998_v7  ;;  %v1064_v53 = vrot.slane %v1035_v22, %v5998_v7 }
 0x1aa   : > { %v6670_v18 = vpop.permute.xlu1 %798  ;;  %v6672_v2 = vpop.permute.xlu0 %1009 }
 0x1ab   : > { %1523 = vbcast.lane.b32.xlu0 %v1521_v28, 256  ;;  %v1049_v28 = vrot.slane %v1027_v59, %v6155_v27  ;;  %v1060_v59 = vcombine.high %v1056_v24, %v1056_v24 }
 0x1ad   : > { %1375 = vbcast.lane.b32.xlu1 %v1373_v40, 256  ;;  %v875_v40 = vcombine.high %v6701_v63, %v6701_v63  ;;  %v1068_v35 = vrot.slane %v1049_v28, %v5998_v7  ;;  %v1092_v63 = vrot.slane %v1060_v59, %v5998_v7 }
 0x1ae   : > { %v6681_v49 = vpop.permute.xlu1 %805  ;;  %v6687_v54 = vpop.permute.xlu0 %1484 }
 0x1af   : > { %7799 = vst [vmem:[#allocation16_spill] sm:$0xff] %v6687_v54  ;;  %1537 = vbcast.lane.b32.xlu0 %v1535_v29, 256  ;;  %v1057_v29 = vcombine.high %v1035_v22, %v1035_v22  ;;  %v905_v34 = vrot.slane %v875_v40, %v5998_v7  ;;  %v1887_v54 = vrot.slane %v6698_v52, %v5995_v4 }
 0x1b0   : > { %v921_v22 = vmul.f32 %v893_v45, %v6670_v18  ;;  %v1915_v45 = vrot.slane %v6698_v52, %v6009_v15 }
 0x1b1   : > { %1516 = vbcast.lane.b32.xlu1 %v1514_v14, 256  ;;  %v881_v14 = vrot.slane %v6695_v10, %v5998_v7 }
 0x1b2   : > { %v6703_v43 = vpop.permute.xlu1 %819  ;;  %v6721_v55 = vpop.permute.xlu0 %3689 }
 0x1b3   : > { %1551 = vbcast.lane.b32.xlu0 %v1549_v33, 256  ;;  %7801 = vst [vmem:[#allocation9_spill] sm:$0xff] %v6721_v55  ;;  %v889_v33 = vrot.slane %v874_v42, %v5998_v7  ;;  %v2047_v55 = vmax.f32 %v2046_v20, 0.0  ;;  %v909_v42 = vrot.slane %v877_v23, %v5998_v7  ;;  %v1084_v20 = vrot.slane %v1056_v24, %v5998_v7 }
 0x1b4   : > { %v1080_v23 = vrot.slane %v1042_v1, %v5998_v7  ;;  %v1880_v24 = vrot.slane %v6698_v52, %v6006_v12  ;;  %v1088_v1 = vrot.slane %v1058_v17, %v5998_v7 }
 0x1b5   : > { %1530 = vbcast.lane.b32.xlu1 %v1528_v37, 256  ;;  %v1059_v37 = vcombine.high %v1049_v28, %v1049_v28  ;;  %v1901_v28 = vrot.slane %v6698_v52, %v6001_v8  ;;  %v920_v59 = vmul.f32 %v889_v33, %v6276_v16  ;;  %v925_v16 = vmul.f32 %v909_v42, %v6626_v5 }
 0x1b6   : > { %v961_v39 = vpop.permute.xlu1 %960  ;;  %v6748_v6 = vpop.permute.xlu0 %3703 }
 0x1b7   : > { %1875 = vbcast.lane.b32.xlu0 %v1873_v25, 256  ;;  %v1072_v25 = vrot.slane %v1057_v29, %v5998_v7  ;;  %7802 = vst [vmem:[#allocation13_spill] sm:$0xff] %v6748_v6  ;;  %v1556_v29 = vrot.slane %v6651_v47, %v6026_v32  ;;  %v1108_v6 = vmul.f32 %v1092_v63, %v6672_v2 }
 0x1b8   : > { %v1102_v47 = vmul.f32 %v1068_v35, %v6634_v48  ;;  %v7804_v48 = vld [vmem:[#allocation17_spill] sm:$0xff] }
 0x1b9   : > { %1544 = vbcast.lane.b32.xlu1 %v1542_v31, 256  ;;  %v1076_v31 = vrot.slane %v1059_v37, %v5998_v7  ;;  %v1106_v37 = vmul.f32 %v1084_v20, %v6663_v13  ;;  %v923_v13 = vmul.f32 %v901_v0, %v6602_v51  ;;  %v1894_v51 = vrot.slane %v6698_v52, %v6014_v19 }
 0x1ba   : > { %v975_v10 = vpop.permute.xlu1 %974  ;;  %v924_v0 = vmul.f32 %v905_v34, %v6703_v43 }
 0x1bb   : > { %v1103_v40 = vmul.f32 %v1072_v25, %v975_v10  ;;  %1889 = vbcast.lane.b32.xlu0 %v1887_v54, 256  ;;  %v1101_v10 = vmul.f32 %v1064_v53, %v961_v39  ;;  %v918_v25 = vmul.f32 %v881_v14, %v6265_v9  ;;  %v1104_v18 = vmul.f32 %v1076_v31, %v6653_v58  ;;  %v7803_v53 = vld [vmem:[#allocation15_spill] sm:$0xff]  ;;  %v6783_v58 = vpop.permute.xlu0 %3717 }
 0x1bc   : > { %v6771_v2 = vmul.f32 %v7803_v53, %v2047_v55  ;;  %v919_v39 = vmul.f32 %v885_v50, %v7804_v48  ;;  %v6779_v9 = vadd.f32 %v1108_v6, %v925_v16  ;;  %v6787_v35 = vadd.f32 %v1106_v37, %v923_v13  ;;  %v3371_v13 = vld [vmem:[%s6841_s16 + $0x60] sm:$0xff] }
 0x1bd   : > { %1558 = vbcast.lane.b32.xlu1 %v1556_v29, 256  ;;  %v6768_v33 = vadd.f32 %v1103_v40, %v920_v59  ;;  %v6777_v17 = vadd.f32 %v1104_v18, %v921_v22  ;;  %v6781_v5 = vadd.f32 %v1101_v10, %v918_v25  ;;  %v922_v50 = vmul.f32 %v897_v62, %v6681_v49 }
 0x1be   : > { %v989_v54 = vpop.permute.xlu1 %988  ;;  %v6785_v55 = vadd.f32 %v1102_v47, %v919_v39  ;;  %v2056_v40 = vrot.slane %v6771_v2, %v5998_v7  ;;  %v1177_v31 = vcombine.low %v6787_v35, %v6779_v9  ;;  %v2070_v47 = vrot.slane %v6771_v2, %v5995_v4 }
 0x1bf   : > { %1903 = vbcast.lane.b32.xlu0 %v1901_v28, 256  ;;  %v1105_v14 = vmul.f32 %v1080_v23, %v989_v54  ;;  %v1129_v63 = vcombine.low %v6781_v5, %v6768_v33  ;;  %v1908_v28 = vrot.slane %v6698_v52, %v6020_v26  ;;  %v1922_v25 = vrot.slane %v6698_v52, %v6026_v32 }
 0x1c0   : > { %v1145_v29 = vcombine.low %v6785_v55, %v6777_v17  ;;  %v6821_v22 = vrot.slane %v1177_v31, %v6253_v11  ;;  %v2084_v16 = vrot.slane %v6771_v2, %v6001_v8  ;;  %v3667_v53 = vsub.f32 %v6581_v36, %v5984_v56 }
 0x1c1   : > { %1882 = vbcast.lane.b32.xlu1 %v1880_v24, 256  ;;  %v6801_v20 = vadd.f32 %v1105_v14, %v922_v50  ;;  %v6810_v34 = vrot.slane %v1129_v63, %v6253_v11  ;;  %v2063_v52 = vrot.slane %v6771_v2, %v6006_v12  ;;  %v2822_v8 = vcombine.high %v6473_v46, %v6476_v21  ;;  %v7812_v50 = vld [vmem:[#allocation20_spill] sm:$0xff] }
 0x1c2   : > { %v1003_v42 = vpop.permute.xlu1 %1002  ;;  %v6818_v59 = vrot.slane %v1145_v29, %v6253_v11  ;;  %v2098_v36 = vrot.slane %v6771_v2, %v6009_v15  ;;  %v3850_v12 = vsub.f32 %v6646_v38, %v5984_v56  ;;  %v3668_v63 = vand.u32 2147483647, %v3667_v53 }
 0x1c3   : > { %v1107_v6 = vmul.f32 %v1088_v1, %v1003_v42  ;;  %1917 = vbcast.lane.b32.xlu0 %v1915_v45, 256  ;;  %v3372_v45 = vld [vmem:[%s6841_s16 + $0x68] sm:$0xff]  ;;  %v2077_v46 = vrot.slane %v6771_v2, %v6014_v19  ;;  %v2091_v38 = vrot.slane %v6771_v2, %v6020_v26  ;;  %v3423_v53 = vcombine.high %v6614_v61, %v6609_v60  ;;  %v7813_v60 = vld [vmem:[#allocation10_spill] sm:$0xff]  ;;  %v7814_v61 = vld [vmem:[#allocation21_spill] sm:$0xff] }
 0x1c4   : > { %v1193_v37 = vcombine.low %v6810_v34, %v6818_v59  ;;  %v6875_v21 = vpack.i.bf16 %v3372_v45, %v3371_v13  ;;  %v3851_v29 = vand.u32 2147483647, %v3850_v12  ;;  %v3669_v31 = vsub.f32 1.0, %v3668_v63  ;;  %v1127_v42 = vld [vmem:[%s6841_s16 + $0x50] sm:$0xff] }
 0x1c5   : > { %v6803_v62 = vadd.f32 %v1107_v6, %v924_v0  ;;  %1896 = vbcast.lane.b32.xlu1 %v1894_v51, 256  ;;  %v6805_v49 = vpop.permute.xlu0 %710  ;;  %v7811_v51 = vld [vmem:[#allocation6_spill] sm:$0xff]  ;;  %v2838_v12 = vcombine.high %v7814_v61, %v7813_v60 }
 0x1c6   : > { %7805 = vst [vmem:[#allocation11_spill] sm:$0xff] %v6805_v49  ;;  %v6807_v43 = vpop.permute.xlu1 %1301  ;;  %v6855_v48 = vrot.slane %v1193_v37, %v6271_v3  ;;  %v2806_v0 = vcombine.high %v7812_v50, %v7811_v51  ;;  %v3852_v37 = vsub.f32 1.0, %v3851_v29  ;;  %v1122_v51 = vld [vmem:[%s6841_s16 + $0x28] sm:$0xff]  ;;  %v1117_v50 = vld [vmem:[%s6841_s16] sm:$0xff]  ;;  %v1119_v29 = vld [vmem:[%s6841_s16 + $0x10] sm:$0xff] }
 0x1c7   : > { %v1161_v23 = vcombine.low %v6801_v20, %v6803_v62  ;;  %2058 = vbcast.lane.b32.xlu0 %v2056_v40, 256  ;;  %v2836_v40 = vrot.slane %v2822_v8, %v6271_v3  ;;  %v6901_v8 = vld [vmem:[%s6841_s16 + $0x70] sm:$0xff] }
 0x1c8   : > { %v2820_v19 = vrot.slane %v2806_v0, %v6271_v3  ;;  %v3853_v45 = vmax.f32 %v3852_v37, 0.0  ;;  %v1118_v0 = vld [vmem:[%s6841_s16 + $0x8] sm:$0xff] }
 0x1c9   : > { %v6824_v10 = vrot.slane %v1161_v23, %v6253_v11  ;;  %1910 = vbcast.lane.b32.xlu1 %v1908_v28, 256  ;;  %v6826_v54 = vpop.permute.xlu0 %718 }
 0x1ca   : > { %7806 = vst [vmem:[#allocation14_spill] sm:$0xff] %v6826_v54  ;;  %v2840_v13 = vcombine.high %v2820_v19, %v2836_v40  ;;  %v3924_v37 = vcombine.high %v3853_v45, %v3853_v45 }
 0x1cb   : > { %v1225_v24 = vcombine.low %v6824_v10, %v6821_v22  ;;  %v6834_v1 = vpop.permute.xlu1 %1850  ;;  %2072 = vbcast.lane.b32.xlu0 %v2070_v47, 256  ;;  %v2839_v47 = vcombine.low %v2820_v19, %v2836_v40  ;;  %v1126_v40 = vld [vmem:[%s6841_s16 + $0x48] sm:$0xff]  ;;  %v1123_v19 = vld [vmem:[%s6841_s16 + $0x30] sm:$0xff] }
 0x1cc   : > { %7807 = vst [vmem:[#allocation15_spill] sm:$0xff] %v6834_v1 }
 0x1cd   : > { %1924 = vbcast.lane.b32.xlu1 %v1922_v25, 256  ;;  %v6843_v4 = vpop.permute.xlu0 %726  ;;  %v6848_v18 = vrot.slane %v1225_v24, %v6271_v3  ;;  %v3670_v24 = vmax.f32 %v3669_v31, 0.0  ;;  %v2105_v25 = vrot.slane %v6771_v2, %v6026_v32  ;;  %v3407_v32 = vcombine.high %v6622_v41, %v6617_v44 }
 0x1ce   : > { %7808 = vst [vmem:[#allocation17_spill] sm:$0xff] %v6843_v4  ;;  %v3437_v31 = vrot.slane %v3423_v53, %v6271_v3  ;;  %v7820_v4 = vld [vmem:[#allocation7_spill] sm:$0xff] }
 0x1cf   : > { %2086 = vbcast.lane.b32.xlu0 %v2084_v16, 256  ;;  %v3741_v16 = vcombine.high %v3670_v24, %v3670_v24  ;;  %v3748_v2 = vrot.slane %v3670_v24, %v6155_v27  ;;  %v3421_v53 = vrot.slane %v3407_v32, %v6271_v3  ;;  %v4508_v54 = vsub.f32 %v7820_v4, %v5984_v56  ;;  %v2771_v4 = vld [vmem:[%s6841_s16 + $0x68] sm:$0xff] }
 0x1d0   : > { %v6857_v39 = vpop.permute.xlu1 %2033 }
 0x1d1   : > { %7809 = vst [vmem:[#allocation22_spill] sm:$0xff] %v6857_v39  ;;  %2065 = vbcast.lane.b32.xlu1 %v2063_v52, 256  ;;  %v6863_v14 = vpop.permute.xlu0 %734  ;;  %v3755_v44 = vrot.slane %v3741_v16, %v6155_v27  ;;  %v6932_v16 = vrot.slane %v3748_v2, %v6155_v27 }
 0x1d2   : > { %7810 = vst [vmem:[#allocation23_spill] sm:$0xff] %v6863_v14  ;;  %v1128_v14 = vld [vmem:[%s6841_s16 + $0x58] sm:$0xff] }
 0x1d3   : > { %2100 = vbcast.lane.b32.xlu0 %v2098_v36, 256  ;;  %v1121_v36 = vld [vmem:[%s6841_s16 + $0x20] sm:$0xff]  ;;  %v3757_v32 = vcombine.high %v3755_v44, %v3755_v44 }
 0x1d4   : > { %v6877_v6 = vpop.permute.xlu1 %3696  ;;  %v6926_v24 = vpack.i.bf16 %v1122_v51, %v1121_v36  ;;  %v3756_v36 = vcombine.high %v3748_v2, %v3748_v2  ;;  %v3441_v2 = vcombine.high %v3421_v53, %v3437_v31 }
 0x1d5   : > { %2079 = vbcast.lane.b32.xlu1 %v2077_v46, 256  ;;  %v6879_v15 = vpop.permute.xlu0 %3731  ;;  %v1125_v46 = vld [vmem:[%s6841_s16 + $0x40] sm:$0xff] }
 0x1d6   : > { %7816 = vst [vmem:[#allocation20_spill] sm:$0xff] %v6926_v24 }
 0x1d7   : > { %5597 = vrot.lane.b32.xlu0 %v6875_v21, %s5848_s18 }
 0x1d8   : > { %v6887_v23 = vpop.permute.xlu1 %3710 }
 0x1d9   : > { %2093 = vbcast.lane.b32.xlu1 %v2091_v38, 256  ;;  %v6889_v28 = vpop.permute.xlu0 %3872  ;;  %v1120_v38 = vld [vmem:[%s6841_s16 + $0x18] sm:$0xff] }
 0x1db   : > { %2846 = vrot.lane.b32.xlu0 %v2839_v47, %s5841_s28  ;;  %v1124_v47 = vld [vmem:[%s6841_s16 + $0x38] sm:$0xff] }
 0x1dc   : > { %v6894_v26 = vpop.permute.xlu1 %3724 }
 0x1dd   : > { %2107 = vbcast.lane.b32.xlu1 %v2105_v25, 256  ;;  %v6898_v52 = vpop.permute.xlu0 %3886  ;;  %v6928_v25 = vpack.i.bf16 %v1118_v0, %v1117_v50  ;;  %v6943_v50 = vpack.i.bf16 %v1126_v40, %v1125_v46  ;;  %v6947_v0 = vpack.i.bf16 %v1124_v47, %v1123_v19  ;;  %v6960_v46 = vrot.slane %v3755_v44, %v6155_v27 }
 0x1de   : > { %v3440_v40 = vcombine.low %v3421_v53, %v3437_v31  ;;  %v7754_v31 = vmov 0.0|0.0   ;;  %v1226_v53 = vcombine.high %v6824_v10, %v6821_v22  ;;  %v7752_v22 = vmov 0.0   ;;  %v2772_v10 = vld [vmem:[%s6841_s16 + $0x70] sm:$0xff] }
 0x1df   : > { %2850 = vrot.lane.b32.xlu0 %v2840_v13, %s5849_s20  ;;  %v3931_v13 = vrot.slane %v3853_v45, %v6155_v27  ;;  %7818 = vst [vmem:[#allocation25_spill] sm:$0xff] %v6943_v50  ;;  %v6945_v45 = vpack.i.bf16 %v1120_v38, %v1119_v29  ;;  %v6962_v29 = vpack.i.bf16 %v1128_v14, %v1127_v42  ;;  %v2770_v38 = vld [vmem:[%s6841_s16 + $0x60] sm:$0xff]  ;;  %v6978_v14 = vand.u32 2147483647, %v4508_v54 }
 0x1e0   : > { %v6913_v63 = vpop.permute.xlu1 %714  ;;  %v5333_v47 = vpack.c.bf16 %v2771_v4, %v2770_v38  ;;  %5332 = vmatprep.subr.bf16.mxu0 %v7754_v31  ;;  %5353 = vmatprep.subr.bf16.mxu1 %v7754_v31  ;;  %v1130_v54 = vcombine.high %v6781_v5, %v6768_v33  ;;  %v7823_v38 = vld [vmem:[#allocation5_spill] sm:$0xff] }
 0x1e1   : > { %7815 = vst [vmem:[#allocation6_spill] sm:$0xff] %v6913_v63  ;;  %2842 = vrot.lane.b32.xlu1 %v2838_v12, %s5850_s23  ;;  %v6920_v41 = vpop.permute.xlu0 %3900  ;;  %v3439_v12 = vcombine.high %v6644_v30, %v6639_v57  ;;  %7819 = vst [vmem:[#allocation26_spill] sm:$0xff] %v6945_v45  ;;  %v3786_v63 = vcombine.high %v6932_v16, %v6932_v16  ;;  %v3939_v19 = vcombine.high %v3931_v13, %v3931_v13 }
 0x1e2   : > { %v1162_v57 = vcombine.high %v6801_v20, %v6803_v62  ;;  %v6984_v20 = vrot.slane %v3757_v32, %v6155_v27  ;;  %5334 = vmatpush3.bf16.msra.mxu0 %v5333_v47  ;;  %v1194_v32 = vcombine.high %v6810_v34, %v6818_v59  ;;  %5194 = vmatprep.mubr.msk.f32.mxu0 %vm5853_vm0, %v7752_v22 }
 0x1e3   : > { %3464 = vrot.lane.b32.xlu0 %v6901_v8, %s5848_s18  ;;  %v3801_v42 = vrot.slane %v3786_v63, %v5998_v7  ;;  %5192 = vmatprep.subr.mxu0 %v7752_v22  ;;  %v3961_v33 = vrot.slane %v3939_v19, %v6155_v27  ;;  %v4325_v4 = vsub.f32 %v7823_v38, %v5984_v56 }
 0x1e4   : > { %v6941_v51 = vpop.permute.xlu1 %722  ;;  %v7014_v5 = vrot.slane %v1162_v57, %v6253_v11  ;;  %5230 = vmatprep.mubr.msk.f32.mxu1 %vm5853_vm0, %v7752_v22  ;;  %v3789_v57 = vcombine.high %v6984_v20, %v6984_v20  ;;  %v7036_v47 = vrot.slane %v1130_v54, %v6253_v11 }
 0x1e5   : > { %7817 = vst [vmem:[#allocation24_spill] sm:$0xff] %v6941_v51  ;;  %3443 = vrot.lane.b32.xlu1 %v3439_v12, %s5850_s23  ;;  %v6954_v49 = vpop.permute.xlu0 %3914  ;;  %v6957_v51 = vrot.slane %v3924_v37, %v6155_v27  ;;  %v6972_v37 = vrot.slane %v3756_v36, %v6155_v27  ;;  %v1178_v36 = vcombine.high %v6787_v35, %v6779_v9 }
 0x1e6   : > { %v1146_v9 = vcombine.high %v6785_v55, %v6777_v17  ;;  %v3787_v35 = vcombine.high %v6960_v46, %v6960_v46  ;;  %v1240_v55 = vrot.slane %v1226_v53, %v6271_v3  ;;  %5193 = vmatpush3.msra.mxu0 %v2772_v10  ;;  %v3971_v54 = vcombine.high %v3961_v33, %v3961_v33 }
 0x1e7   : > { %3451 = vrot.lane.b32.xlu0 %v3441_v2, %s5849_s20  ;;  %v6996_v2 = vrot.slane %v3931_v13, %v6155_v27  ;;  %v3788_v34 = vcombine.high %v6972_v37, %v6972_v37  ;;  %v1192_v19 = vrot.slane %v1178_v36, %v6253_v11  ;;  %v3940_v38 = vcombine.high %v6957_v51, %v6957_v51 }
 0x1e8   : > { %v6974_v44 = vpop.permute.xlu1 %730  ;;  %5335 = vmatprep.subr.bf16.mxu0 %v7754_v31  ;;  %v3797_v13 = vrot.slane %v6972_v37, %v5998_v7  ;;  %v1208_v36 = vrot.slane %v1194_v32, %v6271_v3  ;;  %v1160_v10 = vrot.slane %v1146_v9, %v6253_v11  ;;  %v3813_v37 = vrot.slane %v6984_v20, %v5998_v7 }
 0x1e9   : > { %7821 = vst [vmem:[#allocation7_spill] sm:$0xff] %v6974_v44  ;;  %3447 = vrot.lane.b32.xlu1 %v3440_v40, %s5841_s28  ;;  %v6987_v62 = vpop.permute.xlu0 %4347  ;;  %v7004_v40 = vrot.slane %v6957_v51, %v6155_v27  ;;  %v3969_v22 = vcombine.high %v6996_v2, %v6996_v2  ;;  %v1241_v63 = vcombine.low %v7014_v5, %v1192_v19  ;;  %v7054_v44 = vand.u32 2147483647, %v4325_v4 }
 0x1ea   : > { %7822 = vst [vmem:[#allocation27_spill] sm:$0xff] %v6987_v62  ;;  %v3817_v51 = vrot.slane %v3787_v35, %v5998_v7  ;;  %v3805_v31 = vrot.slane %v3788_v34, %v5998_v7  ;;  %v3821_v30 = vrot.slane %v3789_v57, %v5998_v7  ;;  %v1259_v32 = vcombine.low %v1208_v36, %v1240_v55 }
 0x1eb   : > { %5612 = vrot.lane.b32.xlu0 %v6926_v24, %s5848_s18  ;;  %v3970_v53 = vcombine.high %v7004_v40, %v7004_v40  ;;  %v1209_v9 = vcombine.low %v7036_v47, %v1160_v10  ;;  %v3976_v35 = vrot.slane %v6996_v2, %v5998_v7  ;;  %v3984_v34 = vrot.slane %v3969_v22, %v5998_v7  ;;  %v7825_v24 = vld [vmem:[#allocation13_spill] sm:$0xff] }
 0x1ec   : > { %v7020_v59 = vpop.permute.xlu1 %3738  ;;  %v3968_v4 = vrot.slane %v3940_v38, %v6155_v27  ;;  %v3992_v20 = vrot.slane %v7004_v40, %v5998_v7  ;;  %v3980_v61 = vrot.slane %v3961_v33, %v5998_v7  ;;  %v3832_v39 = vmul.f32 %v3801_v42, %v7825_v24 }
 0x1ed   : > { %v7029_v17 = vpop.permute.xlu0 %4361  ;;  %5602 = vrot.lane.b32.xlu1 %v6928_v25, %s5848_s18  ;;  %v4000_v57 = vrot.slane %v3970_v53, %v5998_v7  ;;  %v1242_v1 = vcombine.high %v7014_v5, %v1192_v19  ;;  %v1249_v22 = vrot.slane %v1241_v63, %v6271_v3  ;;  %v3833_v38 = vmul.f32 %v3805_v31, %v6887_v23 }
 0x1ee   : > { %v4015_v40 = vmul.f32 %v3984_v34, %v6898_v52  ;;  %v1210_v33 = vcombine.high %v7036_v47, %v1160_v10  ;;  %v1258_v24 = vcombine.high %v6855_v48, %v6848_v18  ;;  %v1217_v42 = vrot.slane %v1209_v9, %v6271_v3 }
 0x1ef   : > { %5622 = vrot.lane.b32.xlu0 %v6943_v50, %s5848_s18  ;;  %v3988_v50 = vrot.slane %v3971_v54, %v5998_v7  ;;  %v3972_v5 = vcombine.high %v3968_v4, %v3968_v4  ;;  %v3831_v63 = vmul.f32 %v3797_v13, %v6877_v6  ;;  %v4013_v23 = vmul.f32 %v3976_v35, %v6889_v28 }
 0x1f0   : > { %v3880_v12 = vpop.permute.xlu1 %3879  ;;  %v4019_v52 = vmul.f32 %v4000_v57, %v6954_v49  ;;  %v1262_v47 = vcombine.high %v1217_v42, %v1249_v22  ;;  %v3836_v6 = vmul.f32 %v3817_v51, %v6879_v15  ;;  %v4023_v13 = vadd.f32 %v4015_v40, %v3832_v39 }
 0x1f1   : > { %v7059_v60 = vpop.permute.xlu0 %4375  ;;  %5607 = vrot.lane.b32.xlu1 %v6945_v45, %s5848_s18  ;;  %v1260_v45 = vcombine.high %v1208_v36, %v1240_v55  ;;  %v3996_v55 = vrot.slane %v3968_v4, %v5998_v7  ;;  %v1256_v36 = vrot.slane %v1242_v1, %v6271_v3  ;;  %v4017_v28 = vmul.f32 %v3992_v20, %v6920_v41 }
 0x1f2   : > { %7824 = vst [vmem:[#allocation5_spill] sm:$0xff] %v7059_v60  ;;  %v4014_v60 = vmul.f32 %v3980_v61, %v3880_v12  ;;  %v7827_v12 = vrot.slane %v6932_v16, %v5998_v7  ;;  %v7828_v16 = vrot.slane %v6960_v46, %v5998_v7  ;;  %v1224_v1 = vrot.slane %v1210_v33, %v6271_v3 }
 0x1f3   : > { %1270 = vrot.lane.b32.xlu0 %v1259_v32, %s5845_s4  ;;  %v4004_v32 = vrot.slane %v3972_v5, %v5998_v7  ;;  %v4027_v39 = vadd.f32 %v4019_v52, %v3836_v6  ;;  %v3837_v4 = vmul.f32 %v3821_v30, %v7020_v59  ;;  %v7829_v20 = vsub.f32 1.0, %v6978_v14 }
 0x1f4   : > { %v3894_v2 = vpop.permute.xlu1 %3893  ;;  %v4022_v49 = vadd.f32 %v4014_v60, %v3831_v63  ;;  %v3834_v10 = vmul.f32 %v7828_v16, %v6783_v58  ;;  %v3835_v60 = vmul.f32 %v3813_v37, %v6894_v26  ;;  %v1263_v35 = vcombine.low %v1224_v1, %v1256_v36 }
 0x1f5   : > { %v4016_v53 = vmul.f32 %v3988_v50, %v3894_v2  ;;  %v7079_v62 = vpop.permute.xlu0 %4389  ;;  %5617 = vrot.lane.b32.xlu1 %v6947_v0, %s5848_s18  ;;  %v7826_v50 = vld [vmem:[#allocation9_spill] sm:$0xff]  ;;  %v4511_v57 = vmax.f32 %v7829_v20, 0.0  ;;  %v1264_v14 = vcombine.high %v1224_v1, %v1256_v36 }
 0x1f6   : > { %v3830_v31 = vmul.f32 %v7827_v12, %v7826_v50  ;;  %v4025_v34 = vadd.f32 %v4017_v28, %v3834_v10 }
 0x1f7   : > { %v4024_v61 = vadd.f32 %v4016_v53, %v3833_v38  ;;  %1274 = vrot.lane.b32.xlu0 %v1260_v45, %s5842_s29  ;;  %v4327_v45 = vsub.f32 1.0, %v7054_v44  ;;  %v1261_v38 = vcombine.low %v1217_v42, %v1249_v22  ;;  %v4582_v5 = vcombine.high %v4511_v57, %v4511_v57 }
 0x1f8   : > { %v3908_v19 = vpop.permute.xlu1 %3907  ;;  %v4021_v15 = vadd.f32 %v4013_v23, %v3830_v31  ;;  %v4048_v40 = vcombine.low %v4025_v34, %v4027_v39  ;;  %v4589_v22 = vrot.slane %v4511_v57, %v6155_v27 }
 0x1f9   : > { %v7099_v54 = vpop.permute.xlu0 %4530  ;;  %1266 = vrot.lane.b32.xlu1 %v1258_v24, %s5841_s28  ;;  %v4040_v51 = vcombine.low %v4022_v49, %v4024_v61  ;;  %v4018_v41 = vmul.f32 %v3996_v55, %v3908_v19  ;;  %v4328_v2 = vmax.f32 %v4327_v45, 0.0  ;;  %v4596_v36 = vrot.slane %v4582_v5, %v6155_v27 }
 0x1fa   : > { %v4032_v44 = vcombine.low %v4021_v15, %v4023_v13  ;;  %v4055_v63 = vrot.slane %v4048_v40, %v6253_v11  ;;  %v4597_v19 = vcombine.high %v4589_v22, %v4589_v22  ;;  %v4605_v10 = vrot.slane %v4589_v22, %v6155_v27 }
 0x1fb   : > { %1282 = vrot.lane.b32.xlu0 %v1262_v47, %s5843_s30  ;;  %v4047_v26 = vrot.slane %v4040_v51, %v6253_v11  ;;  %v4026_v37 = vadd.f32 %v4018_v41, %v3835_v60  ;;  %v4406_v42 = vrot.slane %v4328_v2, %v6155_v27  ;;  %v4399_v47 = vcombine.high %v4328_v2, %v4328_v2 }
 0x1fc   : > { %v3922_v9 = vpop.permute.xlu1 %3921  ;;  %v4039_v30 = vrot.slane %v4032_v44, %v6253_v11  ;;  %v7155_v39 = vrot.slane %v4596_v36, %v6155_v27  ;;  %v4619_v51 = vrot.slane %v4597_v19, %v6155_v27  ;;  %v4627_v34 = vcombine.high %v4605_v10, %v4605_v10 }
 0x1fd   : > { %v4020_v46 = vmul.f32 %v4004_v32, %v3922_v9  ;;  %v7112_v58 = vpop.permute.xlu0 %4544  ;;  %5627 = vrot.lane.b32.xlu1 %v6962_v29, %s5848_s18  ;;  %v4414_v6 = vcombine.high %v4406_v42, %v4406_v42  ;;  %v4413_v15 = vrot.slane %v4399_v47, %v6155_v27 }
 0x1fe   : > { %v4065_v23 = vcombine.high %v4039_v30, %v4047_v26  ;;  %v4064_v61 = vcombine.low %v4039_v30, %v4047_v26  ;;  %v4629_v57 = vcombine.high %v4619_v51, %v4619_v51  ;;  %v7830_v26 = vld [vmem:[#allocation16_spill] sm:$0xff]  ;;  %v4650_v5 = vrot.slane %v7155_v39, %v5998_v7 }
 0x1ff   : > { %v4028_v53 = vadd.f32 %v4020_v46, %v3837_v4  ;;  %1286 = vrot.lane.b32.xlu0 %v1263_v35, %s5847_s6  ;;  %v4436_v60 = vrot.slane %v4414_v6, %v6155_v27  ;;  %v4598_v35 = vcombine.high %v4596_v36, %v4596_v36  ;;  %v4628_v46 = vcombine.high %v7155_v39, %v7155_v39 }
 0x200   : > { %v7120_v33 = vpop.permute.xlu1 %4354  ;;  %v4079_v13 = vrot.slane %v4065_v23, %v6271_v3  ;;  %v7146_v16 = vrot.slane %v4064_v61, %v6271_v3  ;;  %v4415_v20 = vcombine.high %v4413_v15, %v4413_v15  ;;  %v4429_v2 = vrot.slane %v4413_v15, %v6155_v27 }
 0x201   : > { %v4056_v59 = vcombine.low %v4026_v37, %v4028_v53  ;;  %v7123_v24 = vpop.permute.xlu0 %4558  ;;  %1278 = vrot.lane.b32.xlu1 %v1261_v38, %s5846_s5  ;;  %v4446_v38 = vcombine.high %v4436_v60, %v4436_v60  ;;  %v4626_v40 = vrot.slane %v4598_v35, %v6155_v27  ;;  %v1487_v37 = vsub.f32 %v7830_v26, %v5984_v56 }
 0x202   : > { %v4443_v23 = vrot.slane %v4415_v20, %v6155_v27  ;;  %v4646_v61 = vrot.slane %v4629_v57, %v5998_v7  ;;  %v1304_v6 = vsub.f32 %v6807_v43, %v5984_v56 }
 0x203   : > { %v4063_v52 = vrot.slane %v4056_v59, %v6253_v11  ;;  %1290 = vrot.lane.b32.xlu0 %v1264_v14, %s5844_s3  ;;  %v4634_v59 = vrot.slane %v4605_v10, %v5998_v7  ;;  %v4642_v14 = vrot.slane %v4627_v34, %v5998_v7  ;;  %v4654_v19 = vrot.slane %v4626_v40, %v5998_v7 }
 0x204   : > { %v7131_v50 = vpop.permute.xlu1 %4368  ;;  %v4630_v47 = vcombine.high %v4626_v40, %v4626_v40  ;;  %v1488_v36 = vand.u32 2147483647, %v1487_v37  ;;  %v4447_v43 = vcombine.high %v4443_v23, %v4443_v23 }
 0x205   : > { %v4080_v12 = vcombine.low %v4055_v63, %v4063_v52  ;;  %v4081_v31 = vcombine.high %v4055_v63, %v4063_v52  ;;  %v7133_v55 = vpop.permute.xlu0 %4572  ;;  %5632 = vrot.lane.b32.xlu1 %v6875_v21, %s5854_s24  ;;  %v4658_v63 = vrot.slane %v4628_v46, %v5998_v7  ;;  %v4638_v52 = vrot.slane %v4619_v51, %v5998_v7 }
 0x206   : > { %v4671_v46 = vmul.f32 %v4634_v59, %v7099_v54  ;;  %v4467_v54 = vrot.slane %v4429_v2, %v5998_v7 }
 0x207   : > { %v4095_v28 = vrot.slane %v4081_v31, %v6271_v3  ;;  %v7141_v49 = vrot.slane %v4080_v12, %v6271_v3  ;;  %v4445_v12 = vcombine.high %v4429_v2, %v4429_v2  ;;  %v4463_v31 = vrot.slane %v4446_v38, %v5998_v7  ;;  %v7831_v38 = vld [vmem:[#allocation27_spill] sm:$0xff] }
 0x208   : > { %v7143_v45 = vpop.permute.xlu1 %4382  ;;  %v4677_v57 = vmul.f32 %v4658_v63, %v7133_v55  ;;  %v1489_v55 = vsub.f32 1.0, %v1488_v36 }
 0x209   : > { %v7149_v32 = vpop.permute.xlu0 %1326  ;;  %5637 = vrot.lane.b32.xlu1 %v6875_v21, %s5855_s25  ;;  %v4098_v1 = vcombine.low %v4079_v13, %v4095_v28  ;;  %v4096_v41 = vcombine.low %v7146_v16, %v7141_v49  ;;  %v4097_v9 = vcombine.high %v7146_v16, %v7141_v49  ;;  %v4422_v21 = vrot.slane %v4406_v42, %v6155_v27 }
 0x20a   : > { %v4099_v42 = vcombine.high %v4079_v13, %v4095_v28  ;;  %v4673_v28 = vmul.f32 %v4642_v14, %v7112_v58  ;;  %v4491_v15 = vmul.f32 %v4463_v31, %v7131_v50  ;;  %v4475_v20 = vrot.slane %v4445_v12, %v5998_v7 }
 0x20b   : > { %4105 = vrot.lane.b32.xlu0 %v4098_v1, %s5841_s28  ;;  %v4444_v53 = vcombine.high %v4422_v21, %v4422_v21  ;;  %v4455_v1 = vrot.slane %v4436_v60, %v5998_v7  ;;  %v4451_v35 = vrot.slane %v4422_v21, %v5998_v7  ;;  %v1305_v50 = vand.u32 2147483647, %v1304_v6 }
 0x20c   : > { %v7165_v44 = vpop.permute.xlu1 %4396  ;;  %v4494_v37 = vmul.f32 %v4475_v20, %v7079_v62  ;;  %v4479_v14 = vrot.slane %v4447_v43, %v5998_v7 }
 0x20d   : > { %v7167_v4 = vpop.permute.xlu0 %1340  ;;  %4101 = vrot.lane.b32.xlu1 %v4097_v9, %s5850_s23  ;;  %v4459_v13 = vrot.slane %v4444_v53, %v5998_v7  ;;  %v4489_v58 = vmul.f32 %v4455_v1, %v7120_v33  ;;  %v4488_v40 = vmul.f32 %v4451_v35, %v7831_v38  ;;  %v4675_v53 = vmul.f32 %v4650_v5, %v7123_v24 }
 0x20e   : > { %v1306_v31 = vsub.f32 1.0, %v1305_v50  ;;  %v4495_v5 = vmul.f32 %v4479_v14, %v7165_v44 }
 0x20f   : > { %5642 = vrot.lane.b32.xlu0 %v6928_v25, %s5854_s24  ;;  %v4490_v34 = vmul.f32 %v4459_v13, %v7029_v17  ;;  %v4662_v17 = vrot.slane %v4630_v47, %v5998_v7  ;;  %v4679_v59 = vadd.f32 %v4671_v46, %v4488_v40  ;;  %v1490_v13 = vmax.f32 %v1489_v55, 0.0 }
 0x210   : > { %v4538_v30 = vpop.permute.xlu1 %4537 }
 0x211   : > { %v7182_v22 = vpop.permute.xlu0 %1354  ;;  %4122 = vrot.lane.b32.xlu1 %v6901_v8, %s5854_s24  ;;  %v4672_v39 = vmul.f32 %v4638_v52, %v4538_v30  ;;  %v4681_v26 = vadd.f32 %v4673_v28, %v4490_v34  ;;  %v4685_v52 = vadd.f32 %v4677_v57, %v4494_v37  ;;  %v1568_v44 = vrot.slane %v1490_v13, %v6155_v27 }
 0x213   : > { %4109 = vrot.lane.b32.xlu0 %v4099_v42, %s5849_s20  ;;  %v4680_v33 = vadd.f32 %v4672_v39, %v4489_v58  ;;  %v7832_v42 = vld [vmem:[#allocation5_spill] sm:$0xff]  ;;  %v4690_v2 = vcombine.low %v4679_v59, %v4681_v26 }
 0x214   : > { %v4552_v10 = vpop.permute.xlu1 %4551  ;;  %v4492_v63 = vmul.f32 %v4467_v54, %v7832_v42  ;;  %v1584_v42 = vrot.slane %v1568_v44, %v6155_v27 }
 0x215   : > { %v4674_v51 = vmul.f32 %v4646_v61, %v4552_v10  ;;  %v7199_v9 = vpop.permute.xlu0 %1368 }
 0x216   : > { %v4683_v62 = vadd.f32 %v4675_v53, %v4492_v63 }
 0x217   : > { %v4682_v60 = vadd.f32 %v4674_v51, %v4491_v15  ;;  %4780 = vrot.lane.b32.xlu0 %v6901_v8, %s5855_s25  ;;  %v4471_v8 = vrot.slane %v4443_v23, %v5998_v7  ;;  %v1307_v15 = vmax.f32 %v1306_v31, 0.0 }
 0x218   : > { %v4566_v21 = vpop.permute.xlu1 %4565  ;;  %v4706_v23 = vcombine.low %v4683_v62, %v4685_v52 }
 0x219   : > { %v7214_v30 = vpop.permute.xlu0 %1509  ;;  %v4698_v61 = vcombine.low %v4680_v33, %v4682_v60  ;;  %v4676_v12 = vmul.f32 %v4654_v19, %v4566_v21  ;;  %v4493_v24 = vmul.f32 %v4471_v8, %v7143_v45  ;;  %v4697_v19 = vrot.slane %v4690_v2, %v6253_v11 }
 0x21a   : > { %v1561_v45 = vcombine.high %v1490_v13, %v1490_v13  ;;  %v4713_v34 = vrot.slane %v4706_v23, %v6253_v11  ;;  %v1385_v58 = vrot.slane %v1307_v15, %v6155_v27  ;;  %v1378_v40 = vcombine.high %v1307_v15, %v1307_v15 }
 0x21b   : > { %v4705_v28 = vrot.slane %v4698_v61, %v6253_v11  ;;  %v4684_v10 = vadd.f32 %v4676_v12, %v4493_v24  ;;  %v1576_v21 = vcombine.high %v1568_v44, %v1568_v44 }
 0x21c   : > { %v4580_v47 = vpop.permute.xlu1 %4579  ;;  %v1575_v26 = vrot.slane %v1561_v45, %v6155_v27  ;;  %v1393_v33 = vcombine.high %v1385_v58, %v1385_v58  ;;  %v1392_v61 = vrot.slane %v1378_v40, %v6155_v27  ;;  %v1401_v62 = vrot.slane %v1385_v58, %v6155_v27  ;;  %v7834_v45 = vld [vmem:[#allocation15_spill] sm:$0xff]  ;;  %v7835_v40 = vld [vmem:[#allocation22_spill] sm:$0xff] }
 0x21d   : > { %v4678_v6 = vmul.f32 %v4662_v17, %v4580_v47  ;;  %v7221_v36 = vpop.permute.xlu0 %1523  ;;  %v4722_v46 = vcombine.low %v4697_v19, %v4705_v28  ;;  %v4723_v43 = vcombine.high %v4697_v19, %v4705_v28  ;;  %v1598_v12 = vrot.slane %v1576_v21, %v6155_v27 }
 0x21e   : > { %v7254_v63 = vrot.slane %v1575_v26, %v6155_v27  ;;  %v1415_v31 = vrot.slane %v1393_v33, %v6155_v27  ;;  %v1577_v47 = vcombine.high %v1575_v26, %v1575_v26  ;;  %v1394_v23 = vcombine.high %v1392_v61, %v1392_v61 }
 0x21f   : > { %v4686_v1 = vadd.f32 %v4678_v6, %v4495_v5  ;;  %v4737_v17 = vrot.slane %v4723_v43, %v6271_v3  ;;  %v7241_v37 = vrot.slane %v4722_v46, %v6271_v3  ;;  %v1606_v6 = vcombine.high %v1584_v42, %v1584_v42 }
 0x220   : > { %v7224_v39 = vpop.permute.xlu1 %1333  ;;  %v1607_v13 = vcombine.high %v7254_v63, %v7254_v63  ;;  %v1608_v28 = vcombine.high %v1598_v12, %v1598_v12  ;;  %v1425_v15 = vcombine.high %v1415_v31, %v1415_v31  ;;  %v1853_v44 = vsub.f32 %v7834_v45, %v5984_v56 }
 0x221   : > { %v4714_v51 = vcombine.low %v4684_v10, %v4686_v1  ;;  %v7227_v35 = vpop.permute.xlu0 %1537  ;;  %v7833_v10 = vld [vmem:[#allocation26_spill] sm:$0xff]  ;;  %v1408_v1 = vrot.slane %v1392_v61, %v6155_v27  ;;  %v1613_v46 = vrot.slane %v1584_v42, %v5998_v7  ;;  %v1629_v58 = vrot.slane %v7254_v63, %v5998_v7 }
 0x222   : > { %v2036_v26 = vsub.f32 %v7835_v40, %v5984_v56  ;;  %v1422_v21 = vrot.slane %v1394_v23, %v6155_v27  ;;  %v1854_v61 = vand.u32 2147483647, %v1853_v44 }
 0x223   : > { %v4721_v20 = vrot.slane %v4714_v51, %v6253_v11  ;;  %v1605_v51 = vrot.slane %v1577_v47, %v6155_v27  ;;  %v1424_v33 = vcombine.high %v1408_v1, %v1408_v1 }
 0x224   : > { %v7233_v57 = vpop.permute.xlu1 %1347  ;;  %v1426_v45 = vcombine.high %v1422_v21, %v1422_v21  ;;  %v1855_v44 = vsub.f32 1.0, %v1854_v61  ;;  %v1450_v40 = vrot.slane %v1422_v21, %v5998_v7 }
 0x225   : > { %v4738_v60 = vcombine.low %v4713_v34, %v4721_v20  ;;  %v4739_v50 = vcombine.high %v4713_v34, %v4721_v20  ;;  %v7235_v38 = vpop.permute.xlu0 %1551  ;;  %v1423_v34 = vcombine.high %v1401_v62, %v1401_v62  ;;  %v1621_v20 = vrot.slane %v1606_v6, %v5998_v7 }
 0x226   : > { %v1633_v42 = vrot.slane %v1605_v51, %v5998_v7  ;;  %v1609_v63 = vcombine.high %v1605_v51, %v1605_v51  ;;  %v1434_v6 = vrot.slane %v1415_v31, %v5998_v7  ;;  %v1650_v51 = vmul.f32 %v1613_v46, %v7214_v30 }
 0x227   : > { %v4753_v54 = vrot.slane %v4739_v50, %v6271_v3  ;;  %v7244_v53 = vrot.slane %v4738_v60, %v6271_v3  ;;  %v1637_v60 = vrot.slane %v1607_v13, %v5998_v7  ;;  %v1617_v50 = vrot.slane %v1598_v12, %v5998_v7 }
 0x228   : > { %v7246_v55 = vpop.permute.xlu1 %1361  ;;  %v1438_v56 = vrot.slane %v1423_v34, %v5998_v7  ;;  %v1652_v12 = vmul.f32 %v1621_v20, %v7221_v36  ;;  %v1454_v36 = vrot.slane %v1424_v33, %v5998_v7  ;;  %v1446_v46 = vrot.slane %v1408_v1, %v5998_v7 }
 0x229   : > { %v7248_v59 = vpop.permute.xlu0 %1875  ;;  %v4757_v8 = vcombine.high %v4737_v17, %v4753_v54  ;;  %v4755_v14 = vcombine.high %v7241_v37, %v7244_v53  ;;  %v4756_v5 = vcombine.low %v4737_v17, %v4753_v54  ;;  %v1625_v17 = vrot.slane %v1608_v28, %v5998_v7  ;;  %v7836_v54 = vld [vmem:[#allocation20_spill] sm:$0xff] }
 0x22a   : > { %v2037_v28 = vand.u32 2147483647, %v2036_v26  ;;  %v1656_v31 = vmul.f32 %v1637_v60, %v7235_v38  ;;  %v1473_v20 = vmul.f32 %v1454_v36, %v7199_v9  ;;  %v7837_v26 = vld [vmem:[#allocation25_spill] sm:$0xff]  ;;  %v1471_v1 = vmul.f32 %v1446_v46, %v7182_v22 }
 0x22b   : > { %4767 = vrot.lane.b32.xlu0 %v4757_v8, %s5849_s20  ;;  %4759 = vrot.lane.b32.xlu1 %v4755_v14, %s5850_s23  ;;  %v1442_v8 = vrot.slane %v1425_v15, %v5998_v7  ;;  %v1469_v15 = vmul.f32 %v1438_v56, %v7167_v4  ;;  %v1856_v22 = vmax.f32 %v1855_v44, 0.0 }
 0x22c   : > { %v7263_v2 = vpop.permute.xlu1 %1375  ;;  %v2038_v38 = vsub.f32 1.0, %v2037_v28  ;;  %v7333_v9 = vadd.f32 %v1656_v31, %v1473_v20 }
 0x22d   : > { %v7266_v24 = vpop.permute.xlu0 %1889  ;;  %v1470_v13 = vmul.f32 %v1442_v8, %v7233_v57  ;;  %v7314_v30 = vadd.f32 %v1652_v12, %v1469_v15  ;;  %v1927_v36 = vcombine.high %v1856_v22, %v1856_v22 }
 0x22e   : > { %v2039_v61 = vmax.f32 %v2038_v38, 0.0 }
 0x22f   : > { %4763 = vrot.lane.b32.xlu1 %v4756_v5, %s5841_s28  ;;  %5657 = vrot.lane.b32.xlu0 %v7833_v10, %s5855_s25 }
 0x230   : > { %v1517_v19 = vpop.permute.xlu1 %1516 }
 0x231   : > { %v7278_v43 = vpop.permute.xlu0 %1903  ;;  %v1651_v23 = vmul.f32 %v1617_v50, %v1517_v19 }
 0x233   : > { %5647 = vrot.lane.b32.xlu1 %v6928_v25, %s5855_s25  ;;  %5667 = vrot.lane.b32.xlu0 %v7836_v54, %s5855_s25  ;;  %v1430_v25 = vrot.slane %v1401_v62, %v5998_v7  ;;  %v1468_v62 = vmul.f32 %v1434_v6, %v7224_v39  ;;  %v1654_v39 = vmul.f32 %v1629_v58, %v7227_v35 }
 0x234   : > { %v1531_v14 = vpop.permute.xlu1 %1530 }
 0x235   : > { %v1653_v47 = vmul.f32 %v1625_v17, %v1531_v14  ;;  %v7297_v5 = vpop.permute.xlu0 %1917  ;;  %v1467_v4 = vmul.f32 %v1430_v25, %v7149_v32  ;;  %v7322_v50 = vadd.f32 %v1651_v23, %v1468_v62  ;;  %v1458_v32 = vrot.slane %v1426_v45, %v5998_v7 }
 0x236   : > { %v7341_v8 = vadd.f32 %v1654_v39, %v1471_v1  ;;  %v2110_v62 = vcombine.high %v2039_v61, %v2039_v61 }
 0x237   : > { %5652 = vrot.lane.b32.xlu1 %v7833_v10, %s5854_s24  ;;  %5677 = vrot.lane.b32.xlu0 %v6947_v0, %s5855_s25  ;;  %v7311_v57 = vadd.f32 %v1653_v47, %v1470_v13  ;;  %v1641_v10 = vrot.slane %v1609_v63, %v5998_v7  ;;  %v7324_v60 = vadd.f32 %v1650_v51, %v1467_v4 }
 0x238   : > { %v1545_v19 = vpop.permute.xlu1 %1544  ;;  %v1474_v14 = vmul.f32 %v1458_v32, %v7263_v2  ;;  %v2117_v13 = vrot.slane %v2039_v61, %v6155_v27  ;;  %v2124_v1 = vrot.slane %v2110_v62, %v6155_v27 }
 0x239   : > { %v7316_v34 = vpop.permute.xlu0 %2058  ;;  %v1694_v35 = vcombine.low %v7322_v50, %v7311_v57  ;;  %v1655_v58 = vmul.f32 %v1633_v42, %v1545_v19  ;;  %v1678_v21 = vcombine.low %v7324_v60, %v7314_v30  ;;  %v1710_v42 = vcombine.low %v7341_v8, %v7333_v9 }
 0x23b   : > { %5662 = vrot.lane.b32.xlu1 %v7836_v54, %s5854_s24  ;;  %5687 = vrot.lane.b32.xlu0 %v7837_v26, %s5855_s25  ;;  %v1472_v54 = vmul.f32 %v1450_v40, %v7246_v55  ;;  %v1702_v56 = vrot.slane %v1694_v35, %v6253_v11  ;;  %v1686_v2 = vrot.slane %v1678_v21, %v6253_v11 }
 0x23c   : > { %v1559_v17 = vpop.permute.xlu1 %1558  ;;  %v1718_v23 = vrot.slane %v1710_v42, %v6253_v11 }
 0x23d   : > { %v7339_v33 = vpop.permute.xlu0 %2072  ;;  %v1657_v63 = vmul.f32 %v1641_v10, %v1559_v17  ;;  %v7350_v12 = vadd.f32 %v1655_v58, %v1472_v54  ;;  %v1742_v28 = vcombine.low %v1686_v2, %v1702_v56  ;;  %v1743_v15 = vcombine.high %v1686_v2, %v1702_v56 }
 0x23e   : > { %v2125_v10 = vcombine.high %v2117_v13, %v2117_v13 }
 0x23f   : > { %5672 = vrot.lane.b32.xlu1 %v6947_v0, %s5854_s24  ;;  %v7352_v47 = vadd.f32 %v1657_v63, %v1474_v14  ;;  %v1934_v0 = vrot.slane %v1856_v22, %v6155_v27  ;;  %v1757_v20 = vrot.slane %v1743_v15, %v6271_v3  ;;  %v7374_v38 = vrot.slane %v1742_v28, %v6271_v3 }
 0x240   : > { %v7354_v25 = vpop.permute.xlu1 %1882  ;;  %v2133_v14 = vrot.slane %v2117_v13, %v6155_v27  ;;  %v2147_v22 = vrot.slane %v2125_v10, %v6155_v27 }
 0x241   : > { %v7356_v55 = vpop.permute.xlu0 %2086  ;;  %v1726_v6 = vcombine.low %v7350_v12, %v7352_v47  ;;  %v1942_v4 = vcombine.high %v1934_v0, %v1934_v0  ;;  %v7380_v32 = vrot.slane %v1934_v0, %v6155_v27 }
 0x242   : > { %v2155_v28 = vcombine.high %v2133_v14, %v2133_v14 }
 0x243   : > { %5682 = vrot.lane.b32.xlu1 %v7837_v26, %s5854_s24  ;;  %v1734_v51 = vrot.slane %v1726_v6, %v6253_v11  ;;  %v1941_v26 = vrot.slane %v1927_v36, %v6155_v27  ;;  %v1964_v63 = vrot.slane %v1942_v4, %v6155_v27  ;;  %v1972_v56 = vcombine.high %v7380_v32, %v7380_v32 }
 0x244   : > { %v1897_v45 = vpop.permute.xlu1 %1896  ;;  %v2140_v6 = vrot.slane %v2124_v1, %v6155_v27  ;;  %v7838_v36 = vmov 0.0  }
 0x245   : > { %v7367_v31 = vpop.permute.xlu0 %2100  ;;  %v1774_v19 = vcombine.low %v1718_v23, %v1734_v51  ;;  %v1775_v44 = vcombine.high %v1718_v23, %v1734_v51  ;;  %v1943_v0 = vcombine.high %v1941_v26, %v1941_v26  ;;  %v1974_v15 = vcombine.high %v1964_v63, %v1964_v63 }
 0x246   : > { %v2157_v51 = vcombine.high %v2147_v22, %v2147_v22  ;;  %v1957_v62 = vrot.slane %v1941_v26, %v6155_v27  ;;  %v1987_v10 = vrot.slane %v1972_v56, %v5998_v7 }
 0x247   : > { %v1789_v39 = vrot.slane %v1775_v44, %v6271_v3  ;;  %v7377_v40 = vrot.slane %v1774_v19, %v6271_v3  ;;  %v2126_v44 = vcombine.high %v2124_v1, %v2124_v1  ;;  %v1983_v1 = vrot.slane %v1964_v63, %v5998_v7 }
 0x248   : > { %v7369_v46 = vpop.permute.xlu1 %1910  ;;  %v1973_v26 = vcombine.high %v1957_v62, %v1957_v62  ;;  %v2018_v63 = vmul.f32 %v1987_v10, %v7266_v24 }
 0x249   : > { %v5598_v35 = vpop.permute.xlu0 %5597  ;;  %v1808_v21 = vcombine.low %v1757_v20, %v1789_v39  ;;  %v1807_v54 = vcombine.high %v7374_v38, %v7377_v40  ;;  %v1809_v13 = vcombine.high %v1757_v20, %v1789_v39  ;;  %v2156_v20 = vcombine.high %v2140_v6, %v2140_v6 }
 0x24a   : > { %v5600_v58 = vunpack.i.h.bf16 %v5598_v35  ;;  %v5599_v17 = vunpack.i.l.bf16 %v5598_v35  ;;  %v1971_v39 = vrot.slane %v1943_v0, %v6155_v27  ;;  %v2170_v35 = vrot.slane %v2155_v28, %v5998_v7 }
 0x24b   : > { %1819 = vrot.lane.b32.xlu0 %v1808_v21, %s5845_s4  ;;  %1815 = vrot.lane.b32.xlu1 %v1807_v54, %s5841_s28  ;;  %v2174_v21 = vrot.slane %v2157_v51, %v5998_v7  ;;  %v2162_v54 = vrot.slane %v2133_v14, %v5998_v7  ;;  %v2186_v51 = vrot.slane %v2156_v20, %v5998_v7 }
 0x24c   : > { %v7391_v61 = vpop.permute.xlu1 %1924  ;;  %v5354_v42 = vpack.c.bf16 %v5600_v58, %v5599_v17  ;;  %v1991_v58 = vrot.slane %v1974_v15, %v5998_v7  ;;  %v2166_v17 = vrot.slane %v2147_v22, %v5998_v7  ;;  %v2201_v56 = vmul.f32 %v2170_v35, %v7339_v33 }
 0x24d   : > { %v7395_v2 = vpop.permute.xlu0 %2846  ;;  %v1979_v22 = vrot.slane %v7380_v32, %v5998_v7  ;;  %v1975_v14 = vcombine.high %v1971_v39, %v1971_v39  ;;  %v7839_v33 = vmov 0.0|0.0   ;;  %v2205_v32 = vmul.f32 %v2186_v51, %v7367_v31 }
 0x24e   : > { %5355 = vmatpush3.bf16.msra.mxu1 %v5354_v42  ;;  %v2019_v0 = vmul.f32 %v1991_v58, %v1897_v45  ;;  %v2003_v45 = vrot.slane %v1973_v26, %v5998_v7  ;;  %v7430_v58 = vadd.f32 %v2201_v56, %v2018_v63  ;;  %v1999_v31 = vrot.slane %v1971_v39, %v5998_v7 }
 0x24f   : > { %5228 = vmatprep.subr.mxu1 %v7838_v36  ;;  %1823 = vrot.lane.b32.xlu0 %v1809_v13, %s5842_s29  ;;  %v2154_v13 = vrot.slane %v2126_v44, %v6155_v27  ;;  %v2199_v27 = vmul.f32 %v2162_v54, %v7316_v34  ;;  %v2017_v44 = vmul.f32 %v1983_v1, %v7354_v25 }
 0x250   : > { %v2066_v19 = vpop.permute.xlu1 %2065  ;;  %v1995_v25 = vrot.slane %v1957_v62, %v5998_v7  ;;  %v2022_v10 = vmul.f32 %v2003_v45, %v7297_v5 }
 0x251   : > { %v7403_v4 = vpop.permute.xlu0 %2850  ;;  %v2200_v28 = vmul.f32 %v2166_v17, %v2066_v19  ;;  %v2178_v19 = vrot.slane %v2140_v6, %v5998_v7  ;;  %v2158_v20 = vcombine.high %v2154_v13, %v2154_v13  ;;  %v2182_v6 = vrot.slane %v2154_v13, %v5998_v7 }
 0x252   : > { %v2020_v54 = vmul.f32 %v1995_v25, %v7278_v43  ;;  %v7447_v1 = vadd.f32 %v2205_v32, %v2022_v10  ;;  %v2021_v43 = vmul.f32 %v1999_v31, %v7369_v46 }
 0x253   : > { %5692 = vrot.lane.b32.xlu0 %v6962_v29, %s5854_s24  ;;  %v7432_v24 = vadd.f32 %v2200_v28, %v2017_v44  ;;  %v2203_v17 = vmul.f32 %v2178_v19, %v7356_v55  ;;  %v2190_v5 = vrot.slane %v2158_v20, %v5998_v7  ;;  %v1727_v55 = vcombine.high %v7350_v12, %v7352_v47 }
 0x254   : > { %v2080_v42 = vpop.permute.xlu1 %2079  ;;  %v1711_v28 = vcombine.high %v7341_v8, %v7333_v9  ;;  %v1695_v12 = vcombine.high %v7322_v50, %v7311_v57  ;;  %v1679_v9 = vcombine.high %v7324_v60, %v7314_v30  ;;  %v7840_v50 = vld [vmem:[#allocation21_spill] sm:$0xff] }
 0x255   : > { %v2202_v15 = vmul.f32 %v2174_v21, %v2080_v42  ;;  %v3465_v23 = vpop.permute.xlu0 %3464  ;;  %v7456_v56 = vadd.f32 %v2203_v17, %v2020_v54  ;;  %v1741_v8 = vrot.slane %v1727_v55, %v6253_v11  ;;  %v5705_v54 = vld [vmem:[%s6841_s16 + $0x18] sm:$0xff]  ;;  %v566_v55 = vld [vmem:[%s6841_s16 + $0x28] sm:$0xff] }
 0x256   : > { %5229 = vmatpush3.msra.mxu1 %v3465_v23  ;;  %v2016_v23 = vmul.f32 %v1979_v22, %v7248_v59  ;;  %v2007_v59 = vrot.slane %v1975_v14, %v5998_v7  ;;  %v5702_v14 = vld [vmem:[%s6841_s16] sm:$0xff]  ;;  %v1725_v60 = vrot.slane %v1711_v28, %v6253_v11  ;;  %v7844_v28 = vld [vmem:[#allocation8_spill] sm:$0xff] }
 0x257   : > { %v7423_v52 = vadd.f32 %v2202_v15, %v2019_v0  ;;  %5356 = vmatprep.subr.bf16.mxu1 %v7839_v33  ;;  %v2259_v15 = vcombine.low %v7456_v56, %v7447_v1 }
 0x258   : > { %v2094_v35 = vpop.permute.xlu1 %2093  ;;  %v7440_v21 = vadd.f32 %v2199_v27, %v2016_v23  ;;  %v2023_v0 = vmul.f32 %v2007_v59, %v7391_v61  ;;  %v5703_v61 = vld [vmem:[%s6841_s16 + $0x8] sm:$0xff]  ;;  %v7841_v27 = vld [vmem:[#allocation10_spill] sm:$0xff]  ;;  %v1790_v31 = vcombine.low %v1725_v60, %v1741_v8 }
 0x259   : > { %v7434_v34 = vpop.permute.xlu0 %3451  ;;  %v2243_v26 = vcombine.low %v7432_v24, %v7423_v52  ;;  %v2204_v62 = vmul.f32 %v2182_v6, %v2094_v35  ;;  %v5336_v63 = vpack.c.bf16 %v5703_v61, %v5702_v14  ;;  %v7842_v44 = vcombine.low %v7840_v50, %v7841_v27 }
 0x25a   : > { %v2227_v39 = vcombine.low %v7440_v21, %v7430_v58  ;;  %v7489_v35 = vrot.slane %v1695_v12, %v6253_v11  ;;  %v2267_v25 = vrot.slane %v2259_v15, %v6253_v11 }
 0x25b   : > { %v2251_v47 = vrot.slane %v2243_v26, %v6253_v11  ;;  %v7467_v22 = vadd.f32 %v2204_v62, %v2021_v43  ;;  %v5704_v26 = vld [vmem:[%s6841_s16 + $0x10] sm:$0xff]  ;;  %v1791_v43 = vcombine.high %v1725_v60, %v1741_v8  ;;  %v2244_v60 = vcombine.high %v7432_v24, %v7423_v52  ;;  %v5707_v24 = vld [vmem:[%s6841_s16 + $0x38] sm:$0xff] }
 0x25c   : > { %v2108_v42 = vpop.permute.xlu1 %2107  ;;  %v2235_v57 = vrot.slane %v2227_v39, %v6253_v11  ;;  %v5339_v62 = vpack.c.bf16 %v5705_v54, %v5704_v26  ;;  %v5706_v52 = vld [vmem:[%s6841_s16 + $0x30] sm:$0xff] }
 0x25d   : > { %v7454_v13 = vpop.permute.xlu0 %5612  ;;  %v2206_v7 = vmul.f32 %v2190_v5, %v2108_v42  ;;  %v565_v42 = vld [vmem:[%s6841_s16 + $0x20] sm:$0xff] }
 0x25e   : > { %v2292_v20 = vcombine.high %v2235_v57, %v2251_v47  ;;  %v2291_v10 = vcombine.low %v2235_v57, %v2251_v47  ;;  %v5342_v8 = vpack.c.bf16 %v566_v55, %v565_v42  ;;  %v7522_v57 = vrot.slane %v1790_v31, %v6271_v3 }
 0x25f   : > { %v7469_v51 = vadd.f32 %v2206_v7, %v2023_v0  ;;  %v7843_v7 = vld [vmem:[#allocation12_spill] sm:$0xff] }
 0x260   : > { %v2843_v46 = vpop.permute.xlu1 %2842  ;;  %v2306_v0 = vrot.slane %v2292_v20, %v6271_v3  ;;  %v7845_v12 = vcombine.low %v7843_v7, %v7844_v28  ;;  %v7514_v14 = vrot.slane %v2291_v10, %v6271_v3  ;;  %v7848_v10 = vld [vmem:[#allocation19_spill] sm:$0xff]  ;;  %v2258_v7 = vrot.slane %v2244_v60, %v6253_v11 }
 0x261   : > { %v2854_v45 = vsel %vm2853_vm2, %v7842_v44, %v2843_v46  ;;  %v7481_v19 = vpop.permute.xlu0 %5622  ;;  %v2275_v32 = vcombine.low %v7467_v22, %v7469_v51  ;;  %v2276_v50 = vcombine.high %v7467_v22, %v7469_v51  ;;  %v7538_v51 = vrot.slane %v1791_v43, %v6271_v3 }
 0x262   : > { %v2855_v30 = vsel %vm737_vm1, %v2854_v45, %v7395_v2  ;;  %v1693_v2 = vrot.slane %v1679_v9, %v6253_v11 }
 0x263   : > { %v2857_v23 = vsel %vm2856_vm3, %v2855_v30, %v7403_v4  ;;  %v2283_v17 = vrot.slane %v2275_v32, %v6253_v11  ;;  %v2228_v30 = vcombine.high %v7440_v21, %v7430_v58  ;;  %v569_v21 = vld [vmem:[%s6841_s16 + $0x40] sm:$0xff]  ;;  %v2290_v31 = vrot.slane %v2276_v50, %v6253_v11  ;;  %v7851_v50 = vld [vmem:[#allocation14_spill] sm:$0xff] }
 0x264   : > { %v3444_v6 = vpop.permute.xlu1 %3443  ;;  %5195 = vmatmul.mubr.msk.f32.vlgmr.msra.gmra.mrb[0].mxu0 %vm739_vm4, %v2857_v23  ;;  %v1758_v39 = vcombine.low %v1693_v2, %v7489_v35  ;;  %v7846_v23 = vld [vmem:[#allocation11_spill] sm:$0xff] }
 0x265   : > { %5337 = vmatpush3.bf16.msra.mxu0 %v5336_v63  ;;  %v7497_v59 = vpop.permute.xlu0 %1270  ;;  %5221 = vmatprep.mubr.msk.f32.mxu0 %vm5853_vm0, %v7838_v36  ;;  %v2323_v4 = vcombine.low %v2267_v25, %v2283_v17  ;;  %v2324_v5 = vcombine.high %v2267_v25, %v2283_v17  ;;  %v3454_v47 = vsel %vm2853_vm2, %v7845_v12, %v3444_v6  ;;  %v7847_v25 = vld [vmem:[#allocation18_spill] sm:$0xff] }
 0x266   : > { %5338 = vmatprep.subr.bf16.mxu0 %v7839_v33  ;;  %v1759_v63 = vcombine.high %v1693_v2, %v7489_v35  ;;  %v1766_v22 = vrot.slane %v1758_v39, %v6271_v3  ;;  %v570_v35 = vld [vmem:[%s6841_s16 + $0x48] sm:$0xff]  ;;  %v7849_v17 = vcombine.low %v7847_v25, %v7848_v10  ;;  %v5345_v2 = vpack.c.bf16 %v5707_v24, %v5706_v52 }
 0x267   : > { %v2338_v46 = vrot.slane %v2324_v5, %v6271_v3  ;;  %v7517_v61 = vrot.slane %v2323_v4, %v6271_v3  ;;  %v7850_v4 = vld [vmem:[#allocation6_spill] sm:$0xff]  ;;  %v2242_v42 = vrot.slane %v2228_v30, %v6253_v11  ;;  %v5348_v39 = vpack.c.bf16 %v570_v35, %v569_v21  ;;  %v5708_v21 = vld [vmem:[%s6841_s16 + $0x50] sm:$0xff] }
 0x268   : > { %v3448_v15 = vpop.permute.xlu1 %3447  ;;  %v738_v6 = vsel %vm737_vm1, %v7849_v17, %v7846_v23  ;;  %v1811_v26 = vcombine.high %v1766_v22, %v7522_v57  ;;  %v5709_v35 = vld [vmem:[%s6841_s16 + $0x58] sm:$0xff]  ;;  %s5714_s16 = sshll.u32 %s5858_s15, 4  ;;  %s5715_s16 = int_to_ptr.vmem [resolvable:$false] %s5714_s16 }
 0x269   : > { %v3455_v9 = vsel %vm737_vm1, %v3454_v47, %v3448_v15  ;;  %5340 = vmatpush3.bf16.msra.mxu0 %v5339_v62  ;;  %v7526_v27 = vpop.permute.xlu0 %1274  ;;  %v2358_v45 = vcombine.high %v2306_v0, %v2338_v46  ;;  %v2356_v32 = vcombine.high %v7514_v14, %v7517_v61  ;;  %v2355_v20 = vcombine.low %v7514_v14, %v7517_v61  ;;  %s5716_s18 = scalar_lea.vmem %s5715_s16, 256 }
 0x26a   : > { %v3456_v44 = vsel %vm2856_vm3, %v3455_v9, %v7434_v34  ;;  %5341 = vmatprep.subr.bf16.mxu0 %v7839_v33  ;;  %v2260_v34 = vcombine.high %v7456_v56, %v7447_v1  ;;  %v2357_v54 = vcombine.low %v2306_v0, %v2338_v46  ;;  %v1773_v62 = vrot.slane %v1759_v63, %v6271_v3 }
 0x26b   : > { %5231 = vmatmul.mubr.msk.f32.vlgmr.msra.gmra.mrb[0].mxu1 %vm739_vm4, %v3456_v44  ;;  %2372 = vrot.lane.b32.xlu0 %v2358_v45, %s5842_s29  ;;  %v740_v5 = vsel %vm739_vm4, %v738_v6, %v7850_v4  ;;  %v5615_v47 = vunpack.i.h.bf16 %v7454_v13  ;;  %v5614_v15 = vunpack.i.l.bf16 %v7454_v13  ;;  %v2307_v30 = vcombine.low %v2242_v42, %v2258_v7 }
 0x26c   : > { %2364 = vrot.lane.b32.xlu1 %v2356_v32, %s5841_s28  ;;  %v5603_v58 = vpop.permute.xlu1 %5602  ;;  %5257 = vmatprep.mubr.msk.f32.mxu1 %vm5853_vm0, %v7838_v36  ;;  %v2274_v43 = vrot.slane %v2260_v34, %v6253_v11  ;;  %v1812_v12 = vcombine.low %v1773_v62, %v7538_v51  ;;  %v1810_v11 = vcombine.low %v1766_v22, %v7522_v57  ;;  %v7852_v32 = vld [vmem:[#allocation24_spill] sm:$0xff]  ;;  %s169_s28 = sand.u32 1, %s5772_s10  }
 0x26d   : > { %v5605_v1 = vunpack.i.h.bf16 %v5603_v58  ;;  %v5604_v56 = vunpack.i.l.bf16 %v5603_v58  ;;  %5343 = vmatpush3.bf16.msra.mxu0 %v5342_v8  ;;  %v7568_v28 = vpop.permute.xlu0 %1282  ;;  %v742_v44 = vsel %vm741_vm5, %v740_v5, %v7851_v50  ;;  %v2308_v34 = vcombine.high %v2242_v42, %v2258_v7  ;;  %s5101_s29 = sshll.u32 %s169_s28, 3 }
 0x26e   : > { %5344 = vmatprep.subr.bf16.mxu0 %v7839_v33  ;;  %v2339_v9 = vcombine.low %v2274_v43, %v2290_v31  ;;  %v2340_v8 = vcombine.high %v2274_v43, %v2290_v31  ;;  %v744_v13 = vsel %vm743_vm6, %v742_v44, %v7852_v32  ;;  %v5363_v22 = vpack.c.bf16 %v5615_v47, %v5614_v15 }
 0x26f   : > { %v5357_v55 = vpack.c.bf16 %v5605_v1, %v5604_v56  ;;  %1831 = vrot.lane.b32.xlu0 %v1811_v26, %s5843_s30  ;;  %v5351_v23 = vpack.c.bf16 %v5709_v35, %v5708_v21  ;;  %v1813_v10 = vcombine.high %v1773_v62, %v7538_v51  ;;  %v7853_v1 = vld [vmem:[#allocation17_spill] sm:$0xff]  ;;  %v2322_v51 = vrot.slane %v2308_v34, %v6271_v3 }
 0x270   : > { %2368 = vrot.lane.b32.xlu1 %v2357_v54, %s5845_s4  ;;  %v5608_v0 = vpop.permute.xlu1 %5607  ;;  %v2354_v17 = vrot.slane %v2340_v8, %v6271_v3  ;;  %v2347_v6 = vrot.slane %v2339_v9, %v6271_v3  ;;  %v746_v56 = vsel %vm745_vm7, %v744_v13, %v7853_v1  ;;  %v2315_v24 = vrot.slane %v2307_v30, %v6271_v3  ;;  %v7856_v3 = vld [vmem:[#allocation23_spill] sm:$0xff] }
 0x271   : > { %v5610_v46 = vunpack.i.h.bf16 %v5608_v0  ;;  %v5609_v63 = vunpack.i.l.bf16 %v5608_v0  ;;  %5346 = vmatpush3.bf16.msra.mxu0 %v5345_v2  ;;  %5358 = vmatpush3.bf16.msra.mxu1 %v5357_v55  ;;  %v1287_v25 = vpop.permute.xlu0 %1286  ;;  %v7854_v2 = vld [vmem:[#allocation7_spill] sm:$0xff]  ;;  %v5625_v26 = vunpack.i.h.bf16 %v7481_v19  ;;  %v5624_v54 = vunpack.i.l.bf16 %v7481_v19 }
 0x272   : > { %5347 = vmatprep.subr.bf16.mxu0 %v7839_v33  ;;  %5359 = vmatprep.subr.bf16.mxu1 %v7839_v33  ;;  %v748_v31 = vsel %vm747_vm8, %v746_v56, %v7854_v2  ;;  %v7855_v4 = vcombine.low %v6855_v48, %v6848_v18  ;;  %v2362_v5 = vcombine.high %v2322_v51, %v2354_v17 }
 0x273   : > { %v5360_v45 = vpack.c.bf16 %v5610_v46, %v5609_v63  ;;  %1835 = vrot.lane.b32.xlu0 %v1812_v12, %s5847_s6  ;;  %v2359_v42 = vcombine.low %v2315_v24, %v2347_v6  ;;  %v750_v55 = vsel %vm749_vm9, %v748_v31, %v7856_v3  ;;  %v5369_v43 = vpack.c.bf16 %v5625_v26, %v5624_v54 }
 0x274   : > { %1827 = vrot.lane.b32.xlu1 %v1810_v11, %s5846_s5  ;;  %v5618_v57 = vpop.permute.xlu1 %5617  ;;  %v2360_v0 = vcombine.high %v2315_v24, %v2347_v6  ;;  %v2361_v9 = vcombine.low %v2322_v51, %v2354_v17 }
 0x275   : > { %v5620_v60 = vunpack.i.h.bf16 %v5618_v57  ;;  %v5619_v58 = vunpack.i.l.bf16 %v5618_v57  ;;  %5349 = vmatpush3.bf16.msra.mxu0 %v5348_v39  ;;  %5361 = vmatpush3.bf16.msra.mxu1 %v5360_v45  ;;  %v1291_v39 = vpop.permute.xlu0 %1290 }
 0x276   : > { %5350 = vmatprep.subr.bf16.mxu0 %v7839_v33  ;;  %5362 = vmatprep.subr.bf16.mxu1 %v7839_v33 }
 0x277   : > { %1839 = vrot.lane.b32.xlu0 %v1813_v10, %s5844_s3  ;;  %v5366_v62 = vpack.c.bf16 %v5620_v60, %v5619_v58 }
 0x278   : > { %5697 = vrot.lane.b32.xlu1 %v6962_v29, %s5855_s25  ;;  %v1267_v52 = vpop.permute.xlu1 %1266 }
 0x279   : > { %5352 = vmatpush3.bf16.msra.mxu0 %v5351_v23  ;;  %5364 = vmatpush3.bf16.msra.mxu1 %v5363_v22  ;;  %v1293_v29 = vsel %vm737_vm1, %v7855_v4, %v1267_v52 }
 0x27a   : > { %5365 = vmatprep.subr.bf16.mxu1 %v7839_v33  ;;  %5374 = vmatprep.subr.bf16.mxu0 %v7839_v33  ;;  %v1294_v18 = vsel %vm739_vm4, %v1293_v29, %v7497_v59 }
 0x27b   : > { %2388 = vrot.lane.b32.xlu0 %v2362_v5, %s5844_s3  ;;  %v1295_v47 = vsel %vm741_vm5, %v1294_v18, %v7526_v27  ;;  %s171_s3 = scalar_lea.vmem [#allocation2], %s5101_s29 }
 0x27c   : > { %2376 = vrot.lane.b32.xlu1 %v2359_v42, %s5846_s5  ;;  %v5628_v19 = vpop.permute.xlu1 %5627  ;;  %5222 = vmatmul.mubr.msk.f32.vlgmr.msra.gmra.mrb[0].mxu0 %vm2931_vm10, %v750_v55  ;;  %s5013_s5 = sshll.u32 %s171_s3, 4  ;;  %s7694_s5 = int_to_ptr.vmem [resolvable:$true] %s5013_s5 }
 0x27d   : > { %v5630_v48 = vunpack.i.h.bf16 %v5628_v19  ;;  %v5629_v7 = vunpack.i.l.bf16 %v5628_v19  ;;  %5367 = vmatpush3.bf16.msra.mxu1 %v5366_v62  ;;  %5266 = vmatprep.mubr.msk.f32.mxu0 %vm5853_vm0, %v7838_v36  ;;  %v4106_v12 = vpop.permute.xlu0 %4105  ;;  %p5717_p1 = scmp.lt.s32.totalorder %s7694_s5, %s5715_s16 }
 0x27e   : > { %5368 = vmatprep.subr.bf16.mxu1 %v7839_v33 }
 0x27f   : > { %v5372_v46 = vpack.c.bf16 %v5630_v48, %v5629_v7 }
 0x280   : > { %2380 = vrot.lane.b32.xlu1 %v2360_v0, %s5843_s30  ;;  %v1279_v15 = vpop.permute.xlu1 %1278  ;;  %s5117_s30 = sshll.u32 %s5780_s12, 7  ;;  %s4999_s12 = scalar_lea.sflag [#allocation3], %s169_s28 }
 0x281   : > { %v1296_v59 = vsel %vm743_vm6, %v1295_v47, %v1279_v15  ;;  %5370 = vmatpush3.bf16.msra.mxu1 %v5369_v43  ;;  %v5643_v27 = vpop.permute.xlu0 %5642  ;;  %s7692_s8 = scalar_lea.hbm %s7742_s2, %s5117_s30 }
 0x282   : > { %v1297_v63 = vsel %vm745_vm7, %v1296_v59, %v7568_v28  ;;  %5371 = vmatprep.subr.bf16.mxu1 %v7839_v33  ;;  %v5645_v34 = vunpack.i.h.bf16 %v5643_v27  ;;  %v5644_v57 = vunpack.i.l.bf16 %v5643_v27 }
 0x283   : > { %v1298_v8 = vsel %vm747_vm8, %v1297_v63, %v1287_v25 }
 0x284   : > { %2384 = vrot.lane.b32.xlu1 %v2361_v9, %s5847_s6  ;;  %v5633_v11 = vpop.permute.xlu1 %5632  ;;  %v1299_v32 = vsel %vm749_vm9, %v1298_v8, %v1291_v39  ;;  %v5378_v23 = vpack.c.bf16 %v5645_v34, %v5644_v57 }
 0x285   : > { %v5635_v50 = vunpack.i.h.bf16 %v5633_v11  ;;  %v5634_v44 = vunpack.i.l.bf16 %v5633_v11  ;;  %5373 = vmatpush3.bf16.msra.mxu1 %v5372_v46  ;;  %v4110_v60 = vpop.permute.xlu0 %4109 }
 0x286   : > { %5395 = vmatprep.subr.bf16.mxu1 %v7839_v33 }
 0x287   : > { %v5375_v45 = vpack.c.bf16 %v5635_v50, %v5634_v44 }
 0x288   : > { %v5638_v13 = vpop.permute.xlu1 %5637  ;;  %5258 = vmatmul.mubr.msk.f32.vlgmr.msra.gmra.mrb[0].mxu1 %vm2931_vm10, %v1299_v32 }
 0x289   : > { %v5640_v28 = vunpack.i.h.bf16 %v5638_v13  ;;  %v5639_v30 = vunpack.i.l.bf16 %v5638_v13  ;;  %5376 = vmatpush3.bf16.msra.mxu0 %v5375_v45  ;;  %5302 = vmatprep.mubr.msk.f32.mxu1 %vm5853_vm0, %v7838_v36  ;;  %v4781_v10 = vpop.permute.xlu0 %4780 }
 0x28a   : > { %5264 = vmatprep.subr.mxu0 %v7838_v36 }
 0x28b   : > { %v5396_v22 = vpack.c.bf16 %v5640_v28, %v5639_v30 }
 0x28c   : > { %v4102_v58 = vpop.permute.xlu1 %4101 }
 0x28d   : > { %v4112_v21 = vsel %vm2853_vm2, %v4096_v41, %v4102_v58  ;;  %5397 = vmatpush3.bf16.msra.mxu1 %v5396_v22  ;;  %v7857_v41 = vcombine.low %v7241_v37, %v7244_v53 }
 0x28e   : > { %v4113_v35 = vsel %vm737_vm1, %v4112_v21, %v4106_v12  ;;  %5300 = vmatprep.subr.mxu1 %v7838_v36  ;;  %v7858_v21 = vcombine.low %v7374_v38, %v7377_v40 }
 0x28f   : > { %v4114_v17 = vsel %vm2856_vm3, %v4113_v35, %v4110_v60 }
 0x290   : > { %v4123_v25 = vpop.permute.xlu1 %4122 }
 0x291   : > { %5265 = vmatpush3.msra.mxu0 %v4123_v25  ;;  %5301 = vmatpush3.msra.mxu1 %v4781_v10 }
 0x292   : > { %5267 = vmatmul.mubr.msk.f32.vlgmr.msra.gmra.mrb[2].mxu0 %vm739_vm4, %v4114_v17  ;;  %5377 = vmatprep.subr.bf16.mxu0 %v7839_v33 }
 0x293   : > { %5379 = vmatpush3.bf16.msra.mxu0 %v5378_v23  ;;  %5398 = vmatprep.subr.bf16.mxu1 %v7839_v33 }
 0x294   : > { %5380 = vmatprep.subr.bf16.mxu0 %v7839_v33  ;;  %5293 = vmatprep.mubr.msk.f32.mxu0 %vm5853_vm0, %v7838_v36 }
 0x29d   : > { %v4768_v49 = vpop.permute.xlu0 %4767  ;;  %v4760_v16 = vpop.permute.xlu1 %4759 }
 0x29e   : > { %v4770_v6 = vsel %vm2853_vm2, %v7857_v41, %v4760_v16 }
 0x2a1   : > { %v4764_v1 = vpop.permute.xlu1 %4763  ;;  %v5658_v56 = vpop.permute.xlu0 %5657 }
 0x2a2   : > { %v4771_v52 = vsel %vm737_vm1, %v4770_v6, %v4764_v1  ;;  %v5660_v2 = vunpack.i.h.bf16 %v5658_v56  ;;  %v5659_v31 = vunpack.i.l.bf16 %v5658_v56 }
 0x2a3   : > { %v4772_v51 = vsel %vm2856_vm3, %v4771_v52, %v4768_v49 }
 0x2a4   : > { %5303 = vmatmul.mubr.msk.f32.vlgmr.msra.gmra.mrb[2].mxu1 %vm739_vm4, %v4772_v51  ;;  %v5402_v53 = vpack.c.bf16 %v5660_v2, %v5659_v31 }
 0x2a5   : > { %v5648_v24 = vpop.permute.xlu1 %5647  ;;  %v5668_v26 = vpop.permute.xlu0 %5667  ;;  %5329 = vmatprep.mubr.msk.f32.mxu1 %vm5853_vm0, %v7838_v36 }
 0x2a6   : > { %v5650_v54 = vunpack.i.h.bf16 %v5648_v24  ;;  %v5649_v62 = vunpack.i.l.bf16 %v5648_v24  ;;  %v5670_v42 = vunpack.i.h.bf16 %v5668_v26  ;;  %v5669_v3 = vunpack.i.l.bf16 %v5668_v26 }
 0x2a8   : > { %v5399_v37 = vpack.c.bf16 %v5650_v54, %v5649_v62  ;;  %v5405_v48 = vpack.c.bf16 %v5670_v42, %v5669_v3 }
 0x2a9   : > { %v5653_v4 = vpop.permute.xlu1 %5652  ;;  %v5678_v55 = vpop.permute.xlu0 %5677 }
 0x2aa   : > { %v5655_v29 = vunpack.i.h.bf16 %v5653_v4  ;;  %v5654_v5 = vunpack.i.l.bf16 %v5653_v4  ;;  %5400 = vmatpush3.bf16.msra.mxu1 %v5399_v37  ;;  %v5680_v43 = vunpack.i.h.bf16 %v5678_v55  ;;  %v5679_v18 = vunpack.i.l.bf16 %v5678_v55 }
 0x2ab   : > { %5401 = vmatprep.subr.bf16.mxu1 %v7839_v33 }
 0x2ac   : > { %v5381_v39 = vpack.c.bf16 %v5655_v29, %v5654_v5  ;;  %v5408_v12 = vpack.c.bf16 %v5680_v43, %v5679_v18 }
 0x2ad   : > { %v5663_v19 = vpop.permute.xlu1 %5662  ;;  %v5688_v15 = vpop.permute.xlu0 %5687 }
 0x2ae   : > { %v5665_v7 = vunpack.i.h.bf16 %v5663_v19  ;;  %v5664_v36 = vunpack.i.l.bf16 %v5663_v19  ;;  %5382 = vmatpush3.bf16.msra.mxu0 %v5381_v39  ;;  %5403 = vmatpush3.bf16.msra.mxu1 %v5402_v53  ;;  %v5690_v63 = vunpack.i.h.bf16 %v5688_v15  ;;  %v5689_v9 = vunpack.i.l.bf16 %v5688_v15 }
 0x2af   : > { %5383 = vmatprep.subr.bf16.mxu0 %v7839_v33  ;;  %5404 = vmatprep.subr.bf16.mxu1 %v7839_v33 }
 0x2b0   : > { %v5384_v0 = vpack.c.bf16 %v5665_v7, %v5664_v36  ;;  %v5411_v50 = vpack.c.bf16 %v5690_v63, %v5689_v9 }
 0x2b1   : > { %v5673_v47 = vpop.permute.xlu1 %5672 }
 0x2b2   : > { %v5675_v46 = vunpack.i.h.bf16 %v5673_v47  ;;  %v5674_v59 = vunpack.i.l.bf16 %v5673_v47  ;;  %5385 = vmatpush3.bf16.msra.mxu0 %v5384_v0  ;;  %5406 = vmatpush3.bf16.msra.mxu1 %v5405_v48 }
 0x2b3   : > { %5386 = vmatprep.subr.bf16.mxu0 %v7839_v33  ;;  %5407 = vmatprep.subr.bf16.mxu1 %v7839_v33 }
 0x2b4   : > { %v5387_v8 = vpack.c.bf16 %v5675_v46, %v5674_v59 }
 0x2b5   : > { %v5683_v11 = vpop.permute.xlu1 %5682 }
 0x2b6   : > { %v5685_v44 = vunpack.i.h.bf16 %v5683_v11  ;;  %v5684_v27 = vunpack.i.l.bf16 %v5683_v11  ;;  %5388 = vmatpush3.bf16.msra.mxu0 %v5387_v8  ;;  %5409 = vmatpush3.bf16.msra.mxu1 %v5408_v12 }
 0x2b7   : > { %5389 = vmatprep.subr.bf16.mxu0 %v7839_v33  ;;  %5410 = vmatprep.subr.bf16.mxu1 %v7839_v33 }
 0x2b8   : > { %v5390_v45 = vpack.c.bf16 %v5685_v44, %v5684_v27 }
 0x2ba   : > { %5391 = vmatpush3.bf16.msra.mxu0 %v5390_v45  ;;  %5412 = vmatpush3.bf16.msra.mxu1 %v5411_v50 }
 0x2bb   : > { %5392 = vmatprep.subr.bf16.mxu0 %v7839_v33  ;;  %5413 = vmatprep.subr.bf16.mxu1 %v7839_v33 }
 0x2bd   : > { %v1820_v32 = vpop.permute.xlu0 %1819  ;;  %v1816_v22 = vpop.permute.xlu1 %1815 }
 0x2be   : > { %v1842_v35 = vsel %vm737_vm1, %v7858_v21, %v1816_v22 }
 0x2bf   : > { %v1843_v10 = vsel %vm739_vm4, %v1842_v35, %v1820_v32 }
 0x2c1   : > { %v1824_v13 = vpop.permute.xlu0 %1823 }
 0x2c2   : > { %v1844_v33 = vsel %vm741_vm5, %v1843_v10, %v1824_v13 }
 0x2c5   : > { %v5693_v28 = vpop.permute.xlu0 %5692 }
 0x2c6   : > { %v5695_v30 = vunpack.i.h.bf16 %v5693_v28  ;;  %v5694_v34 = vunpack.i.l.bf16 %v5693_v28 }
 0x2c8   : > { %v5393_v57 = vpack.c.bf16 %v5695_v30, %v5694_v34 }
 0x2ca   : > { %5394 = vmatpush3.bf16.msra.mxu0 %v5393_v57 }
 0x2dd   : > { %v2373_v60 = vpop.permute.xlu0 %2372 }
 0x2de   : > { %v2365_v58 = vpop.permute.xlu1 %2364 }
 0x2df   : > { %v2391_v2 = vsel %vm737_vm1, %v2355_v20, %v2365_v58 }
 0x2e1   : > { %v1832_v23 = vpop.permute.xlu0 %1831 }
 0x2e2   : > { %v2369_v25 = vpop.permute.xlu1 %2368 }
 0x2e3   : > { %v2392_v31 = vsel %vm739_vm4, %v2391_v2, %v2369_v25 }
 0x2e4   : > { %v2393_v54 = vsel %vm741_vm5, %v2392_v31, %v2373_v60 }
 0x2e5   : > { %v1836_v17 = vpop.permute.xlu0 %1835 }
 0x2e6   : > { %v1828_v49 = vpop.permute.xlu1 %1827 }
 0x2e7   : > { %v1845_v16 = vsel %vm743_vm6, %v1844_v33, %v1828_v49 }
 0x2e8   : > { %v1846_v41 = vsel %vm745_vm7, %v1845_v16, %v1832_v23 }
 0x2e9   : > { %v1847_v6 = vsel %vm747_vm8, %v1846_v41, %v1836_v17  ;;  %v1840_v1 = vpop.permute.xlu0 %1839 }
 0x2ea   : > { %v5698_v56 = vpop.permute.xlu1 %5697  ;;  %v1848_v38 = vsel %vm749_vm9, %v1847_v6, %v1840_v1 }
 0x2eb   : > { %v5700_v40 = vunpack.i.h.bf16 %v5698_v56  ;;  %v5699_v52 = vunpack.i.l.bf16 %v5698_v56  ;;  %5294 = vmatmul.mubr.msk.f32.vlgmr.msra.gmra.mrb[2].mxu0 %vm2931_vm10, %v1848_v38 }
 0x2ed   : > { %v5414_v51 = vpack.c.bf16 %v5700_v40, %v5699_v52  ;;  %v2389_v4 = vpop.permute.xlu0 %2388 }
 0x2ee   : > { %v2377_v24 = vpop.permute.xlu1 %2376 }
 0x2ef   : > { %5415 = vmatpush3.bf16.msra.mxu1 %v5414_v51  ;;  %v2394_v62 = vsel %vm743_vm6, %v2393_v54, %v2377_v24 }
 0x2f2   : > { %v2381_v26 = vpop.permute.xlu1 %2380 }
 0x2f3   : > { %v2395_v37 = vsel %vm745_vm7, %v2394_v62, %v2381_v26 }
 0x2f6   : > { %v2385_v53 = vpop.permute.xlu1 %2384 }
 0x2f7   : > { %v2396_v29 = vsel %vm747_vm8, %v2395_v37, %v2385_v53 }
 0x2f8   : > { %v2397_v5 = vsel %vm749_vm9, %v2396_v29, %v2389_v4 }
 0x2f9   : > { %5330 = vmatmul.mubr.msk.f32.vlgmr.msra.gmra.mrb[2].mxu1 %vm2931_vm10, %v2397_v5 }
 0x34f   : > { %v3001_v14 = vpop.f32.mrb[0].mxu0 }
 0x350   : > { %v5223_v61 = vpop.f32.mrb[1].mxu0 }
 0x35b   : > { %v3659_v20 = vpop.f32.mrb[0].mxu1 }
 0x35c   : > { %4980 = vrot.lane.b32.xlu1 %v3659_v20, %s5856_s26  ;;  %v5259_v42 = vpop.f32.mrb[1].mxu1 }
 0x3be   : > { %v4317_v3 = vpop.f32.mrb[2].mxu0 }
 0x3bf   : > { %4984 = vrot.lane.b32.xlu0 %v4317_v3, %s5857_s27  ;;  %v5295_v55 = vpop.f32.mrb[3].mxu0 }
 0x3cc   : > { %v4975_v39 = vpop.f32.mrb[2].mxu1 }
 0x3cd   : > { %4988 = vrot.lane.b32.xlu1 %v4975_v39, %s5845_s4  ;;  %v5331_v19 = vpop.f32.mrb[3].mxu1  ;;  %s5710_s4 = scalar_lea.vmem %s7694_s5, 128 }
 0x3ce   : > { %v4981_v43 = vpop.permute.xlu1 %4980  ;;  %p5711_p12 = scmp.ne.s32.totalorder %s7694_s5, %s5710_s4  ;;  %p5718_p2 = scmp.lt.s32.totalorder %s5716_s18, %s5710_s4 }
 0x3cf   : > { %v4992_v48 = vsel %vm4991_vm11, %v3001_v14, %v4981_v43 }
 0x3d0   : > { %p5712_p13 = pnand %p5711_p12, %p5914_p4  ;;  %p5719_p3 = por %p5718_p2, %p5717_p1 }
 0x3d2   : > { %p5713_p0 = pneg %p5712_p13 }
 0x3d4   : > { %p5720_p5 = pnand %p5719_p3, %p5713_p0 }
 0x431   : > { %v4985_v18 = vpop.permute.xlu0 %4984 }
 0x432   : > { %v4994_v7 = vsel %vm4993_vm12, %v4992_v48, %v4985_v18 }
 0x43f   : > { %v4989_v36 = vpop.permute.xlu1 %4988 }
 0x440   : > { %v4995_v0 = vsel %vm739_vm4, %v4994_v7, %v4989_v36 }
 0x441   : > { %4997 = vst.msk [vmem:[%s171_s3] sm:$0xff] %vm4996_vm13, %v4995_v0 }
 0x442   : > { %5723 = shalt.err (!%p5720_p5)
}
 0x443   : > { %s5724_s20 = scalar_lea.hbm %s7692_s8, 128  ;;  %s5728_s25 = scalar_lea.hbm %s7742_s2, 256 }
 0x444   : > { %p5725_p6 = scmp.ne.s32.totalorder %s7692_s8, %s5724_s20  ;;  %p5729_p10 = scmp.lt.u32.totalorder %s7692_s8, %s7742_s2 }
 0x445   : > { %p5730_p11 = scmp.lt.u32.totalorder %s5728_s25, %s5724_s20  ;;  %p5732_p13 = scmp.lt.u32.totalorder %s5724_s20, %s7692_s8 }
 0x446   : > { %p5726_p7 = pnand %p5725_p6, %p5914_p4 }
 0x447   : > { %p5731_p12 = por %p5730_p11, %p5729_p10 }
 0x448   : > { %p5727_p9 = pneg %p5726_p7 }
 0x449   : > { %p5733_p0 = por %p5732_p13, %p5731_p12 }
 0x44b   : > { %p5734_p1 = pnand %p5733_p0, %p5727_p9 }
 0x44d   : > { %5737 = shalt.err (!%p5734_p1)
}
 0x44e   : > { %5425 = dma.vmem_to_hbm [thread:$0]  (%p5914_p4), %s7694_s5, 128, %s7692_s8, %s4999_s12  }
 0x44f PF: > { %p5431_p2 = scmp.ge.s32.totalorder %s5788_s14, 2  ;;  %s5025_s28 = sand.u32 1, %s5768_s9  }
 0x450   : > { %s5026_s29 = scalar_lea.sflag [#allocation3], %s5025_s28 }
 0x451   : > { %p5428_p3 = pnand %p5431_p2, %p5921_p8 }
 0x453   : > { %5763 = dma.done.wait (!%p5428_p3), %s5026_s29, 128  }
 0x454   : > { %5765 = vsyncadd (!%p5428_p3), %s5026_s29, 4294967168  ;;  %s15_s14 = sadd.s32 1, %s5788_s14   ;;  %s7859_s9 = smov %s5772_s10 }
 0x455   : > { %p12_p5 = scmp.ge.s32.totalorder %s15_s14, 4   ;;  %s7860_s10 = smov %s5776_s11 }
 0x456   : > { %s7861_s11 = smov %s5927_s22  ;;  %s7862_s12 = smov %s5784_s13 }
 0x457   : > { %s7863_s13 = smov %s7865_s17  ;;  %14 = sbr.rel (!%p12_p5) target bundleno = 4 (0x4), region = 66 }
 0x45e   :  { %5031 = vsyncpa [#allocation3], 1 }
 0x45f   :  { %5033 = vsyncpa [#allocation3 + $0x1], 1 }

</bundles_post_ra>
